<compile_context>
chip_gen: v7x
topology: tpu7x:2x2x1
jax: 0.10.0
libtpu: 0.0.40
codegen_flags: <defaults>
</compile_context>

<pallas_src>
import jax
import jax.numpy as jnp
from jax import lax
from jax.experimental import pallas as pl
from jax.experimental.pallas import tpu as pltpu


NUM_LAYERS = 3
_BATCH_TILE = 16          # sublane-aligned batch tile (bf16 tile = 16 sublanes)


def _round_up(x, m):
    return (x + m - 1) // m * m


def _pick_seq_chunk(T, max_chunk=64):
    """Largest chunk <= max_chunk that divides T (keeps the h/c carry exact)."""
    if T <= max_chunk:
        return T
    for tc in range(max_chunk, 0, -1):
        if T % tc == 0:
            return tc
    return T


# ----------------------------- fused 3-layer LSTM -----------------------------

def _fused_lstm_kernel(x_ref,                                   # (tc, tb, E)  bf16
                       wih0_ref, wih1_ref, wih2_ref,            # (Din, 4H)    bf16
                       whh0_ref, whh1_ref, whh2_ref,            # (H, 4H)      bf16
                       b0_ref, b1_ref, b2_ref,                  # (1, 4H)      f32
                       h0_ref, c0_ref,                          # (3, tb, H)   f32
                       y_ref, hn_ref, cn_ref,                   # (tc,tb,H) bf16, (3,tb,H) f32 x2
                       gx_ref, ys_ref):                         # scratch: (tc,tb,4H) f32, (tc,tb,H) bf16
    tc, tb, _ = x_ref.shape
    H = hn_ref.shape[-1]

    # First sequence chunk of each batch tile: load the initial recurrent state.
    # hn_ref / cn_ref stay VMEM-resident across the "arbitrary" chunk axis and act
    # as the cross-chunk h/c carry; final values are written back to HBM at the end.
    @pl.when(pl.program_id(1) == 0)
    def _init():
        hn_ref[...] = h0_ref[...]
        cn_ref[...] = c0_ref[...]

    wih = (wih0_ref, wih1_ref, wih2_ref)
    whh = (whh0_ref, whh1_ref, whh2_ref)
    bias = (b0_ref, b1_ref, b2_ref)

    for layer in range(NUM_LAYERS):
        # ----- hoisted input projection: one big MXU matmul per layer per chunk ----
        src = x_ref[...] if layer == 0 else ys_ref[...]          # bf16
        d_in = src.shape[-1]
        gx = (jnp.dot(src.reshape(tc * tb, d_in), wih[layer][...],
                      preferred_element_type=jnp.float32)
              + bias[layer][...])                                # (tc*tb, 4H) f32
        gx_ref[...] = gx.reshape(tc, tb, 4 * H)

        whh_l = whh[layer][...]                                  # (H, 4H) bf16
        h_init = hn_ref[layer]                                   # (tb, H) f32 carry
        c_init = cn_ref[layer]

        def step(t, carry, whh_l=whh_l):
            h, c = carry
            gates = gx_ref[t] + jnp.dot(h.astype(jnp.bfloat16), whh_l,
                                        preferred_element_type=jnp.float32)
            i = jax.nn.sigmoid(gates[:, 0:H])
            f = jax.nn.sigmoid(gates[:, H:2 * H])
            g = jnp.tanh(gates[:, 2 * H:3 * H])
            o = jax.nn.sigmoid(gates[:, 3 * H:4 * H])
            c_new = f * c + i * g
            h_new = o * jnp.tanh(c_new)
            ys_ref[t] = h_new.astype(ys_ref.dtype)
            return (h_new, c_new)

        h_fin, c_fin = lax.fori_loop(0, tc, step, (h_init, c_init),
                                     unroll=min(tc, 8))
        hn_ref[layer] = h_fin
        cn_ref[layer] = c_fin

    # Single dense store of the top layer's activations for this chunk.
    y_ref[...] = ys_ref[...]


def fused_lstm(x_tm, lstm_params, h0, c0, *, seq_chunk=64):
    """All 3 LSTM layers in one kernel.
    x_tm: (T, Bp, E) bf16 time-major, Bp a multiple of _BATCH_TILE.
    Returns y (T, Bp, H) bf16, h_n (3, Bp, H) f32, c_n (3, Bp, H) f32."""
    T, Bp, E = x_tm.shape
    H = lstm_params[0]["w_hh"].shape[1]
    tb = _BATCH_TILE
    tc = _pick_seq_chunk(T, seq_chunk)
    nb = Bp // tb
    nc = T // tc

    wih, whh, bias = [], [], []
    for lp in lstm_params:
        wih.append(lp["w_ih"].T.astype(jnp.bfloat16))            # (Din, 4H)
        whh.append(lp["w_hh"].T.astype(jnp.bfloat16))            # (H, 4H)
        bias.append((lp["b_ih"] + lp["b_hh"]).reshape(1, 4 * H).astype(jnp.float32))

    def wspec(shape):
        return pl.BlockSpec(shape, lambda bi, c: (0, 0))

    grid_spec = pltpu.PrefetchScalarGridSpec(
        num_scalar_prefetch=0,
        grid=(nb, nc),
        in_specs=[
            pl.BlockSpec((tc, tb, E), lambda bi, c: (c, bi, 0)),
            wspec((E, 4 * H)), wspec((H, 4 * H)), wspec((H, 4 * H)),
            wspec((H, 4 * H)), wspec((H, 4 * H)), wspec((H, 4 * H)),
            wspec((1, 4 * H)), wspec((1, 4 * H)), wspec((1, 4 * H)),
            pl.BlockSpec((NUM_LAYERS, tb, H), lambda bi, c: (0, bi, 0)),
            pl.BlockSpec((NUM_LAYERS, tb, H), lambda bi, c: (0, bi, 0)),
        ],
        out_specs=(
            pl.BlockSpec((tc, tb, H), lambda bi, c: (c, bi, 0)),
            pl.BlockSpec((NUM_LAYERS, tb, H), lambda bi, c: (0, bi, 0)),
            pl.BlockSpec((NUM_LAYERS, tb, H), lambda bi, c: (0, bi, 0)),
        ),
        scratch_shapes=[
            pltpu.VMEM((tc, tb, 4 * H), jnp.float32),   # hoisted gate pre-activations
            pltpu.VMEM((tc, tb, H), jnp.bfloat16),      # inter-layer activations
        ],
    )
    out_shape = (
        jax.ShapeDtypeStruct((T, Bp, H), jnp.bfloat16),
        jax.ShapeDtypeStruct((NUM_LAYERS, Bp, H), jnp.float32),
        jax.ShapeDtypeStruct((NUM_LAYERS, Bp, H), jnp.float32),
    )
    return pl.pallas_call(
        _fused_lstm_kernel,
        out_shape=out_shape,
        grid_spec=grid_spec,
        compiler_params=pltpu.CompilerParams(
            dimension_semantics=("parallel", "arbitrary")),
    )(x_tm, wih[0], wih[1], wih[2], whh[0], whh[1], whh[2],
      bias[0], bias[1], bias[2], h0, c0)


# ------------------------------- tiled linear ---------------------------------

def _linear_kernel(x_ref, w_ref, b_ref, o_ref):
    x = x_ref[...].astype(jnp.bfloat16)
    o_ref[...] = (jnp.dot(x, w_ref[...], preferred_element_type=jnp.float32)
                  + b_ref[...])


def linear(x, w_t, bias_row, *, tn_max=512, tw_max=1024, tw_tile=512):
    """x: (N, H); w_t: (H, W) bf16; bias_row: (1, W) f32. Returns (N, W) f32."""
    N, H = x.shape
    W = w_t.shape[1]
    tn = N if N <= tn_max else tn_max            # tn_max is a multiple of 8
    tw = W if W <= tw_max else tw_tile           # tw_tile is a multiple of 128
    grid = (pl.cdiv(N, tn), pl.cdiv(W, tw))
    return pl.pallas_call(
        _linear_kernel,
        out_shape=jax.ShapeDtypeStruct((N, W), jnp.float32),
        grid_spec=pltpu.PrefetchScalarGridSpec(
            num_scalar_prefetch=0,
            grid=grid,
            in_specs=[pl.BlockSpec((tn, H), lambda i, j: (i, 0)),
                      pl.BlockSpec((H, tw), lambda i, j: (0, j)),
                      pl.BlockSpec((1, tw), lambda i, j: (0, j))],
            out_specs=pl.BlockSpec((tn, tw), lambda i, j: (i, j)),
        ),
        compiler_params=pltpu.CompilerParams(
            dimension_semantics=("parallel", "parallel")),
    )(x, w_t, bias_row)


# ------------------------------- model wrapper ---------------------------------

def init_params(key, embedding_num, hidden_num, word_size, num_layers=NUM_LAYERS):
    H = hidden_num
    scale = 1.0 / jnp.sqrt(jnp.float32(H))
    params = {"lstm": [], "linear": {}}
    for layer in range(num_layers):
        d_in = embedding_num if layer == 0 else H
        key, k1, k2, k3, k4 = jax.random.split(key, 5)
        params["lstm"].append({
            "w_ih": jax.random.uniform(k1, (4 * H, d_in), jnp.float32, -scale, scale),
            "w_hh": jax.random.uniform(k2, (4 * H, H), jnp.float32, -scale, scale),
            "b_ih": jax.random.uniform(k3, (4 * H,), jnp.float32, -scale, scale),
            "b_hh": jax.random.uniform(k4, (4 * H,), jnp.float32, -scale, scale),
        })
    key, k1, k2 = jax.random.split(key, 3)
    params["linear"]["weight"] = jax.random.uniform(
        k1, (word_size, H), jnp.float32, -scale, scale)
    params["linear"]["bias"] = jax.random.uniform(
        k2, (word_size,), jnp.float32, -scale, scale)
    return params


def mymodel_forward(params, xs_embedding, h_0=None, c_0=None):
    """Matches Mymodel.forward: returns (p, (h_n, c_n)).
       xs_embedding: (B, T, E); p: (B*T, word_size); h_n/c_n: (3, B, H)."""
    B, T, E = xs_embedding.shape
    H = params["lstm"][0]["w_hh"].shape[1]
    W = params["linear"]["weight"].shape[0]
    if h_0 is None or c_0 is None:
        h_0 = jnp.zeros((NUM_LAYERS, B, H), jnp.float32)
        c_0 = jnp.zeros((NUM_LAYERS, B, H), jnp.float32)

    Bp = _round_up(B, _BATCH_TILE)
    pad = Bp - B

    # time-major, batch padded to a sublane multiple, bf16 MXU operands.
    x_tm = jnp.transpose(xs_embedding.astype(jnp.bfloat16), (1, 0, 2))   # (T, B, E)
    h0 = h_0.astype(jnp.float32)
    c0 = c_0.astype(jnp.float32)
    if pad:
        x_tm = jnp.pad(x_tm, ((0, 0), (0, pad), (0, 0)))
        h0 = jnp.pad(h0, ((0, 0), (0, pad), (0, 0)))
        c0 = jnp.pad(c0, ((0, 0), (0, pad), (0, 0)))

    y_tm, h_n, c_n = fused_lstm(x_tm, params["lstm"], h0, c0)

    # (T, Bp, H) -> (B, T, H) -> (B*T, H)  (matches torch's batch_first reshape(-1, H))
    h_bt = jnp.transpose(y_tm[:, :B, :], (1, 0, 2)).reshape(B * T, H)

    w_t = params["linear"]["weight"].T.astype(jnp.bfloat16)
    b_row = params["linear"]["bias"].reshape(1, W).astype(jnp.float32)
    p = linear(h_bt, w_t, b_row)
    return p, (h_n[:, :B, :], c_n[:, :B, :])


# ----------------------------- pure-JAX reference ------------------------------

def _reference_forward(params, xs, h_0, c_0):
    B, T, E = xs.shape
    H = params["lstm"][0]["w_hh"].shape[1]
    x = xs.astype(jnp.float32)
    h_ns, c_ns = [], []
    for layer, lp in enumerate(params["lstm"]):
        wih, whh = lp["w_ih"], lp["w_hh"]
        b = lp["b_ih"] + lp["b_hh"]
        h, c = h_0[layer], c_0[layer]
        outs = []
        for t in range(T):
            gates = x[:, t, :] @ wih.T + h @ whh.T + b
            i = jax.nn.sigmoid(gates[:, 0:H])
            f = jax.nn.sigmoid(gates[:, H:2 * H])
            g = jnp.tanh(gates[:, 2 * H:3 * H])
            o = jax.nn.sigmoid(gates[:, 3 * H:4 * H])
            c = f * c + i * g
            h = o * jnp.tanh(c)
            outs.append(h)
        x = jnp.stack(outs, axis=1)
        h_ns.append(h)
        c_ns.append(c)
    p = x.reshape(-1, H) @ params["linear"]["weight"].T + params["linear"]["bias"]
    return p, (jnp.stack(h_ns), jnp.stack(c_ns))


# TODO(synk): nn.CrossEntropyLoss is declared in __init__ but never used in forward(); omitted.

if __name__ == "__main__":
    B, T, E, H, W = 2, 8, 16, 32, 64
    key = jax.random.PRNGKey(0)
    key, kx = jax.random.split(key)
    xs_embedding = jax.random.normal(kx, (B, T, E), jnp.float32)
    params = init_params(key, embedding_num=E, hidden_num=H, word_size=W)

    fwd = jax.jit(mymodel_forward)
    p, (h_n, c_n) = fwd(params, xs_embedding)
    jax.block_until_ready((p, h_n, c_n))

    assert p.shape == (B * T, W), p.shape
    assert h_n.shape == (NUM_LAYERS, B, H) and c_n.shape == (NUM_LAYERS, B, H)

    h0 = jnp.zeros((NUM_LAYERS, B, H), jnp.float32)
    c0 = jnp.zeros((NUM_LAYERS, B, H), jnp.float32)
    p_ref, (h_ref, c_ref) = _reference_forward(params, xs_embedding, h0, c0)
    # bf16 MXU operands (f32 accumulation / gate math) -> slightly looser tolerance.
    assert jnp.allclose(p, p_ref, atol=3e-2, rtol=3e-2), float(jnp.max(jnp.abs(p - p_ref)))
    assert jnp.allclose(h_n, h_ref, atol=3e-2, rtol=3e-2), float(jnp.max(jnp.abs(h_n - h_ref)))
    assert jnp.allclose(c_n, c_ref, atol=3e-2, rtol=3e-2), float(jnp.max(jnp.abs(c_n - c_ref)))

    print("KERNEL_OK")
</pallas_src>

<mosaic_0001>
module attributes {stable_mosaic.version = 11 : i64} {
  func.func @_linear_kernel(%arg0: i32, %arg1: i32, %arg2: memref<16x32xbf16, #tpu.memory_space<vmem>>, %arg3: memref<32x64xbf16, #tpu.memory_space<vmem>>, %arg4: memref<1x64xf32, #tpu.memory_space<vmem>>, %arg5: memref<16x64xf32, #tpu.memory_space<vmem>>) attributes {dimension_semantics = [#tpu.dimension_semantics<parallel>, #tpu.dimension_semantics<parallel>], iteration_bounds = array<i64: 1, 1>, scalar_prefetch = 0 : i64, scratch_operands = 0 : i64, tpu.core_type = #tpu.core_type<tc>, window_params = [{transform_indices = @transform_0, window_bounds = array<i64: 16, 32>}, {transform_indices = @transform_1, window_bounds = array<i64: 32, 64>}, {transform_indices = @transform_2, window_bounds = array<i64: 1, 64>}, {transform_indices = @transform_3, window_bounds = array<i64: 16, 64>}]} {
    %c0 = arith.constant 0 : index
    %c0_0 = arith.constant 0 : index
    %0 = vector.load %arg2[%c0, %c0_0] : memref<16x32xbf16, #tpu.memory_space<vmem>>, vector<16x32xbf16>
    %c0_1 = arith.constant 0 : index
    %c0_2 = arith.constant 0 : index
    %1 = vector.load %arg3[%c0_1, %c0_2] : memref<32x64xbf16, #tpu.memory_space<vmem>>, vector<32x64xbf16>
    %cst = arith.constant dense<0.000000e+00> : vector<16x64xf32>
    %2 = tpu.matmul %0, %1, %cst {dimension_numbers = #tpu.dot_dimension_numbers<[1], [0], [0], [1], [0, 0, 1, 1], [], []>} : vector<16x32xbf16>, vector<32x64xbf16>, vector<16x64xf32> -> vector<16x64xf32>
    %c0_3 = arith.constant 0 : index
    %c0_4 = arith.constant 0 : index
    %3 = vector.load %arg4[%c0_3, %c0_4] : memref<1x64xf32, #tpu.memory_space<vmem>>, vector<1x64xf32>
    %4 = vector.broadcast %3 : vector<1x64xf32> to vector<16x64xf32>
    %5 = arith.addf %2, %4 : vector<16x64xf32>
    %c0_5 = arith.constant 0 : index
    %c0_6 = arith.constant 0 : index
    %6 = vector.load %arg5[%c0_5, %c0_6] : memref<16x64xf32, #tpu.memory_space<vmem>>, vector<16x64xf32>
    tpu.vector_store %arg5[%c0_5, %c0_6], %5 {strides = array<i32>} : memref<16x64xf32, #tpu.memory_space<vmem>>, vector<16x64xf32>,
    return
  }
  func.func @transform_0(%arg0: i32, %arg1: i32) -> (i32, i32) {
    %c0_i32 = arith.constant 0 : i32
    %c0_i32_0 = arith.constant 0 : i32
    return %arg0, %c0_i32 : i32, i32
  }
  func.func @transform_1(%arg0: i32, %arg1: i32) -> (i32, i32) {
    %c0_i32 = arith.constant 0 : i32
    %c0_i32_0 = arith.constant 0 : i32
    return %c0_i32, %arg1 : i32, i32
  }
  func.func @transform_2(%arg0: i32, %arg1: i32) -> (i32, i32) {
    %c0_i32 = arith.constant 0 : i32
    %c0_i32_0 = arith.constant 0 : i32
    return %c0_i32, %arg1 : i32, i32
  }
  func.func @transform_3(%arg0: i32, %arg1: i32) -> (i32, i32) {
    %c0_i32 = arith.constant 0 : i32
    return %arg0, %arg1 : i32, i32
  }
}

module attributes {stable_mosaic.version = 11 : i64} {
  func.func @_fused_lstm_kernel(%arg0: i32, %arg1: i32, %arg2: memref<8x16x16xbf16, #tpu.memory_space<vmem>>, %arg3: memref<16x128xbf16, #tpu.memory_space<vmem>>, %arg4: memref<32x128xbf16, #tpu.memory_space<vmem>>, %arg5: memref<32x128xbf16, #tpu.memory_space<vmem>>, %arg6: memref<32x128xbf16, #tpu.memory_space<vmem>>, %arg7: memref<32x128xbf16, #tpu.memory_space<vmem>>, %arg8: memref<32x128xbf16, #tpu.memory_space<vmem>>, %arg9: memref<1x128xf32, #tpu.memory_space<vmem>>, %arg10: memref<1x128xf32, #tpu.memory_space<vmem>>, %arg11: memref<1x128xf32, #tpu.memory_space<vmem>>, %arg12: memref<3x16x32xf32, #tpu.memory_space<vmem>>, %arg13: memref<3x16x32xf32, #tpu.memory_space<vmem>>, %arg14: memref<8x16x32xbf16, #tpu.memory_space<vmem>>, %arg15: memref<3x16x32xf32, #tpu.memory_space<vmem>>, %arg16: memref<3x16x32xf32, #tpu.memory_space<vmem>>, %arg17: memref<8x16x128xf32, #tpu.memory_space<vmem>>, %arg18: memref<8x16x32xbf16, #tpu.memory_space<vmem>>) attributes {dimension_semantics = [#tpu.dimension_semantics<parallel>, #tpu.dimension_semantics<arbitrary>], iteration_bounds = array<i64: 1, 1>, scalar_prefetch = 0 : i64, scratch_operands = 2 : i64, tpu.core_type = #tpu.core_type<tc>, window_params = [{transform_indices = @transform_0, window_bounds = array<i64: 8, 16, 16>}, {pipeline_mode = #tpu.pipeline_mode<synchronous>, transform_indices = @transform_1, window_bounds = array<i64: 16, 128>}, {pipeline_mode = #tpu.pipeline_mode<synchronous>, transform_indices = @transform_2, window_bounds = array<i64: 32, 128>}, {pipeline_mode = #tpu.pipeline_mode<synchronous>, transform_indices = @transform_3, window_bounds = array<i64: 32, 128>}, {pipeline_mode = #tpu.pipeline_mode<synchronous>, transform_indices = @transform_4, window_bounds = array<i64: 32, 128>}, {pipeline_mode = #tpu.pipeline_mode<synchronous>, transform_indices = @transform_5, window_bounds = array<i64: 32, 128>}, {pipeline_mode = #tpu.pipeline_mode<synchronous>, transform_indices = @transform_6, window_bounds = array<i64: 32, 128>}, {pipeline_mode = #tpu.pipeline_mode<synchronous>, transform_indices = @transform_7, window_bounds = array<i64: 1, 128>}, {pipeline_mode = #tpu.pipeline_mode<synchronous>, transform_indices = @transform_8, window_bounds = array<i64: 1, 128>}, {pipeline_mode = #tpu.pipeline_mode<synchronous>, transform_indices = @transform_9, window_bounds = array<i64: 1, 128>}, {transform_indices = @transform_10, window_bounds = array<i64: 3, 16, 32>}, {transform_indices = @transform_11, window_bounds = array<i64: 3, 16, 32>}, {transform_indices = @transform_12, window_bounds = array<i64: 8, 16, 32>}, {transform_indices = @transform_13, window_bounds = array<i64: 3, 16, 32>}, {transform_indices = @transform_14, window_bounds = array<i64: 3, 16, 32>}]} {
    %c0_i32 = arith.constant 0 : i32
    %0 = arith.cmpi eq, %arg1, %c0_i32 : i32
    %1 = arith.extui %0 : i1 to i32
    %c0_i32_0 = arith.constant 0 : i32
    %2 = arith.cmpi ne, %1, %c0_i32_0 : i32
    scf.if %2 {
      %c0_289 = arith.constant 0 : index
      %c0_290 = arith.constant 0 : index
      %c0_291 = arith.constant 0 : index
      %929 = vector.load %arg12[%c0_289, %c0_290, %c0_291] : memref<3x16x32xf32, #tpu.memory_space<vmem>>, vector<3x16x32xf32>
      %c0_292 = arith.constant 0 : index
      %c0_293 = arith.constant 0 : index
      %c0_294 = arith.constant 0 : index
      %930 = vector.load %arg15[%c0_292, %c0_293, %c0_294] : memref<3x16x32xf32, #tpu.memory_space<vmem>>, vector<3x16x32xf32>
      tpu.vector_store %arg15[%c0_292, %c0_293, %c0_294], %929 {strides = array<i32>} : memref<3x16x32xf32, #tpu.memory_space<vmem>>, vector<3x16x32xf32>,
      %c0_295 = arith.constant 0 : index
      %c0_296 = arith.constant 0 : index
      %c0_297 = arith.constant 0 : index
      %931 = vector.load %arg13[%c0_295, %c0_296, %c0_297] : memref<3x16x32xf32, #tpu.memory_space<vmem>>, vector<3x16x32xf32>
      %c0_298 = arith.constant 0 : index
      %c0_299 = arith.constant 0 : index
      %c0_300 = arith.constant 0 : index
      %932 = vector.load %arg16[%c0_298, %c0_299, %c0_300] : memref<3x16x32xf32, #tpu.memory_space<vmem>>, vector<3x16x32xf32>
      tpu.vector_store %arg16[%c0_298, %c0_299, %c0_300], %931 {strides = array<i32>} : memref<3x16x32xf32, #tpu.memory_space<vmem>>, vector<3x16x32xf32>,
    } else {
    }
    %c0 = arith.constant 0 : index
    %c0_1 = arith.constant 0 : index
    %c0_2 = arith.constant 0 : index
    %3 = vector.load %arg2[%c0, %c0_1, %c0_2] : memref<8x16x16xbf16, #tpu.memory_space<vmem>>, vector<8x16x16xbf16>
    %4 = vector.shape_cast %3 : vector<8x16x16xbf16> to vector<128x16xbf16>
    %c0_3 = arith.constant 0 : index
    %c0_4 = arith.constant 0 : index
    %5 = vector.load %arg3[%c0_3, %c0_4] : memref<16x128xbf16, #tpu.memory_space<vmem>>, vector<16x128xbf16>
    %cst = arith.constant dense<0.000000e+00> : vector<128x128xf32>
    %6 = tpu.matmul %4, %5, %cst {dimension_numbers = #tpu.dot_dimension_numbers<[1], [0], [0], [1], [0, 0, 1, 1], [], []>} : vector<128x16xbf16>, vector<16x128xbf16>, vector<128x128xf32> -> vector<128x128xf32>
    %c0_5 = arith.constant 0 : index
    %c0_6 = arith.constant 0 : index
    %7 = vector.load %arg9[%c0_5, %c0_6] : memref<1x128xf32, #tpu.memory_space<vmem>>, vector<1x128xf32>
    %8 = vector.broadcast %7 : vector<1x128xf32> to vector<128x128xf32>
    %9 = arith.addf %6, %8 : vector<128x128xf32>
    %10 = vector.shape_cast %9 : vector<128x128xf32> to vector<8x16x128xf32>
    %c0_7 = arith.constant 0 : index
    %c0_8 = arith.constant 0 : index
    %c0_9 = arith.constant 0 : index
    %11 = vector.load %arg17[%c0_7, %c0_8, %c0_9] : memref<8x16x128xf32, #tpu.memory_space<vmem>>, vector<8x16x128xf32>
    tpu.vector_store %arg17[%c0_7, %c0_8, %c0_9], %10 {strides = array<i32>} : memref<8x16x128xf32, #tpu.memory_space<vmem>>, vector<8x16x128xf32>,
    %c0_10 = arith.constant 0 : index
    %c0_11 = arith.constant 0 : index
    %12 = vector.load %arg6[%c0_10, %c0_11] : memref<32x128xbf16, #tpu.memory_space<vmem>>, vector<32x128xbf16>
    %c0_12 = arith.constant 0 : index
    %c0_13 = arith.constant 0 : index
    %c0_14 = arith.constant 0 : index
    %13 = vector.load %arg15[%c0_12, %c0_13, %c0_14] : memref<3x16x32xf32, #tpu.memory_space<vmem>>, vector<1x16x32xf32>
    %14 = vector.shape_cast %13 : vector<1x16x32xf32> to vector<16x32xf32>
    %c0_15 = arith.constant 0 : index
    %c0_16 = arith.constant 0 : index
    %c0_17 = arith.constant 0 : index
    %15 = vector.load %arg16[%c0_15, %c0_16, %c0_17] : memref<3x16x32xf32, #tpu.memory_space<vmem>>, vector<1x16x32xf32>
    %16 = vector.shape_cast %15 : vector<1x16x32xf32> to vector<16x32xf32>
    %c0_i32_18 = arith.constant 0 : i32
    %17 = arith.index_cast %c0_i32_18 : i32 to index
    %c0_19 = arith.constant 0 : index
    %c0_20 = arith.constant 0 : index
    %18 = vector.load %arg17[%17, %c0_19, %c0_20] : memref<8x16x128xf32, #tpu.memory_space<vmem>>, vector<1x16x128xf32>
    %19 = vector.shape_cast %18 : vector<1x16x128xf32> to vector<16x128xf32>
    %20 = arith.truncf %14 : vector<16x32xf32> to vector<16x32xbf16>
    %cst_21 = arith.constant dense<0.000000e+00> : vector<16x128xf32>
    %21 = tpu.matmul %20, %12, %cst_21 {dimension_numbers = #tpu.dot_dimension_numbers<[1], [0], [0], [1], [0, 0, 1, 1], [], []>} : vector<16x32xbf16>, vector<32x128xbf16>, vector<16x128xf32> -> vector<16x128xf32>
    %22 = arith.addf %19, %21 : vector<16x128xf32>
    %23 = vector.extract_strided_slice %22 {offsets = [0, 0], sizes = [16, 32], strides = [1, 1]} : vector<16x128xf32> to vector<16x32xf32>
    %24 = arith.negf %23 : vector<16x32xf32>
    %25 = math.exp %24 : vector<16x32xf32>
    %cst_22 = arith.constant 1.000000e+00 : f32
    %26 = vector.broadcast %cst_22 : f32 to vector<16x32xf32>
    %27 = arith.addf %26, %25 : vector<16x32xf32>
    %28 = arith.divf %26, %27 : vector<16x32xf32>
    %29 = vector.extract_strided_slice %22 {offsets = [0, 32], sizes = [16, 32], strides = [1, 1]} : vector<16x128xf32> to vector<16x32xf32>
    %30 = arith.negf %29 : vector<16x32xf32>
    %31 = math.exp %30 : vector<16x32xf32>
    %cst_23 = arith.constant 1.000000e+00 : f32
    %32 = vector.broadcast %cst_23 : f32 to vector<16x32xf32>
    %33 = arith.addf %32, %31 : vector<16x32xf32>
    %34 = arith.divf %32, %33 : vector<16x32xf32>
    %35 = vector.extract_strided_slice %22 {offsets = [0, 64], sizes = [16, 32], strides = [1, 1]} : vector<16x128xf32> to vector<16x32xf32>
    %36 = math.tanh %35 : vector<16x32xf32>
    %37 = vector.extract_strided_slice %22 {offsets = [0, 96], sizes = [16, 32], strides = [1, 1]} : vector<16x128xf32> to vector<16x32xf32>
    %38 = arith.negf %37 : vector<16x32xf32>
    %39 = math.exp %38 : vector<16x32xf32>
    %cst_24 = arith.constant 1.000000e+00 : f32
    %40 = vector.broadcast %cst_24 : f32 to vector<16x32xf32>
    %41 = arith.addf %40, %39 : vector<16x32xf32>
    %42 = arith.divf %40, %41 : vector<16x32xf32>
    %43 = arith.mulf %34, %16 : vector<16x32xf32>
    %44 = arith.mulf %28, %36 : vector<16x32xf32>
    %45 = arith.addf %43, %44 : vector<16x32xf32>
    %46 = math.tanh %45 : vector<16x32xf32>
    %47 = arith.mulf %42, %46 : vector<16x32xf32>
    %48 = arith.truncf %47 : vector<16x32xf32> to vector<16x32xbf16>
    %49 = arith.index_cast %c0_i32_18 : i32 to index
    %c0_25 = arith.constant 0 : index
    %c0_26 = arith.constant 0 : index
    %50 = vector.load %arg18[%49, %c0_25, %c0_26] : memref<8x16x32xbf16, #tpu.memory_space<vmem>>, vector<1x16x32xbf16>
    %51 = vector.shape_cast %50 : vector<1x16x32xbf16> to vector<16x32xbf16>
    %52 = vector.shape_cast %48 : vector<16x32xbf16> to vector<1x16x32xbf16>
    tpu.vector_store %arg18[%49, %c0_25, %c0_26], %52 {strides = array<i32>} : memref<8x16x32xbf16, #tpu.memory_space<vmem>>, vector<1x16x32xbf16>,
    %c1_i32 = arith.constant 1 : i32
    %53 = arith.index_cast %c1_i32 : i32 to index
    %c0_27 = arith.constant 0 : index
    %c0_28 = arith.constant 0 : index
    %54 = vector.load %arg17[%53, %c0_27, %c0_28] : memref<8x16x128xf32, #tpu.memory_space<vmem>>, vector<1x16x128xf32>
    %55 = vector.shape_cast %54 : vector<1x16x128xf32> to vector<16x128xf32>
    %56 = arith.truncf %47 : vector<16x32xf32> to vector<16x32xbf16>
    %cst_29 = arith.constant dense<0.000000e+00> : vector<16x128xf32>
    %57 = tpu.matmul %56, %12, %cst_29 {dimension_numbers = #tpu.dot_dimension_numbers<[1], [0], [0], [1], [0, 0, 1, 1], [], []>} : vector<16x32xbf16>, vector<32x128xbf16>, vector<16x128xf32> -> vector<16x128xf32>
    %58 = arith.addf %55, %57 : vector<16x128xf32>
    %59 = vector.extract_strided_slice %58 {offsets = [0, 0], sizes = [16, 32], strides = [1, 1]} : vector<16x128xf32> to vector<16x32xf32>
    %60 = arith.negf %59 : vector<16x32xf32>
    %61 = math.exp %60 : vector<16x32xf32>
    %cst_30 = arith.constant 1.000000e+00 : f32
    %62 = vector.broadcast %cst_30 : f32 to vector<16x32xf32>
    %63 = arith.addf %62, %61 : vector<16x32xf32>
    %64 = arith.divf %62, %63 : vector<16x32xf32>
    %65 = vector.extract_strided_slice %58 {offsets = [0, 32], sizes = [16, 32], strides = [1, 1]} : vector<16x128xf32> to vector<16x32xf32>
    %66 = arith.negf %65 : vector<16x32xf32>
    %67 = math.exp %66 : vector<16x32xf32>
    %cst_31 = arith.constant 1.000000e+00 : f32
    %68 = vector.broadcast %cst_31 : f32 to vector<16x32xf32>
    %69 = arith.addf %68, %67 : vector<16x32xf32>
    %70 = arith.divf %68, %69 : vector<16x32xf32>
    %71 = vector.extract_strided_slice %58 {offsets = [0, 64], sizes = [16, 32], strides = [1, 1]} : vector<16x128xf32> to vector<16x32xf32>
    %72 = math.tanh %71 : vector<16x32xf32>
    %73 = vector.extract_strided_slice %58 {offsets = [0, 96], sizes = [16, 32], strides = [1, 1]} : vector<16x128xf32> to vector<16x32xf32>
    %74 = arith.negf %73 : vector<16x32xf32>
    %75 = math.exp %74 : vector<16x32xf32>
    %cst_32 = arith.constant 1.000000e+00 : f32
    %76 = vector.broadcast %cst_32 : f32 to vector<16x32xf32>
    %77 = arith.addf %76, %75 : vector<16x32xf32>
    %78 = arith.divf %76, %77 : vector<16x32xf32>
    %79 = arith.mulf %70, %45 : vector<16x32xf32>
    %80 = arith.mulf %64, %72 : vector<16x32xf32>
    %81 = arith.addf %79, %80 : vector<16x32xf32>
    %82 = math.tanh %81 : vector<16x32xf32>
    %83 = arith.mulf %78, %82 : vector<16x32xf32>
    %84 = arith.truncf %83 : vector<16x32xf32> to vector<16x32xbf16>
    %85 = arith.index_cast %c1_i32 : i32 to index
    %c0_33 = arith.constant 0 : index
    %c0_34 = arith.constant 0 : index
    %86 = vector.load %arg18[%85, %c0_33, %c0_34] : memref<8x16x32xbf16, #tpu.memory_space<vmem>>, vector<1x16x32xbf16>
    %87 = vector.shape_cast %86 : vector<1x16x32xbf16> to vector<16x32xbf16>
    %88 = vector.shape_cast %84 : vector<16x32xbf16> to vector<1x16x32xbf16>
    tpu.vector_store %arg18[%85, %c0_33, %c0_34], %88 {strides = array<i32>} : memref<8x16x32xbf16, #tpu.memory_space<vmem>>, vector<1x16x32xbf16>,
    %c2_i32 = arith.constant 2 : i32
    %89 = arith.index_cast %c2_i32 : i32 to index
    %c0_35 = arith.constant 0 : index
    %c0_36 = arith.constant 0 : index
    %90 = vector.load %arg17[%89, %c0_35, %c0_36] : memref<8x16x128xf32, #tpu.memory_space<vmem>>, vector<1x16x128xf32>
    %91 = vector.shape_cast %90 : vector<1x16x128xf32> to vector<16x128xf32>
    %92 = arith.truncf %83 : vector<16x32xf32> to vector<16x32xbf16>
    %cst_37 = arith.constant dense<0.000000e+00> : vector<16x128xf32>
    %93 = tpu.matmul %92, %12, %cst_37 {dimension_numbers = #tpu.dot_dimension_numbers<[1], [0], [0], [1], [0, 0, 1, 1], [], []>} : vector<16x32xbf16>, vector<32x128xbf16>, vector<16x128xf32> -> vector<16x128xf32>
    %94 = arith.addf %91, %93 : vector<16x128xf32>
    %95 = vector.extract_strided_slice %94 {offsets = [0, 0], sizes = [16, 32], strides = [1, 1]} : vector<16x128xf32> to vector<16x32xf32>
    %96 = arith.negf %95 : vector<16x32xf32>
    %97 = math.exp %96 : vector<16x32xf32>
    %cst_38 = arith.constant 1.000000e+00 : f32
    %98 = vector.broadcast %cst_38 : f32 to vector<16x32xf32>
    %99 = arith.addf %98, %97 : vector<16x32xf32>
    %100 = arith.divf %98, %99 : vector<16x32xf32>
    %101 = vector.extract_strided_slice %94 {offsets = [0, 32], sizes = [16, 32], strides = [1, 1]} : vector<16x128xf32> to vector<16x32xf32>
    %102 = arith.negf %101 : vector<16x32xf32>
    %103 = math.exp %102 : vector<16x32xf32>
    %cst_39 = arith.constant 1.000000e+00 : f32
    %104 = vector.broadcast %cst_39 : f32 to vector<16x32xf32>
    %105 = arith.addf %104, %103 : vector<16x32xf32>
    %106 = arith.divf %104, %105 : vector<16x32xf32>
    %107 = vector.extract_strided_slice %94 {offsets = [0, 64], sizes = [16, 32], strides = [1, 1]} : vector<16x128xf32> to vector<16x32xf32>
    %108 = math.tanh %107 : vector<16x32xf32>
    %109 = vector.extract_strided_slice %94 {offsets = [0, 96], sizes = [16, 32], strides = [1, 1]} : vector<16x128xf32> to vector<16x32xf32>
    %110 = arith.negf %109 : vector<16x32xf32>
    %111 = math.exp %110 : vector<16x32xf32>
    %cst_40 = arith.constant 1.000000e+00 : f32
    %112 = vector.broadcast %cst_40 : f32 to vector<16x32xf32>
    %113 = arith.addf %112, %111 : vector<16x32xf32>
    %114 = arith.divf %112, %113 : vector<16x32xf32>
    %115 = arith.mulf %106, %81 : vector<16x32xf32>
    %116 = arith.mulf %100, %108 : vector<16x32xf32>
    %117 = arith.addf %115, %116 : vector<16x32xf32>
    %118 = math.tanh %117 : vector<16x32xf32>
    %119 = arith.mulf %114, %118 : vector<16x32xf32>
    %120 = arith.truncf %119 : vector<16x32xf32> to vector<16x32xbf16>
    %121 = arith.index_cast %c2_i32 : i32 to index
    %c0_41 = arith.constant 0 : index
    %c0_42 = arith.constant 0 : index
    %122 = vector.load %arg18[%121, %c0_41, %c0_42] : memref<8x16x32xbf16, #tpu.memory_space<vmem>>, vector<1x16x32xbf16>
    %123 = vector.shape_cast %122 : vector<1x16x32xbf16> to vector<16x32xbf16>
    %124 = vector.shape_cast %120 : vector<16x32xbf16> to vector<1x16x32xbf16>
    tpu.vector_store %arg18[%121, %c0_41, %c0_42], %124 {strides = array<i32>} : memref<8x16x32xbf16, #tpu.memory_space<vmem>>, vector<1x16x32xbf16>,
    %c3_i32 = arith.constant 3 : i32
    %125 = arith.index_cast %c3_i32 : i32 to index
    %c0_43 = arith.constant 0 : index
    %c0_44 = arith.constant 0 : index
    %126 = vector.load %arg17[%125, %c0_43, %c0_44] : memref<8x16x128xf32, #tpu.memory_space<vmem>>, vector<1x16x128xf32>
    %127 = vector.shape_cast %126 : vector<1x16x128xf32> to vector<16x128xf32>
    %128 = arith.truncf %119 : vector<16x32xf32> to vector<16x32xbf16>
    %cst_45 = arith.constant dense<0.000000e+00> : vector<16x128xf32>
    %129 = tpu.matmul %128, %12, %cst_45 {dimension_numbers = #tpu.dot_dimension_numbers<[1], [0], [0], [1], [0, 0, 1, 1], [], []>} : vector<16x32xbf16>, vector<32x128xbf16>, vector<16x128xf32> -> vector<16x128xf32>
    %130 = arith.addf %127, %129 : vector<16x128xf32>
    %131 = vector.extract_strided_slice %130 {offsets = [0, 0], sizes = [16, 32], strides = [1, 1]} : vector<16x128xf32> to vector<16x32xf32>
    %132 = arith.negf %131 : vector<16x32xf32>
    %133 = math.exp %132 : vector<16x32xf32>
    %cst_46 = arith.constant 1.000000e+00 : f32
    %134 = vector.broadcast %cst_46 : f32 to vector<16x32xf32>
    %135 = arith.addf %134, %133 : vector<16x32xf32>
    %136 = arith.divf %134, %135 : vector<16x32xf32>
    %137 = vector.extract_strided_slice %130 {offsets = [0, 32], sizes = [16, 32], strides = [1, 1]} : vector<16x128xf32> to vector<16x32xf32>
    %138 = arith.negf %137 : vector<16x32xf32>
    %139 = math.exp %138 : vector<16x32xf32>
    %cst_47 = arith.constant 1.000000e+00 : f32
    %140 = vector.broadcast %cst_47 : f32 to vector<16x32xf32>
    %141 = arith.addf %140, %139 : vector<16x32xf32>
    %142 = arith.divf %140, %141 : vector<16x32xf32>
    %143 = vector.extract_strided_slice %130 {offsets = [0, 64], sizes = [16, 32], strides = [1, 1]} : vector<16x128xf32> to vector<16x32xf32>
    %144 = math.tanh %143 : vector<16x32xf32>
    %145 = vector.extract_strided_slice %130 {offsets = [0, 96], sizes = [16, 32], strides = [1, 1]} : vector<16x128xf32> to vector<16x32xf32>
    %146 = arith.negf %145 : vector<16x32xf32>
    %147 = math.exp %146 : vector<16x32xf32>
    %cst_48 = arith.constant 1.000000e+00 : f32
    %148 = vector.broadcast %cst_48 : f32 to vector<16x32xf32>
    %149 = arith.addf %148, %147 : vector<16x32xf32>
    %150 = arith.divf %148, %149 : vector<16x32xf32>
    %151 = arith.mulf %142, %117 : vector<16x32xf32>
    %152 = arith.mulf %136, %144 : vector<16x32xf32>
    %153 = arith.addf %151, %152 : vector<16x32xf32>
    %154 = math.tanh %153 : vector<16x32xf32>
    %155 = arith.mulf %150, %154 : vector<16x32xf32>
    %156 = arith.truncf %155 : vector<16x32xf32> to vector<16x32xbf16>
    %157 = arith.index_cast %c3_i32 : i32 to index
    %c0_49 = arith.constant 0 : index
    %c0_50 = arith.constant 0 : index
    %158 = vector.load %arg18[%157, %c0_49, %c0_50] : memref<8x16x32xbf16, #tpu.memory_space<vmem>>, vector<1x16x32xbf16>
    %159 = vector.shape_cast %158 : vector<1x16x32xbf16> to vector<16x32xbf16>
    %160 = vector.shape_cast %156 : vector<16x32xbf16> to vector<1x16x32xbf16>
    tpu.vector_store %arg18[%157, %c0_49, %c0_50], %160 {strides = array<i32>} : memref<8x16x32xbf16, #tpu.memory_space<vmem>>, vector<1x16x32xbf16>,
    %c4_i32 = arith.constant 4 : i32
    %161 = arith.index_cast %c4_i32 : i32 to index
    %c0_51 = arith.constant 0 : index
    %c0_52 = arith.constant 0 : index
    %162 = vector.load %arg17[%161, %c0_51, %c0_52] : memref<8x16x128xf32, #tpu.memory_space<vmem>>, vector<1x16x128xf32>
    %163 = vector.shape_cast %162 : vector<1x16x128xf32> to vector<16x128xf32>
    %164 = arith.truncf %155 : vector<16x32xf32> to vector<16x32xbf16>
    %cst_53 = arith.constant dense<0.000000e+00> : vector<16x128xf32>
    %165 = tpu.matmul %164, %12, %cst_53 {dimension_numbers = #tpu.dot_dimension_numbers<[1], [0], [0], [1], [0, 0, 1, 1], [], []>} : vector<16x32xbf16>, vector<32x128xbf16>, vector<16x128xf32> -> vector<16x128xf32>
    %166 = arith.addf %163, %165 : vector<16x128xf32>
    %167 = vector.extract_strided_slice %166 {offsets = [0, 0], sizes = [16, 32], strides = [1, 1]} : vector<16x128xf32> to vector<16x32xf32>
    %168 = arith.negf %167 : vector<16x32xf32>
    %169 = math.exp %168 : vector<16x32xf32>
    %cst_54 = arith.constant 1.000000e+00 : f32
    %170 = vector.broadcast %cst_54 : f32 to vector<16x32xf32>
    %171 = arith.addf %170, %169 : vector<16x32xf32>
    %172 = arith.divf %170, %171 : vector<16x32xf32>
    %173 = vector.extract_strided_slice %166 {offsets = [0, 32], sizes = [16, 32], strides = [1, 1]} : vector<16x128xf32> to vector<16x32xf32>
    %174 = arith.negf %173 : vector<16x32xf32>
    %175 = math.exp %174 : vector<16x32xf32>
    %cst_55 = arith.constant 1.000000e+00 : f32
    %176 = vector.broadcast %cst_55 : f32 to vector<16x32xf32>
    %177 = arith.addf %176, %175 : vector<16x32xf32>
    %178 = arith.divf %176, %177 : vector<16x32xf32>
    %179 = vector.extract_strided_slice %166 {offsets = [0, 64], sizes = [16, 32], strides = [1, 1]} : vector<16x128xf32> to vector<16x32xf32>
    %180 = math.tanh %179 : vector<16x32xf32>
    %181 = vector.extract_strided_slice %166 {offsets = [0, 96], sizes = [16, 32], strides = [1, 1]} : vector<16x128xf32> to vector<16x32xf32>
    %182 = arith.negf %181 : vector<16x32xf32>
    %183 = math.exp %182 : vector<16x32xf32>
    %cst_56 = arith.constant 1.000000e+00 : f32
    %184 = vector.broadcast %cst_56 : f32 to vector<16x32xf32>
    %185 = arith.addf %184, %183 : vector<16x32xf32>
    %186 = arith.divf %184, %185 : vector<16x32xf32>
    %187 = arith.mulf %178, %153 : vector<16x32xf32>
    %188 = arith.mulf %172, %180 : vector<16x32xf32>
    %189 = arith.addf %187, %188 : vector<16x32xf32>
    %190 = math.tanh %189 : vector<16x32xf32>
    %191 = arith.mulf %186, %190 : vector<16x32xf32>
    %192 = arith.truncf %191 : vector<16x32xf32> to vector<16x32xbf16>
    %193 = arith.index_cast %c4_i32 : i32 to index
    %c0_57 = arith.constant 0 : index
    %c0_58 = arith.constant 0 : index
    %194 = vector.load %arg18[%193, %c0_57, %c0_58] : memref<8x16x32xbf16, #tpu.memory_space<vmem>>, vector<1x16x32xbf16>
    %195 = vector.shape_cast %194 : vector<1x16x32xbf16> to vector<16x32xbf16>
    %196 = vector.shape_cast %192 : vector<16x32xbf16> to vector<1x16x32xbf16>
    tpu.vector_store %arg18[%193, %c0_57, %c0_58], %196 {strides = array<i32>} : memref<8x16x32xbf16, #tpu.memory_space<vmem>>, vector<1x16x32xbf16>,
    %c5_i32 = arith.constant 5 : i32
    %197 = arith.index_cast %c5_i32 : i32 to index
    %c0_59 = arith.constant 0 : index
    %c0_60 = arith.constant 0 : index
    %198 = vector.load %arg17[%197, %c0_59, %c0_60] : memref<8x16x128xf32, #tpu.memory_space<vmem>>, vector<1x16x128xf32>
    %199 = vector.shape_cast %198 : vector<1x16x128xf32> to vector<16x128xf32>
    %200 = arith.truncf %191 : vector<16x32xf32> to vector<16x32xbf16>
    %cst_61 = arith.constant dense<0.000000e+00> : vector<16x128xf32>
    %201 = tpu.matmul %200, %12, %cst_61 {dimension_numbers = #tpu.dot_dimension_numbers<[1], [0], [0], [1], [0, 0, 1, 1], [], []>} : vector<16x32xbf16>, vector<32x128xbf16>, vector<16x128xf32> -> vector<16x128xf32>
    %202 = arith.addf %199, %201 : vector<16x128xf32>
    %203 = vector.extract_strided_slice %202 {offsets = [0, 0], sizes = [16, 32], strides = [1, 1]} : vector<16x128xf32> to vector<16x32xf32>
    %204 = arith.negf %203 : vector<16x32xf32>
    %205 = math.exp %204 : vector<16x32xf32>
    %cst_62 = arith.constant 1.000000e+00 : f32
    %206 = vector.broadcast %cst_62 : f32 to vector<16x32xf32>
    %207 = arith.addf %206, %205 : vector<16x32xf32>
    %208 = arith.divf %206, %207 : vector<16x32xf32>
    %209 = vector.extract_strided_slice %202 {offsets = [0, 32], sizes = [16, 32], strides = [1, 1]} : vector<16x128xf32> to vector<16x32xf32>
    %210 = arith.negf %209 : vector<16x32xf32>
    %211 = math.exp %210 : vector<16x32xf32>
    %cst_63 = arith.constant 1.000000e+00 : f32
    %212 = vector.broadcast %cst_63 : f32 to vector<16x32xf32>
    %213 = arith.addf %212, %211 : vector<16x32xf32>
    %214 = arith.divf %212, %213 : vector<16x32xf32>
    %215 = vector.extract_strided_slice %202 {offsets = [0, 64], sizes = [16, 32], strides = [1, 1]} : vector<16x128xf32> to vector<16x32xf32>
    %216 = math.tanh %215 : vector<16x32xf32>
    %217 = vector.extract_strided_slice %202 {offsets = [0, 96], sizes = [16, 32], strides = [1, 1]} : vector<16x128xf32> to vector<16x32xf32>
    %218 = arith.negf %217 : vector<16x32xf32>
    %219 = math.exp %218 : vector<16x32xf32>
    %cst_64 = arith.constant 1.000000e+00 : f32
    %220 = vector.broadcast %cst_64 : f32 to vector<16x32xf32>
    %221 = arith.addf %220, %219 : vector<16x32xf32>
    %222 = arith.divf %220, %221 : vector<16x32xf32>
    %223 = arith.mulf %214, %189 : vector<16x32xf32>
    %224 = arith.mulf %208, %216 : vector<16x32xf32>
    %225 = arith.addf %223, %224 : vector<16x32xf32>
    %226 = math.tanh %225 : vector<16x32xf32>
    %227 = arith.mulf %222, %226 : vector<16x32xf32>
    %228 = arith.truncf %227 : vector<16x32xf32> to vector<16x32xbf16>
    %229 = arith.index_cast %c5_i32 : i32 to index
    %c0_65 = arith.constant 0 : index
    %c0_66 = arith.constant 0 : index
    %230 = vector.load %arg18[%229, %c0_65, %c0_66] : memref<8x16x32xbf16, #tpu.memory_space<vmem>>, vector<1x16x32xbf16>
    %231 = vector.shape_cast %230 : vector<1x16x32xbf16> to vector<16x32xbf16>
    %232 = vector.shape_cast %228 : vector<16x32xbf16> to vector<1x16x32xbf16>
    tpu.vector_store %arg18[%229, %c0_65, %c0_66], %232 {strides = array<i32>} : memref<8x16x32xbf16, #tpu.memory_space<vmem>>, vector<1x16x32xbf16>,
    %c6_i32 = arith.constant 6 : i32
    %233 = arith.index_cast %c6_i32 : i32 to index
    %c0_67 = arith.constant 0 : index
    %c0_68 = arith.constant 0 : index
    %234 = vector.load %arg17[%233, %c0_67, %c0_68] : memref<8x16x128xf32, #tpu.memory_space<vmem>>, vector<1x16x128xf32>
    %235 = vector.shape_cast %234 : vector<1x16x128xf32> to vector<16x128xf32>
    %236 = arith.truncf %227 : vector<16x32xf32> to vector<16x32xbf16>
    %cst_69 = arith.constant dense<0.000000e+00> : vector<16x128xf32>
    %237 = tpu.matmul %236, %12, %cst_69 {dimension_numbers = #tpu.dot_dimension_numbers<[1], [0], [0], [1], [0, 0, 1, 1], [], []>} : vector<16x32xbf16>, vector<32x128xbf16>, vector<16x128xf32> -> vector<16x128xf32>
    %238 = arith.addf %235, %237 : vector<16x128xf32>
    %239 = vector.extract_strided_slice %238 {offsets = [0, 0], sizes = [16, 32], strides = [1, 1]} : vector<16x128xf32> to vector<16x32xf32>
    %240 = arith.negf %239 : vector<16x32xf32>
    %241 = math.exp %240 : vector<16x32xf32>
    %cst_70 = arith.constant 1.000000e+00 : f32
    %242 = vector.broadcast %cst_70 : f32 to vector<16x32xf32>
    %243 = arith.addf %242, %241 : vector<16x32xf32>
    %244 = arith.divf %242, %243 : vector<16x32xf32>
    %245 = vector.extract_strided_slice %238 {offsets = [0, 32], sizes = [16, 32], strides = [1, 1]} : vector<16x128xf32> to vector<16x32xf32>
    %246 = arith.negf %245 : vector<16x32xf32>
    %247 = math.exp %246 : vector<16x32xf32>
    %cst_71 = arith.constant 1.000000e+00 : f32
    %248 = vector.broadcast %cst_71 : f32 to vector<16x32xf32>
    %249 = arith.addf %248, %247 : vector<16x32xf32>
    %250 = arith.divf %248, %249 : vector<16x32xf32>
    %251 = vector.extract_strided_slice %238 {offsets = [0, 64], sizes = [16, 32], strides = [1, 1]} : vector<16x128xf32> to vector<16x32xf32>
    %252 = math.tanh %251 : vector<16x32xf32>
    %253 = vector.extract_strided_slice %238 {offsets = [0, 96], sizes = [16, 32], strides = [1, 1]} : vector<16x128xf32> to vector<16x32xf32>
    %254 = arith.negf %253 : vector<16x32xf32>
    %255 = math.exp %254 : vector<16x32xf32>
    %cst_72 = arith.constant 1.000000e+00 : f32
    %256 = vector.broadcast %cst_72 : f32 to vector<16x32xf32>
    %257 = arith.addf %256, %255 : vector<16x32xf32>
    %258 = arith.divf %256, %257 : vector<16x32xf32>
    %259 = arith.mulf %250, %225 : vector<16x32xf32>
    %260 = arith.mulf %244, %252 : vector<16x32xf32>
    %261 = arith.addf %259, %260 : vector<16x32xf32>
    %262 = math.tanh %261 : vector<16x32xf32>
    %263 = arith.mulf %258, %262 : vector<16x32xf32>
    %264 = arith.truncf %263 : vector<16x32xf32> to vector<16x32xbf16>
    %265 = arith.index_cast %c6_i32 : i32 to index
    %c0_73 = arith.constant 0 : index
    %c0_74 = arith.constant 0 : index
    %266 = vector.load %arg18[%265, %c0_73, %c0_74] : memref<8x16x32xbf16, #tpu.memory_space<vmem>>, vector<1x16x32xbf16>
    %267 = vector.shape_cast %266 : vector<1x16x32xbf16> to vector<16x32xbf16>
    %268 = vector.shape_cast %264 : vector<16x32xbf16> to vector<1x16x32xbf16>
    tpu.vector_store %arg18[%265, %c0_73, %c0_74], %268 {strides = array<i32>} : memref<8x16x32xbf16, #tpu.memory_space<vmem>>, vector<1x16x32xbf16>,
    %c7_i32 = arith.constant 7 : i32
    %269 = arith.index_cast %c7_i32 : i32 to index
    %c0_75 = arith.constant 0 : index
    %c0_76 = arith.constant 0 : index
    %270 = vector.load %arg17[%269, %c0_75, %c0_76] : memref<8x16x128xf32, #tpu.memory_space<vmem>>, vector<1x16x128xf32>
    %271 = vector.shape_cast %270 : vector<1x16x128xf32> to vector<16x128xf32>
    %272 = arith.truncf %263 : vector<16x32xf32> to vector<16x32xbf16>
    %cst_77 = arith.constant dense<0.000000e+00> : vector<16x128xf32>
    %273 = tpu.matmul %272, %12, %cst_77 {dimension_numbers = #tpu.dot_dimension_numbers<[1], [0], [0], [1], [0, 0, 1, 1], [], []>} : vector<16x32xbf16>, vector<32x128xbf16>, vector<16x128xf32> -> vector<16x128xf32>
    %274 = arith.addf %271, %273 : vector<16x128xf32>
    %275 = vector.extract_strided_slice %274 {offsets = [0, 0], sizes = [16, 32], strides = [1, 1]} : vector<16x128xf32> to vector<16x32xf32>
    %276 = arith.negf %275 : vector<16x32xf32>
    %277 = math.exp %276 : vector<16x32xf32>
    %cst_78 = arith.constant 1.000000e+00 : f32
    %278 = vector.broadcast %cst_78 : f32 to vector<16x32xf32>
    %279 = arith.addf %278, %277 : vector<16x32xf32>
    %280 = arith.divf %278, %279 : vector<16x32xf32>
    %281 = vector.extract_strided_slice %274 {offsets = [0, 32], sizes = [16, 32], strides = [1, 1]} : vector<16x128xf32> to vector<16x32xf32>
    %282 = arith.negf %281 : vector<16x32xf32>
    %283 = math.exp %282 : vector<16x32xf32>
    %cst_79 = arith.constant 1.000000e+00 : f32
    %284 = vector.broadcast %cst_79 : f32 to vector<16x32xf32>
    %285 = arith.addf %284, %283 : vector<16x32xf32>
    %286 = arith.divf %284, %285 : vector<16x32xf32>
    %287 = vector.extract_strided_slice %274 {offsets = [0, 64], sizes = [16, 32], strides = [1, 1]} : vector<16x128xf32> to vector<16x32xf32>
    %288 = math.tanh %287 : vector<16x32xf32>
    %289 = vector.extract_strided_slice %274 {offsets = [0, 96], sizes = [16, 32], strides = [1, 1]} : vector<16x128xf32> to vector<16x32xf32>
    %290 = arith.negf %289 : vector<16x32xf32>
    %291 = math.exp %290 : vector<16x32xf32>
    %cst_80 = arith.constant 1.000000e+00 : f32
    %292 = vector.broadcast %cst_80 : f32 to vector<16x32xf32>
    %293 = arith.addf %292, %291 : vector<16x32xf32>
    %294 = arith.divf %292, %293 : vector<16x32xf32>
    %295 = arith.mulf %286, %261 : vector<16x32xf32>
    %296 = arith.mulf %280, %288 : vector<16x32xf32>
    %297 = arith.addf %295, %296 : vector<16x32xf32>
    %298 = math.tanh %297 : vector<16x32xf32>
    %299 = arith.mulf %294, %298 : vector<16x32xf32>
    %300 = arith.truncf %299 : vector<16x32xf32> to vector<16x32xbf16>
    %301 = arith.index_cast %c7_i32 : i32 to index
    %c0_81 = arith.constant 0 : index
    %c0_82 = arith.constant 0 : index
    %302 = vector.load %arg18[%301, %c0_81, %c0_82] : memref<8x16x32xbf16, #tpu.memory_space<vmem>>, vector<1x16x32xbf16>
    %303 = vector.shape_cast %302 : vector<1x16x32xbf16> to vector<16x32xbf16>
    %304 = vector.shape_cast %300 : vector<16x32xbf16> to vector<1x16x32xbf16>
    tpu.vector_store %arg18[%301, %c0_81, %c0_82], %304 {strides = array<i32>} : memref<8x16x32xbf16, #tpu.memory_space<vmem>>, vector<1x16x32xbf16>,
    %c8_i32 = arith.constant 8 : i32
    %c0_83 = arith.constant 0 : index
    %c0_84 = arith.constant 0 : index
    %c0_85 = arith.constant 0 : index
    %305 = vector.load %arg15[%c0_83, %c0_84, %c0_85] : memref<3x16x32xf32, #tpu.memory_space<vmem>>, vector<1x16x32xf32>
    %306 = vector.shape_cast %305 : vector<1x16x32xf32> to vector<16x32xf32>
    %307 = vector.shape_cast %299 : vector<16x32xf32> to vector<1x16x32xf32>
    tpu.vector_store %arg15[%c0_83, %c0_84, %c0_85], %307 {strides = array<i32>} : memref<3x16x32xf32, #tpu.memory_space<vmem>>, vector<1x16x32xf32>,
    %c0_86 = arith.constant 0 : index
    %c0_87 = arith.constant 0 : index
    %c0_88 = arith.constant 0 : index
    %308 = vector.load %arg16[%c0_86, %c0_87, %c0_88] : memref<3x16x32xf32, #tpu.memory_space<vmem>>, vector<1x16x32xf32>
    %309 = vector.shape_cast %308 : vector<1x16x32xf32> to vector<16x32xf32>
    %310 = vector.shape_cast %297 : vector<16x32xf32> to vector<1x16x32xf32>
    tpu.vector_store %arg16[%c0_86, %c0_87, %c0_88], %310 {strides = array<i32>} : memref<3x16x32xf32, #tpu.memory_space<vmem>>, vector<1x16x32xf32>,
    %c0_89 = arith.constant 0 : index
    %c0_90 = arith.constant 0 : index
    %c0_91 = arith.constant 0 : index
    %311 = vector.load %arg18[%c0_89, %c0_90, %c0_91] : memref<8x16x32xbf16, #tpu.memory_space<vmem>>, vector<8x16x32xbf16>
    %312 = vector.shape_cast %311 : vector<8x16x32xbf16> to vector<128x32xbf16>
    %c0_92 = arith.constant 0 : index
    %c0_93 = arith.constant 0 : index
    %313 = vector.load %arg4[%c0_92, %c0_93] : memref<32x128xbf16, #tpu.memory_space<vmem>>, vector<32x128xbf16>
    %cst_94 = arith.constant dense<0.000000e+00> : vector<128x128xf32>
    %314 = tpu.matmul %312, %313, %cst_94 {dimension_numbers = #tpu.dot_dimension_numbers<[1], [0], [0], [1], [0, 0, 1, 1], [], []>} : vector<128x32xbf16>, vector<32x128xbf16>, vector<128x128xf32> -> vector<128x128xf32>
    %c0_95 = arith.constant 0 : index
    %c0_96 = arith.constant 0 : index
    %315 = vector.load %arg10[%c0_95, %c0_96] : memref<1x128xf32, #tpu.memory_space<vmem>>, vector<1x128xf32>
    %316 = vector.broadcast %315 : vector<1x128xf32> to vector<128x128xf32>
    %317 = arith.addf %314, %316 : vector<128x128xf32>
    %318 = vector.shape_cast %317 : vector<128x128xf32> to vector<8x16x128xf32>
    %c0_97 = arith.constant 0 : index
    %c0_98 = arith.constant 0 : index
    %c0_99 = arith.constant 0 : index
    %319 = vector.load %arg17[%c0_97, %c0_98, %c0_99] : memref<8x16x128xf32, #tpu.memory_space<vmem>>, vector<8x16x128xf32>
    tpu.vector_store %arg17[%c0_97, %c0_98, %c0_99], %318 {strides = array<i32>} : memref<8x16x128xf32, #tpu.memory_space<vmem>>, vector<8x16x128xf32>,
    %c0_100 = arith.constant 0 : index
    %c0_101 = arith.constant 0 : index
    %320 = vector.load %arg7[%c0_100, %c0_101] : memref<32x128xbf16, #tpu.memory_space<vmem>>, vector<32x128xbf16>
    %c1 = arith.constant 1 : index
    %c0_102 = arith.constant 0 : index
    %c0_103 = arith.constant 0 : index
    %321 = vector.load %arg15[%c1, %c0_102, %c0_103] : memref<3x16x32xf32, #tpu.memory_space<vmem>>, vector<1x16x32xf32>
    %322 = vector.shape_cast %321 : vector<1x16x32xf32> to vector<16x32xf32>
    %c1_104 = arith.constant 1 : index
    %c0_105 = arith.constant 0 : index
    %c0_106 = arith.constant 0 : index
    %323 = vector.load %arg16[%c1_104, %c0_105, %c0_106] : memref<3x16x32xf32, #tpu.memory_space<vmem>>, vector<1x16x32xf32>
    %324 = vector.shape_cast %323 : vector<1x16x32xf32> to vector<16x32xf32>
    %c0_i32_107 = arith.constant 0 : i32
    %325 = arith.index_cast %c0_i32_107 : i32 to index
    %c0_108 = arith.constant 0 : index
    %c0_109 = arith.constant 0 : index
    %326 = vector.load %arg17[%325, %c0_108, %c0_109] : memref<8x16x128xf32, #tpu.memory_space<vmem>>, vector<1x16x128xf32>
    %327 = vector.shape_cast %326 : vector<1x16x128xf32> to vector<16x128xf32>
    %328 = arith.truncf %322 : vector<16x32xf32> to vector<16x32xbf16>
    %cst_110 = arith.constant dense<0.000000e+00> : vector<16x128xf32>
    %329 = tpu.matmul %328, %320, %cst_110 {dimension_numbers = #tpu.dot_dimension_numbers<[1], [0], [0], [1], [0, 0, 1, 1], [], []>} : vector<16x32xbf16>, vector<32x128xbf16>, vector<16x128xf32> -> vector<16x128xf32>
    %330 = arith.addf %327, %329 : vector<16x128xf32>
    %331 = vector.extract_strided_slice %330 {offsets = [0, 0], sizes = [16, 32], strides = [1, 1]} : vector<16x128xf32> to vector<16x32xf32>
    %332 = arith.negf %331 : vector<16x32xf32>
    %333 = math.exp %332 : vector<16x32xf32>
    %cst_111 = arith.constant 1.000000e+00 : f32
    %334 = vector.broadcast %cst_111 : f32 to vector<16x32xf32>
    %335 = arith.addf %334, %333 : vector<16x32xf32>
    %336 = arith.divf %334, %335 : vector<16x32xf32>
    %337 = vector.extract_strided_slice %330 {offsets = [0, 32], sizes = [16, 32], strides = [1, 1]} : vector<16x128xf32> to vector<16x32xf32>
    %338 = arith.negf %337 : vector<16x32xf32>
    %339 = math.exp %338 : vector<16x32xf32>
    %cst_112 = arith.constant 1.000000e+00 : f32
    %340 = vector.broadcast %cst_112 : f32 to vector<16x32xf32>
    %341 = arith.addf %340, %339 : vector<16x32xf32>
    %342 = arith.divf %340, %341 : vector<16x32xf32>
    %343 = vector.extract_strided_slice %330 {offsets = [0, 64], sizes = [16, 32], strides = [1, 1]} : vector<16x128xf32> to vector<16x32xf32>
    %344 = math.tanh %343 : vector<16x32xf32>
    %345 = vector.extract_strided_slice %330 {offsets = [0, 96], sizes = [16, 32], strides = [1, 1]} : vector<16x128xf32> to vector<16x32xf32>
    %346 = arith.negf %345 : vector<16x32xf32>
    %347 = math.exp %346 : vector<16x32xf32>
    %cst_113 = arith.constant 1.000000e+00 : f32
    %348 = vector.broadcast %cst_113 : f32 to vector<16x32xf32>
    %349 = arith.addf %348, %347 : vector<16x32xf32>
    %350 = arith.divf %348, %349 : vector<16x32xf32>
    %351 = arith.mulf %342, %324 : vector<16x32xf32>
    %352 = arith.mulf %336, %344 : vector<16x32xf32>
    %353 = arith.addf %351, %352 : vector<16x32xf32>
    %354 = math.tanh %353 : vector<16x32xf32>
    %355 = arith.mulf %350, %354 : vector<16x32xf32>
    %356 = arith.truncf %355 : vector<16x32xf32> to vector<16x32xbf16>
    %357 = arith.index_cast %c0_i32_107 : i32 to index
    %c0_114 = arith.constant 0 : index
    %c0_115 = arith.constant 0 : index
    %358 = vector.load %arg18[%357, %c0_114, %c0_115] : memref<8x16x32xbf16, #tpu.memory_space<vmem>>, vector<1x16x32xbf16>
    %359 = vector.shape_cast %358 : vector<1x16x32xbf16> to vector<16x32xbf16>
    %360 = vector.shape_cast %356 : vector<16x32xbf16> to vector<1x16x32xbf16>
    tpu.vector_store %arg18[%357, %c0_114, %c0_115], %360 {strides = array<i32>} : memref<8x16x32xbf16, #tpu.memory_space<vmem>>, vector<1x16x32xbf16>,
    %c1_i32_116 = arith.constant 1 : i32
    %361 = arith.index_cast %c1_i32_116 : i32 to index
    %c0_117 = arith.constant 0 : index
    %c0_118 = arith.constant 0 : index
    %362 = vector.load %arg17[%361, %c0_117, %c0_118] : memref<8x16x128xf32, #tpu.memory_space<vmem>>, vector<1x16x128xf32>
    %363 = vector.shape_cast %362 : vector<1x16x128xf32> to vector<16x128xf32>
    %364 = arith.truncf %355 : vector<16x32xf32> to vector<16x32xbf16>
    %cst_119 = arith.constant dense<0.000000e+00> : vector<16x128xf32>
    %365 = tpu.matmul %364, %320, %cst_119 {dimension_numbers = #tpu.dot_dimension_numbers<[1], [0], [0], [1], [0, 0, 1, 1], [], []>} : vector<16x32xbf16>, vector<32x128xbf16>, vector<16x128xf32> -> vector<16x128xf32>
    %366 = arith.addf %363, %365 : vector<16x128xf32>
    %367 = vector.extract_strided_slice %366 {offsets = [0, 0], sizes = [16, 32], strides = [1, 1]} : vector<16x128xf32> to vector<16x32xf32>
    %368 = arith.negf %367 : vector<16x32xf32>
    %369 = math.exp %368 : vector<16x32xf32>
    %cst_120 = arith.constant 1.000000e+00 : f32
    %370 = vector.broadcast %cst_120 : f32 to vector<16x32xf32>
    %371 = arith.addf %370, %369 : vector<16x32xf32>
    %372 = arith.divf %370, %371 : vector<16x32xf32>
    %373 = vector.extract_strided_slice %366 {offsets = [0, 32], sizes = [16, 32], strides = [1, 1]} : vector<16x128xf32> to vector<16x32xf32>
    %374 = arith.negf %373 : vector<16x32xf32>
    %375 = math.exp %374 : vector<16x32xf32>
    %cst_121 = arith.constant 1.000000e+00 : f32
    %376 = vector.broadcast %cst_121 : f32 to vector<16x32xf32>
    %377 = arith.addf %376, %375 : vector<16x32xf32>
    %378 = arith.divf %376, %377 : vector<16x32xf32>
    %379 = vector.extract_strided_slice %366 {offsets = [0, 64], sizes = [16, 32], strides = [1, 1]} : vector<16x128xf32> to vector<16x32xf32>
    %380 = math.tanh %379 : vector<16x32xf32>
    %381 = vector.extract_strided_slice %366 {offsets = [0, 96], sizes = [16, 32], strides = [1, 1]} : vector<16x128xf32> to vector<16x32xf32>
    %382 = arith.negf %381 : vector<16x32xf32>
    %383 = math.exp %382 : vector<16x32xf32>
    %cst_122 = arith.constant 1.000000e+00 : f32
    %384 = vector.broadcast %cst_122 : f32 to vector<16x32xf32>
    %385 = arith.addf %384, %383 : vector<16x32xf32>
    %386 = arith.divf %384, %385 : vector<16x32xf32>
    %387 = arith.mulf %378, %353 : vector<16x32xf32>
    %388 = arith.mulf %372, %380 : vector<16x32xf32>
    %389 = arith.addf %387, %388 : vector<16x32xf32>
    %390 = math.tanh %389 : vector<16x32xf32>
    %391 = arith.mulf %386, %390 : vector<16x32xf32>
    %392 = arith.truncf %391 : vector<16x32xf32> to vector<16x32xbf16>
    %393 = arith.index_cast %c1_i32_116 : i32 to index
    %c0_123 = arith.constant 0 : index
    %c0_124 = arith.constant 0 : index
    %394 = vector.load %arg18[%393, %c0_123, %c0_124] : memref<8x16x32xbf16, #tpu.memory_space<vmem>>, vector<1x16x32xbf16>
    %395 = vector.shape_cast %394 : vector<1x16x32xbf16> to vector<16x32xbf16>
    %396 = vector.shape_cast %392 : vector<16x32xbf16> to vector<1x16x32xbf16>
    tpu.vector_store %arg18[%393, %c0_123, %c0_124], %396 {strides = array<i32>} : memref<8x16x32xbf16, #tpu.memory_space<vmem>>, vector<1x16x32xbf16>,
    %c2_i32_125 = arith.constant 2 : i32
    %397 = arith.index_cast %c2_i32_125 : i32 to index
    %c0_126 = arith.constant 0 : index
    %c0_127 = arith.constant 0 : index
    %398 = vector.load %arg17[%397, %c0_126, %c0_127] : memref<8x16x128xf32, #tpu.memory_space<vmem>>, vector<1x16x128xf32>
    %399 = vector.shape_cast %398 : vector<1x16x128xf32> to vector<16x128xf32>
    %400 = arith.truncf %391 : vector<16x32xf32> to vector<16x32xbf16>
    %cst_128 = arith.constant dense<0.000000e+00> : vector<16x128xf32>
    %401 = tpu.matmul %400, %320, %cst_128 {dimension_numbers = #tpu.dot_dimension_numbers<[1], [0], [0], [1], [0, 0, 1, 1], [], []>} : vector<16x32xbf16>, vector<32x128xbf16>, vector<16x128xf32> -> vector<16x128xf32>
    %402 = arith.addf %399, %401 : vector<16x128xf32>
    %403 = vector.extract_strided_slice %402 {offsets = [0, 0], sizes = [16, 32], strides = [1, 1]} : vector<16x128xf32> to vector<16x32xf32>
    %404 = arith.negf %403 : vector<16x32xf32>
    %405 = math.exp %404 : vector<16x32xf32>
    %cst_129 = arith.constant 1.000000e+00 : f32
    %406 = vector.broadcast %cst_129 : f32 to vector<16x32xf32>
    %407 = arith.addf %406, %405 : vector<16x32xf32>
    %408 = arith.divf %406, %407 : vector<16x32xf32>
    %409 = vector.extract_strided_slice %402 {offsets = [0, 32], sizes = [16, 32], strides = [1, 1]} : vector<16x128xf32> to vector<16x32xf32>
    %410 = arith.negf %409 : vector<16x32xf32>
    %411 = math.exp %410 : vector<16x32xf32>
    %cst_130 = arith.constant 1.000000e+00 : f32
    %412 = vector.broadcast %cst_130 : f32 to vector<16x32xf32>
    %413 = arith.addf %412, %411 : vector<16x32xf32>
    %414 = arith.divf %412, %413 : vector<16x32xf32>
    %415 = vector.extract_strided_slice %402 {offsets = [0, 64], sizes = [16, 32], strides = [1, 1]} : vector<16x128xf32> to vector<16x32xf32>
    %416 = math.tanh %415 : vector<16x32xf32>
    %417 = vector.extract_strided_slice %402 {offsets = [0, 96], sizes = [16, 32], strides = [1, 1]} : vector<16x128xf32> to vector<16x32xf32>
    %418 = arith.negf %417 : vector<16x32xf32>
    %419 = math.exp %418 : vector<16x32xf32>
    %cst_131 = arith.constant 1.000000e+00 : f32
    %420 = vector.broadcast %cst_131 : f32 to vector<16x32xf32>
    %421 = arith.addf %420, %419 : vector<16x32xf32>
    %422 = arith.divf %420, %421 : vector<16x32xf32>
    %423 = arith.mulf %414, %389 : vector<16x32xf32>
    %424 = arith.mulf %408, %416 : vector<16x32xf32>
    %425 = arith.addf %423, %424 : vector<16x32xf32>
    %426 = math.tanh %425 : vector<16x32xf32>
    %427 = arith.mulf %422, %426 : vector<16x32xf32>
    %428 = arith.truncf %427 : vector<16x32xf32> to vector<16x32xbf16>
    %429 = arith.index_cast %c2_i32_125 : i32 to index
    %c0_132 = arith.constant 0 : index
    %c0_133 = arith.constant 0 : index
    %430 = vector.load %arg18[%429, %c0_132, %c0_133] : memref<8x16x32xbf16, #tpu.memory_space<vmem>>, vector<1x16x32xbf16>
    %431 = vector.shape_cast %430 : vector<1x16x32xbf16> to vector<16x32xbf16>
    %432 = vector.shape_cast %428 : vector<16x32xbf16> to vector<1x16x32xbf16>
    tpu.vector_store %arg18[%429, %c0_132, %c0_133], %432 {strides = array<i32>} : memref<8x16x32xbf16, #tpu.memory_space<vmem>>, vector<1x16x32xbf16>,
    %c3_i32_134 = arith.constant 3 : i32
    %433 = arith.index_cast %c3_i32_134 : i32 to index
    %c0_135 = arith.constant 0 : index
    %c0_136 = arith.constant 0 : index
    %434 = vector.load %arg17[%433, %c0_135, %c0_136] : memref<8x16x128xf32, #tpu.memory_space<vmem>>, vector<1x16x128xf32>
    %435 = vector.shape_cast %434 : vector<1x16x128xf32> to vector<16x128xf32>
    %436 = arith.truncf %427 : vector<16x32xf32> to vector<16x32xbf16>
    %cst_137 = arith.constant dense<0.000000e+00> : vector<16x128xf32>
    %437 = tpu.matmul %436, %320, %cst_137 {dimension_numbers = #tpu.dot_dimension_numbers<[1], [0], [0], [1], [0, 0, 1, 1], [], []>} : vector<16x32xbf16>, vector<32x128xbf16>, vector<16x128xf32> -> vector<16x128xf32>
    %438 = arith.addf %435, %437 : vector<16x128xf32>
    %439 = vector.extract_strided_slice %438 {offsets = [0, 0], sizes = [16, 32], strides = [1, 1]} : vector<16x128xf32> to vector<16x32xf32>
    %440 = arith.negf %439 : vector<16x32xf32>
    %441 = math.exp %440 : vector<16x32xf32>
    %cst_138 = arith.constant 1.000000e+00 : f32
    %442 = vector.broadcast %cst_138 : f32 to vector<16x32xf32>
    %443 = arith.addf %442, %441 : vector<16x32xf32>
    %444 = arith.divf %442, %443 : vector<16x32xf32>
    %445 = vector.extract_strided_slice %438 {offsets = [0, 32], sizes = [16, 32], strides = [1, 1]} : vector<16x128xf32> to vector<16x32xf32>
    %446 = arith.negf %445 : vector<16x32xf32>
    %447 = math.exp %446 : vector<16x32xf32>
    %cst_139 = arith.constant 1.000000e+00 : f32
    %448 = vector.broadcast %cst_139 : f32 to vector<16x32xf32>
    %449 = arith.addf %448, %447 : vector<16x32xf32>
    %450 = arith.divf %448, %449 : vector<16x32xf32>
    %451 = vector.extract_strided_slice %438 {offsets = [0, 64], sizes = [16, 32], strides = [1, 1]} : vector<16x128xf32> to vector<16x32xf32>
    %452 = math.tanh %451 : vector<16x32xf32>
    %453 = vector.extract_strided_slice %438 {offsets = [0, 96], sizes = [16, 32], strides = [1, 1]} : vector<16x128xf32> to vector<16x32xf32>
    %454 = arith.negf %453 : vector<16x32xf32>
    %455 = math.exp %454 : vector<16x32xf32>
    %cst_140 = arith.constant 1.000000e+00 : f32
    %456 = vector.broadcast %cst_140 : f32 to vector<16x32xf32>
    %457 = arith.addf %456, %455 : vector<16x32xf32>
    %458 = arith.divf %456, %457 : vector<16x32xf32>
    %459 = arith.mulf %450, %425 : vector<16x32xf32>
    %460 = arith.mulf %444, %452 : vector<16x32xf32>
    %461 = arith.addf %459, %460 : vector<16x32xf32>
    %462 = math.tanh %461 : vector<16x32xf32>
    %463 = arith.mulf %458, %462 : vector<16x32xf32>
    %464 = arith.truncf %463 : vector<16x32xf32> to vector<16x32xbf16>
    %465 = arith.index_cast %c3_i32_134 : i32 to index
    %c0_141 = arith.constant 0 : index
    %c0_142 = arith.constant 0 : index
    %466 = vector.load %arg18[%465, %c0_141, %c0_142] : memref<8x16x32xbf16, #tpu.memory_space<vmem>>, vector<1x16x32xbf16>
    %467 = vector.shape_cast %466 : vector<1x16x32xbf16> to vector<16x32xbf16>
    %468 = vector.shape_cast %464 : vector<16x32xbf16> to vector<1x16x32xbf16>
    tpu.vector_store %arg18[%465, %c0_141, %c0_142], %468 {strides = array<i32>} : memref<8x16x32xbf16, #tpu.memory_space<vmem>>, vector<1x16x32xbf16>,
    %c4_i32_143 = arith.constant 4 : i32
    %469 = arith.index_cast %c4_i32_143 : i32 to index
    %c0_144 = arith.constant 0 : index
    %c0_145 = arith.constant 0 : index
    %470 = vector.load %arg17[%469, %c0_144, %c0_145] : memref<8x16x128xf32, #tpu.memory_space<vmem>>, vector<1x16x128xf32>
    %471 = vector.shape_cast %470 : vector<1x16x128xf32> to vector<16x128xf32>
    %472 = arith.truncf %463 : vector<16x32xf32> to vector<16x32xbf16>
    %cst_146 = arith.constant dense<0.000000e+00> : vector<16x128xf32>
    %473 = tpu.matmul %472, %320, %cst_146 {dimension_numbers = #tpu.dot_dimension_numbers<[1], [0], [0], [1], [0, 0, 1, 1], [], []>} : vector<16x32xbf16>, vector<32x128xbf16>, vector<16x128xf32> -> vector<16x128xf32>
    %474 = arith.addf %471, %473 : vector<16x128xf32>
    %475 = vector.extract_strided_slice %474 {offsets = [0, 0], sizes = [16, 32], strides = [1, 1]} : vector<16x128xf32> to vector<16x32xf32>
    %476 = arith.negf %475 : vector<16x32xf32>
    %477 = math.exp %476 : vector<16x32xf32>
    %cst_147 = arith.constant 1.000000e+00 : f32
    %478 = vector.broadcast %cst_147 : f32 to vector<16x32xf32>
    %479 = arith.addf %478, %477 : vector<16x32xf32>
    %480 = arith.divf %478, %479 : vector<16x32xf32>
    %481 = vector.extract_strided_slice %474 {offsets = [0, 32], sizes = [16, 32], strides = [1, 1]} : vector<16x128xf32> to vector<16x32xf32>
    %482 = arith.negf %481 : vector<16x32xf32>
    %483 = math.exp %482 : vector<16x32xf32>
    %cst_148 = arith.constant 1.000000e+00 : f32
    %484 = vector.broadcast %cst_148 : f32 to vector<16x32xf32>
    %485 = arith.addf %484, %483 : vector<16x32xf32>
    %486 = arith.divf %484, %485 : vector<16x32xf32>
    %487 = vector.extract_strided_slice %474 {offsets = [0, 64], sizes = [16, 32], strides = [1, 1]} : vector<16x128xf32> to vector<16x32xf32>
    %488 = math.tanh %487 : vector<16x32xf32>
    %489 = vector.extract_strided_slice %474 {offsets = [0, 96], sizes = [16, 32], strides = [1, 1]} : vector<16x128xf32> to vector<16x32xf32>
    %490 = arith.negf %489 : vector<16x32xf32>
    %491 = math.exp %490 : vector<16x32xf32>
    %cst_149 = arith.constant 1.000000e+00 : f32
    %492 = vector.broadcast %cst_149 : f32 to vector<16x32xf32>
    %493 = arith.addf %492, %491 : vector<16x32xf32>
    %494 = arith.divf %492, %493 : vector<16x32xf32>
    %495 = arith.mulf %486, %461 : vector<16x32xf32>
    %496 = arith.mulf %480, %488 : vector<16x32xf32>
    %497 = arith.addf %495, %496 : vector<16x32xf32>
    %498 = math.tanh %497 : vector<16x32xf32>
    %499 = arith.mulf %494, %498 : vector<16x32xf32>
    %500 = arith.truncf %499 : vector<16x32xf32> to vector<16x32xbf16>
    %501 = arith.index_cast %c4_i32_143 : i32 to index
    %c0_150 = arith.constant 0 : index
    %c0_151 = arith.constant 0 : index
    %502 = vector.load %arg18[%501, %c0_150, %c0_151] : memref<8x16x32xbf16, #tpu.memory_space<vmem>>, vector<1x16x32xbf16>
    %503 = vector.shape_cast %502 : vector<1x16x32xbf16> to vector<16x32xbf16>
    %504 = vector.shape_cast %500 : vector<16x32xbf16> to vector<1x16x32xbf16>
    tpu.vector_store %arg18[%501, %c0_150, %c0_151], %504 {strides = array<i32>} : memref<8x16x32xbf16, #tpu.memory_space<vmem>>, vector<1x16x32xbf16>,
    %c5_i32_152 = arith.constant 5 : i32
    %505 = arith.index_cast %c5_i32_152 : i32 to index
    %c0_153 = arith.constant 0 : index
    %c0_154 = arith.constant 0 : index
    %506 = vector.load %arg17[%505, %c0_153, %c0_154] : memref<8x16x128xf32, #tpu.memory_space<vmem>>, vector<1x16x128xf32>
    %507 = vector.shape_cast %506 : vector<1x16x128xf32> to vector<16x128xf32>
    %508 = arith.truncf %499 : vector<16x32xf32> to vector<16x32xbf16>
    %cst_155 = arith.constant dense<0.000000e+00> : vector<16x128xf32>
    %509 = tpu.matmul %508, %320, %cst_155 {dimension_numbers = #tpu.dot_dimension_numbers<[1], [0], [0], [1], [0, 0, 1, 1], [], []>} : vector<16x32xbf16>, vector<32x128xbf16>, vector<16x128xf32> -> vector<16x128xf32>
    %510 = arith.addf %507, %509 : vector<16x128xf32>
    %511 = vector.extract_strided_slice %510 {offsets = [0, 0], sizes = [16, 32], strides = [1, 1]} : vector<16x128xf32> to vector<16x32xf32>
    %512 = arith.negf %511 : vector<16x32xf32>
    %513 = math.exp %512 : vector<16x32xf32>
    %cst_156 = arith.constant 1.000000e+00 : f32
    %514 = vector.broadcast %cst_156 : f32 to vector<16x32xf32>
    %515 = arith.addf %514, %513 : vector<16x32xf32>
    %516 = arith.divf %514, %515 : vector<16x32xf32>
    %517 = vector.extract_strided_slice %510 {offsets = [0, 32], sizes = [16, 32], strides = [1, 1]} : vector<16x128xf32> to vector<16x32xf32>
    %518 = arith.negf %517 : vector<16x32xf32>
    %519 = math.exp %518 : vector<16x32xf32>
    %cst_157 = arith.constant 1.000000e+00 : f32
    %520 = vector.broadcast %cst_157 : f32 to vector<16x32xf32>
    %521 = arith.addf %520, %519 : vector<16x32xf32>
    %522 = arith.divf %520, %521 : vector<16x32xf32>
    %523 = vector.extract_strided_slice %510 {offsets = [0, 64], sizes = [16, 32], strides = [1, 1]} : vector<16x128xf32> to vector<16x32xf32>
    %524 = math.tanh %523 : vector<16x32xf32>
    %525 = vector.extract_strided_slice %510 {offsets = [0, 96], sizes = [16, 32], strides = [1, 1]} : vector<16x128xf32> to vector<16x32xf32>
    %526 = arith.negf %525 : vector<16x32xf32>
    %527 = math.exp %526 : vector<16x32xf32>
    %cst_158 = arith.constant 1.000000e+00 : f32
    %528 = vector.broadcast %cst_158 : f32 to vector<16x32xf32>
    %529 = arith.addf %528, %527 : vector<16x32xf32>
    %530 = arith.divf %528, %529 : vector<16x32xf32>
    %531 = arith.mulf %522, %497 : vector<16x32xf32>
    %532 = arith.mulf %516, %524 : vector<16x32xf32>
    %533 = arith.addf %531, %532 : vector<16x32xf32>
    %534 = math.tanh %533 : vector<16x32xf32>
    %535 = arith.mulf %530, %534 : vector<16x32xf32>
    %536 = arith.truncf %535 : vector<16x32xf32> to vector<16x32xbf16>
    %537 = arith.index_cast %c5_i32_152 : i32 to index
    %c0_159 = arith.constant 0 : index
    %c0_160 = arith.constant 0 : index
    %538 = vector.load %arg18[%537, %c0_159, %c0_160] : memref<8x16x32xbf16, #tpu.memory_space<vmem>>, vector<1x16x32xbf16>
    %539 = vector.shape_cast %538 : vector<1x16x32xbf16> to vector<16x32xbf16>
    %540 = vector.shape_cast %536 : vector<16x32xbf16> to vector<1x16x32xbf16>
    tpu.vector_store %arg18[%537, %c0_159, %c0_160], %540 {strides = array<i32>} : memref<8x16x32xbf16, #tpu.memory_space<vmem>>, vector<1x16x32xbf16>,
    %c6_i32_161 = arith.constant 6 : i32
    %541 = arith.index_cast %c6_i32_161 : i32 to index
    %c0_162 = arith.constant 0 : index
    %c0_163 = arith.constant 0 : index
    %542 = vector.load %arg17[%541, %c0_162, %c0_163] : memref<8x16x128xf32, #tpu.memory_space<vmem>>, vector<1x16x128xf32>
    %543 = vector.shape_cast %542 : vector<1x16x128xf32> to vector<16x128xf32>
    %544 = arith.truncf %535 : vector<16x32xf32> to vector<16x32xbf16>
    %cst_164 = arith.constant dense<0.000000e+00> : vector<16x128xf32>
    %545 = tpu.matmul %544, %320, %cst_164 {dimension_numbers = #tpu.dot_dimension_numbers<[1], [0], [0], [1], [0, 0, 1, 1], [], []>} : vector<16x32xbf16>, vector<32x128xbf16>, vector<16x128xf32> -> vector<16x128xf32>
    %546 = arith.addf %543, %545 : vector<16x128xf32>
    %547 = vector.extract_strided_slice %546 {offsets = [0, 0], sizes = [16, 32], strides = [1, 1]} : vector<16x128xf32> to vector<16x32xf32>
    %548 = arith.negf %547 : vector<16x32xf32>
    %549 = math.exp %548 : vector<16x32xf32>
    %cst_165 = arith.constant 1.000000e+00 : f32
    %550 = vector.broadcast %cst_165 : f32 to vector<16x32xf32>
    %551 = arith.addf %550, %549 : vector<16x32xf32>
    %552 = arith.divf %550, %551 : vector<16x32xf32>
    %553 = vector.extract_strided_slice %546 {offsets = [0, 32], sizes = [16, 32], strides = [1, 1]} : vector<16x128xf32> to vector<16x32xf32>
    %554 = arith.negf %553 : vector<16x32xf32>
    %555 = math.exp %554 : vector<16x32xf32>
    %cst_166 = arith.constant 1.000000e+00 : f32
    %556 = vector.broadcast %cst_166 : f32 to vector<16x32xf32>
    %557 = arith.addf %556, %555 : vector<16x32xf32>
    %558 = arith.divf %556, %557 : vector<16x32xf32>
    %559 = vector.extract_strided_slice %546 {offsets = [0, 64], sizes = [16, 32], strides = [1, 1]} : vector<16x128xf32> to vector<16x32xf32>
    %560 = math.tanh %559 : vector<16x32xf32>
    %561 = vector.extract_strided_slice %546 {offsets = [0, 96], sizes = [16, 32], strides = [1, 1]} : vector<16x128xf32> to vector<16x32xf32>
    %562 = arith.negf %561 : vector<16x32xf32>
    %563 = math.exp %562 : vector<16x32xf32>
    %cst_167 = arith.constant 1.000000e+00 : f32
    %564 = vector.broadcast %cst_167 : f32 to vector<16x32xf32>
    %565 = arith.addf %564, %563 : vector<16x32xf32>
    %566 = arith.divf %564, %565 : vector<16x32xf32>
    %567 = arith.mulf %558, %533 : vector<16x32xf32>
    %568 = arith.mulf %552, %560 : vector<16x32xf32>
    %569 = arith.addf %567, %568 : vector<16x32xf32>
    %570 = math.tanh %569 : vector<16x32xf32>
    %571 = arith.mulf %566, %570 : vector<16x32xf32>
    %572 = arith.truncf %571 : vector<16x32xf32> to vector<16x32xbf16>
    %573 = arith.index_cast %c6_i32_161 : i32 to index
    %c0_168 = arith.constant 0 : index
    %c0_169 = arith.constant 0 : index
    %574 = vector.load %arg18[%573, %c0_168, %c0_169] : memref<8x16x32xbf16, #tpu.memory_space<vmem>>, vector<1x16x32xbf16>
    %575 = vector.shape_cast %574 : vector<1x16x32xbf16> to vector<16x32xbf16>
    %576 = vector.shape_cast %572 : vector<16x32xbf16> to vector<1x16x32xbf16>
    tpu.vector_store %arg18[%573, %c0_168, %c0_169], %576 {strides = array<i32>} : memref<8x16x32xbf16, #tpu.memory_space<vmem>>, vector<1x16x32xbf16>,
    %c7_i32_170 = arith.constant 7 : i32
    %577 = arith.index_cast %c7_i32_170 : i32 to index
    %c0_171 = arith.constant 0 : index
    %c0_172 = arith.constant 0 : index
    %578 = vector.load %arg17[%577, %c0_171, %c0_172] : memref<8x16x128xf32, #tpu.memory_space<vmem>>, vector<1x16x128xf32>
    %579 = vector.shape_cast %578 : vector<1x16x128xf32> to vector<16x128xf32>
    %580 = arith.truncf %571 : vector<16x32xf32> to vector<16x32xbf16>
    %cst_173 = arith.constant dense<0.000000e+00> : vector<16x128xf32>
    %581 = tpu.matmul %580, %320, %cst_173 {dimension_numbers = #tpu.dot_dimension_numbers<[1], [0], [0], [1], [0, 0, 1, 1], [], []>} : vector<16x32xbf16>, vector<32x128xbf16>, vector<16x128xf32> -> vector<16x128xf32>
    %582 = arith.addf %579, %581 : vector<16x128xf32>
    %583 = vector.extract_strided_slice %582 {offsets = [0, 0], sizes = [16, 32], strides = [1, 1]} : vector<16x128xf32> to vector<16x32xf32>
    %584 = arith.negf %583 : vector<16x32xf32>
    %585 = math.exp %584 : vector<16x32xf32>
    %cst_174 = arith.constant 1.000000e+00 : f32
    %586 = vector.broadcast %cst_174 : f32 to vector<16x32xf32>
    %587 = arith.addf %586, %585 : vector<16x32xf32>
    %588 = arith.divf %586, %587 : vector<16x32xf32>
    %589 = vector.extract_strided_slice %582 {offsets = [0, 32], sizes = [16, 32], strides = [1, 1]} : vector<16x128xf32> to vector<16x32xf32>
    %590 = arith.negf %589 : vector<16x32xf32>
    %591 = math.exp %590 : vector<16x32xf32>
    %cst_175 = arith.constant 1.000000e+00 : f32
    %592 = vector.broadcast %cst_175 : f32 to vector<16x32xf32>
    %593 = arith.addf %592, %591 : vector<16x32xf32>
    %594 = arith.divf %592, %593 : vector<16x32xf32>
    %595 = vector.extract_strided_slice %582 {offsets = [0, 64], sizes = [16, 32], strides = [1, 1]} : vector<16x128xf32> to vector<16x32xf32>
    %596 = math.tanh %595 : vector<16x32xf32>
    %597 = vector.extract_strided_slice %582 {offsets = [0, 96], sizes = [16, 32], strides = [1, 1]} : vector<16x128xf32> to vector<16x32xf32>
    %598 = arith.negf %597 : vector<16x32xf32>
    %599 = math.exp %598 : vector<16x32xf32>
    %cst_176 = arith.constant 1.000000e+00 : f32
    %600 = vector.broadcast %cst_176 : f32 to vector<16x32xf32>
    %601 = arith.addf %600, %599 : vector<16x32xf32>
    %602 = arith.divf %600, %601 : vector<16x32xf32>
    %603 = arith.mulf %594, %569 : vector<16x32xf32>
    %604 = arith.mulf %588, %596 : vector<16x32xf32>
    %605 = arith.addf %603, %604 : vector<16x32xf32>
    %606 = math.tanh %605 : vector<16x32xf32>
    %607 = arith.mulf %602, %606 : vector<16x32xf32>
    %608 = arith.truncf %607 : vector<16x32xf32> to vector<16x32xbf16>
    %609 = arith.index_cast %c7_i32_170 : i32 to index
    %c0_177 = arith.constant 0 : index
    %c0_178 = arith.constant 0 : index
    %610 = vector.load %arg18[%609, %c0_177, %c0_178] : memref<8x16x32xbf16, #tpu.memory_space<vmem>>, vector<1x16x32xbf16>
    %611 = vector.shape_cast %610 : vector<1x16x32xbf16> to vector<16x32xbf16>
    %612 = vector.shape_cast %608 : vector<16x32xbf16> to vector<1x16x32xbf16>
    tpu.vector_store %arg18[%609, %c0_177, %c0_178], %612 {strides = array<i32>} : memref<8x16x32xbf16, #tpu.memory_space<vmem>>, vector<1x16x32xbf16>,
    %c8_i32_179 = arith.constant 8 : i32
    %c1_180 = arith.constant 1 : index
    %c0_181 = arith.constant 0 : index
    %c0_182 = arith.constant 0 : index
    %613 = vector.load %arg15[%c1_180, %c0_181, %c0_182] : memref<3x16x32xf32, #tpu.memory_space<vmem>>, vector<1x16x32xf32>
    %614 = vector.shape_cast %613 : vector<1x16x32xf32> to vector<16x32xf32>
    %615 = vector.shape_cast %607 : vector<16x32xf32> to vector<1x16x32xf32>
    tpu.vector_store %arg15[%c1_180, %c0_181, %c0_182], %615 {strides = array<i32>} : memref<3x16x32xf32, #tpu.memory_space<vmem>>, vector<1x16x32xf32>,
    %c1_183 = arith.constant 1 : index
    %c0_184 = arith.constant 0 : index
    %c0_185 = arith.constant 0 : index
    %616 = vector.load %arg16[%c1_183, %c0_184, %c0_185] : memref<3x16x32xf32, #tpu.memory_space<vmem>>, vector<1x16x32xf32>
    %617 = vector.shape_cast %616 : vector<1x16x32xf32> to vector<16x32xf32>
    %618 = vector.shape_cast %605 : vector<16x32xf32> to vector<1x16x32xf32>
    tpu.vector_store %arg16[%c1_183, %c0_184, %c0_185], %618 {strides = array<i32>} : memref<3x16x32xf32, #tpu.memory_space<vmem>>, vector<1x16x32xf32>,
    %c0_186 = arith.constant 0 : index
    %c0_187 = arith.constant 0 : index
    %c0_188 = arith.constant 0 : index
    %619 = vector.load %arg18[%c0_186, %c0_187, %c0_188] : memref<8x16x32xbf16, #tpu.memory_space<vmem>>, vector<8x16x32xbf16>
    %620 = vector.shape_cast %619 : vector<8x16x32xbf16> to vector<128x32xbf16>
    %c0_189 = arith.constant 0 : index
    %c0_190 = arith.constant 0 : index
    %621 = vector.load %arg5[%c0_189, %c0_190] : memref<32x128xbf16, #tpu.memory_space<vmem>>, vector<32x128xbf16>
    %cst_191 = arith.constant dense<0.000000e+00> : vector<128x128xf32>
    %622 = tpu.matmul %620, %621, %cst_191 {dimension_numbers = #tpu.dot_dimension_numbers<[1], [0], [0], [1], [0, 0, 1, 1], [], []>} : vector<128x32xbf16>, vector<32x128xbf16>, vector<128x128xf32> -> vector<128x128xf32>
    %c0_192 = arith.constant 0 : index
    %c0_193 = arith.constant 0 : index
    %623 = vector.load %arg11[%c0_192, %c0_193] : memref<1x128xf32, #tpu.memory_space<vmem>>, vector<1x128xf32>
    %624 = vector.broadcast %623 : vector<1x128xf32> to vector<128x128xf32>
    %625 = arith.addf %622, %624 : vector<128x128xf32>
    %626 = vector.shape_cast %625 : vector<128x128xf32> to vector<8x16x128xf32>
    %c0_194 = arith.constant 0 : index
    %c0_195 = arith.constant 0 : index
    %c0_196 = arith.constant 0 : index
    %627 = vector.load %arg17[%c0_194, %c0_195, %c0_196] : memref<8x16x128xf32, #tpu.memory_space<vmem>>, vector<8x16x128xf32>
    tpu.vector_store %arg17[%c0_194, %c0_195, %c0_196], %626 {strides = array<i32>} : memref<8x16x128xf32, #tpu.memory_space<vmem>>, vector<8x16x128xf32>,
    %c0_197 = arith.constant 0 : index
    %c0_198 = arith.constant 0 : index
    %628 = vector.load %arg8[%c0_197, %c0_198] : memref<32x128xbf16, #tpu.memory_space<vmem>>, vector<32x128xbf16>
    %c2 = arith.constant 2 : index
    %c0_199 = arith.constant 0 : index
    %c0_200 = arith.constant 0 : index
    %629 = vector.load %arg15[%c2, %c0_199, %c0_200] : memref<3x16x32xf32, #tpu.memory_space<vmem>>, vector<1x16x32xf32>
    %630 = vector.shape_cast %629 : vector<1x16x32xf32> to vector<16x32xf32>
    %c2_201 = arith.constant 2 : index
    %c0_202 = arith.constant 0 : index
    %c0_203 = arith.constant 0 : index
    %631 = vector.load %arg16[%c2_201, %c0_202, %c0_203] : memref<3x16x32xf32, #tpu.memory_space<vmem>>, vector<1x16x32xf32>
    %632 = vector.shape_cast %631 : vector<1x16x32xf32> to vector<16x32xf32>
    %c0_i32_204 = arith.constant 0 : i32
    %633 = arith.index_cast %c0_i32_204 : i32 to index
    %c0_205 = arith.constant 0 : index
    %c0_206 = arith.constant 0 : index
    %634 = vector.load %arg17[%633, %c0_205, %c0_206] : memref<8x16x128xf32, #tpu.memory_space<vmem>>, vector<1x16x128xf32>
    %635 = vector.shape_cast %634 : vector<1x16x128xf32> to vector<16x128xf32>
    %636 = arith.truncf %630 : vector<16x32xf32> to vector<16x32xbf16>
    %cst_207 = arith.constant dense<0.000000e+00> : vector<16x128xf32>
    %637 = tpu.matmul %636, %628, %cst_207 {dimension_numbers = #tpu.dot_dimension_numbers<[1], [0], [0], [1], [0, 0, 1, 1], [], []>} : vector<16x32xbf16>, vector<32x128xbf16>, vector<16x128xf32> -> vector<16x128xf32>
    %638 = arith.addf %635, %637 : vector<16x128xf32>
    %639 = vector.extract_strided_slice %638 {offsets = [0, 0], sizes = [16, 32], strides = [1, 1]} : vector<16x128xf32> to vector<16x32xf32>
    %640 = arith.negf %639 : vector<16x32xf32>
    %641 = math.exp %640 : vector<16x32xf32>
    %cst_208 = arith.constant 1.000000e+00 : f32
    %642 = vector.broadcast %cst_208 : f32 to vector<16x32xf32>
    %643 = arith.addf %642, %641 : vector<16x32xf32>
    %644 = arith.divf %642, %643 : vector<16x32xf32>
    %645 = vector.extract_strided_slice %638 {offsets = [0, 32], sizes = [16, 32], strides = [1, 1]} : vector<16x128xf32> to vector<16x32xf32>
    %646 = arith.negf %645 : vector<16x32xf32>
    %647 = math.exp %646 : vector<16x32xf32>
    %cst_209 = arith.constant 1.000000e+00 : f32
    %648 = vector.broadcast %cst_209 : f32 to vector<16x32xf32>
    %649 = arith.addf %648, %647 : vector<16x32xf32>
    %650 = arith.divf %648, %649 : vector<16x32xf32>
    %651 = vector.extract_strided_slice %638 {offsets = [0, 64], sizes = [16, 32], strides = [1, 1]} : vector<16x128xf32> to vector<16x32xf32>
    %652 = math.tanh %651 : vector<16x32xf32>
    %653 = vector.extract_strided_slice %638 {offsets = [0, 96], sizes = [16, 32], strides = [1, 1]} : vector<16x128xf32> to vector<16x32xf32>
    %654 = arith.negf %653 : vector<16x32xf32>
    %655 = math.exp %654 : vector<16x32xf32>
    %cst_210 = arith.constant 1.000000e+00 : f32
    %656 = vector.broadcast %cst_210 : f32 to vector<16x32xf32>
    %657 = arith.addf %656, %655 : vector<16x32xf32>
    %658 = arith.divf %656, %657 : vector<16x32xf32>
    %659 = arith.mulf %650, %632 : vector<16x32xf32>
    %660 = arith.mulf %644, %652 : vector<16x32xf32>
    %661 = arith.addf %659, %660 : vector<16x32xf32>
    %662 = math.tanh %661 : vector<16x32xf32>
    %663 = arith.mulf %658, %662 : vector<16x32xf32>
    %664 = arith.truncf %663 : vector<16x32xf32> to vector<16x32xbf16>
    %665 = arith.index_cast %c0_i32_204 : i32 to index
    %c0_211 = arith.constant 0 : index
    %c0_212 = arith.constant 0 : index
    %666 = vector.load %arg18[%665, %c0_211, %c0_212] : memref<8x16x32xbf16, #tpu.memory_space<vmem>>, vector<1x16x32xbf16>
    %667 = vector.shape_cast %666 : vector<1x16x32xbf16> to vector<16x32xbf16>
    %668 = vector.shape_cast %664 : vector<16x32xbf16> to vector<1x16x32xbf16>
    tpu.vector_store %arg18[%665, %c0_211, %c0_212], %668 {strides = array<i32>} : memref<8x16x32xbf16, #tpu.memory_space<vmem>>, vector<1x16x32xbf16>,
    %c1_i32_213 = arith.constant 1 : i32
    %669 = arith.index_cast %c1_i32_213 : i32 to index
    %c0_214 = arith.constant 0 : index
    %c0_215 = arith.constant 0 : index
    %670 = vector.load %arg17[%669, %c0_214, %c0_215] : memref<8x16x128xf32, #tpu.memory_space<vmem>>, vector<1x16x128xf32>
    %671 = vector.shape_cast %670 : vector<1x16x128xf32> to vector<16x128xf32>
    %672 = arith.truncf %663 : vector<16x32xf32> to vector<16x32xbf16>
    %cst_216 = arith.constant dense<0.000000e+00> : vector<16x128xf32>
    %673 = tpu.matmul %672, %628, %cst_216 {dimension_numbers = #tpu.dot_dimension_numbers<[1], [0], [0], [1], [0, 0, 1, 1], [], []>} : vector<16x32xbf16>, vector<32x128xbf16>, vector<16x128xf32> -> vector<16x128xf32>
    %674 = arith.addf %671, %673 : vector<16x128xf32>
    %675 = vector.extract_strided_slice %674 {offsets = [0, 0], sizes = [16, 32], strides = [1, 1]} : vector<16x128xf32> to vector<16x32xf32>
    %676 = arith.negf %675 : vector<16x32xf32>
    %677 = math.exp %676 : vector<16x32xf32>
    %cst_217 = arith.constant 1.000000e+00 : f32
    %678 = vector.broadcast %cst_217 : f32 to vector<16x32xf32>
    %679 = arith.addf %678, %677 : vector<16x32xf32>
    %680 = arith.divf %678, %679 : vector<16x32xf32>
    %681 = vector.extract_strided_slice %674 {offsets = [0, 32], sizes = [16, 32], strides = [1, 1]} : vector<16x128xf32> to vector<16x32xf32>
    %682 = arith.negf %681 : vector<16x32xf32>
    %683 = math.exp %682 : vector<16x32xf32>
    %cst_218 = arith.constant 1.000000e+00 : f32
    %684 = vector.broadcast %cst_218 : f32 to vector<16x32xf32>
    %685 = arith.addf %684, %683 : vector<16x32xf32>
    %686 = arith.divf %684, %685 : vector<16x32xf32>
    %687 = vector.extract_strided_slice %674 {offsets = [0, 64], sizes = [16, 32], strides = [1, 1]} : vector<16x128xf32> to vector<16x32xf32>
    %688 = math.tanh %687 : vector<16x32xf32>
    %689 = vector.extract_strided_slice %674 {offsets = [0, 96], sizes = [16, 32], strides = [1, 1]} : vector<16x128xf32> to vector<16x32xf32>
    %690 = arith.negf %689 : vector<16x32xf32>
    %691 = math.exp %690 : vector<16x32xf32>
    %cst_219 = arith.constant 1.000000e+00 : f32
    %692 = vector.broadcast %cst_219 : f32 to vector<16x32xf32>
    %693 = arith.addf %692, %691 : vector<16x32xf32>
    %694 = arith.divf %692, %693 : vector<16x32xf32>
    %695 = arith.mulf %686, %661 : vector<16x32xf32>
    %696 = arith.mulf %680, %688 : vector<16x32xf32>
    %697 = arith.addf %695, %696 : vector<16x32xf32>
    %698 = math.tanh %697 : vector<16x32xf32>
    %699 = arith.mulf %694, %698 : vector<16x32xf32>
    %700 = arith.truncf %699 : vector<16x32xf32> to vector<16x32xbf16>
    %701 = arith.index_cast %c1_i32_213 : i32 to index
    %c0_220 = arith.constant 0 : index
    %c0_221 = arith.constant 0 : index
    %702 = vector.load %arg18[%701, %c0_220, %c0_221] : memref<8x16x32xbf16, #tpu.memory_space<vmem>>, vector<1x16x32xbf16>
    %703 = vector.shape_cast %702 : vector<1x16x32xbf16> to vector<16x32xbf16>
    %704 = vector.shape_cast %700 : vector<16x32xbf16> to vector<1x16x32xbf16>
    tpu.vector_store %arg18[%701, %c0_220, %c0_221], %704 {strides = array<i32>} : memref<8x16x32xbf16, #tpu.memory_space<vmem>>, vector<1x16x32xbf16>,
    %c2_i32_222 = arith.constant 2 : i32
    %705 = arith.index_cast %c2_i32_222 : i32 to index
    %c0_223 = arith.constant 0 : index
    %c0_224 = arith.constant 0 : index
    %706 = vector.load %arg17[%705, %c0_223, %c0_224] : memref<8x16x128xf32, #tpu.memory_space<vmem>>, vector<1x16x128xf32>
    %707 = vector.shape_cast %706 : vector<1x16x128xf32> to vector<16x128xf32>
    %708 = arith.truncf %699 : vector<16x32xf32> to vector<16x32xbf16>
    %cst_225 = arith.constant dense<0.000000e+00> : vector<16x128xf32>
    %709 = tpu.matmul %708, %628, %cst_225 {dimension_numbers = #tpu.dot_dimension_numbers<[1], [0], [0], [1], [0, 0, 1, 1], [], []>} : vector<16x32xbf16>, vector<32x128xbf16>, vector<16x128xf32> -> vector<16x128xf32>
    %710 = arith.addf %707, %709 : vector<16x128xf32>
    %711 = vector.extract_strided_slice %710 {offsets = [0, 0], sizes = [16, 32], strides = [1, 1]} : vector<16x128xf32> to vector<16x32xf32>
    %712 = arith.negf %711 : vector<16x32xf32>
    %713 = math.exp %712 : vector<16x32xf32>
    %cst_226 = arith.constant 1.000000e+00 : f32
    %714 = vector.broadcast %cst_226 : f32 to vector<16x32xf32>
    %715 = arith.addf %714, %713 : vector<16x32xf32>
    %716 = arith.divf %714, %715 : vector<16x32xf32>
    %717 = vector.extract_strided_slice %710 {offsets = [0, 32], sizes = [16, 32], strides = [1, 1]} : vector<16x128xf32> to vector<16x32xf32>
    %718 = arith.negf %717 : vector<16x32xf32>
    %719 = math.exp %718 : vector<16x32xf32>
    %cst_227 = arith.constant 1.000000e+00 : f32
    %720 = vector.broadcast %cst_227 : f32 to vector<16x32xf32>
    %721 = arith.addf %720, %719 : vector<16x32xf32>
    %722 = arith.divf %720, %721 : vector<16x32xf32>
    %723 = vector.extract_strided_slice %710 {offsets = [0, 64], sizes = [16, 32], strides = [1, 1]} : vector<16x128xf32> to vector<16x32xf32>
    %724 = math.tanh %723 : vector<16x32xf32>
    %725 = vector.extract_strided_slice %710 {offsets = [0, 96], sizes = [16, 32], strides = [1, 1]} : vector<16x128xf32> to vector<16x32xf32>
    %726 = arith.negf %725 : vector<16x32xf32>
    %727 = math.exp %726 : vector<16x32xf32>
    %cst_228 = arith.constant 1.000000e+00 : f32
    %728 = vector.broadcast %cst_228 : f32 to vector<16x32xf32>
    %729 = arith.addf %728, %727 : vector<16x32xf32>
    %730 = arith.divf %728, %729 : vector<16x32xf32>
    %731 = arith.mulf %722, %697 : vector<16x32xf32>
    %732 = arith.mulf %716, %724 : vector<16x32xf32>
    %733 = arith.addf %731, %732 : vector<16x32xf32>
    %734 = math.tanh %733 : vector<16x32xf32>
    %735 = arith.mulf %730, %734 : vector<16x32xf32>
    %736 = arith.truncf %735 : vector<16x32xf32> to vector<16x32xbf16>
    %737 = arith.index_cast %c2_i32_222 : i32 to index
    %c0_229 = arith.constant 0 : index
    %c0_230 = arith.constant 0 : index
    %738 = vector.load %arg18[%737, %c0_229, %c0_230] : memref<8x16x32xbf16, #tpu.memory_space<vmem>>, vector<1x16x32xbf16>
    %739 = vector.shape_cast %738 : vector<1x16x32xbf16> to vector<16x32xbf16>
    %740 = vector.shape_cast %736 : vector<16x32xbf16> to vector<1x16x32xbf16>
    tpu.vector_store %arg18[%737, %c0_229, %c0_230], %740 {strides = array<i32>} : memref<8x16x32xbf16, #tpu.memory_space<vmem>>, vector<1x16x32xbf16>,
    %c3_i32_231 = arith.constant 3 : i32
    %741 = arith.index_cast %c3_i32_231 : i32 to index
    %c0_232 = arith.constant 0 : index
    %c0_233 = arith.constant 0 : index
    %742 = vector.load %arg17[%741, %c0_232, %c0_233] : memref<8x16x128xf32, #tpu.memory_space<vmem>>, vector<1x16x128xf32>
    %743 = vector.shape_cast %742 : vector<1x16x128xf32> to vector<16x128xf32>
    %744 = arith.truncf %735 : vector<16x32xf32> to vector<16x32xbf16>
    %cst_234 = arith.constant dense<0.000000e+00> : vector<16x128xf32>
    %745 = tpu.matmul %744, %628, %cst_234 {dimension_numbers = #tpu.dot_dimension_numbers<[1], [0], [0], [1], [0, 0, 1, 1], [], []>} : vector<16x32xbf16>, vector<32x128xbf16>, vector<16x128xf32> -> vector<16x128xf32>
    %746 = arith.addf %743, %745 : vector<16x128xf32>
    %747 = vector.extract_strided_slice %746 {offsets = [0, 0], sizes = [16, 32], strides = [1, 1]} : vector<16x128xf32> to vector<16x32xf32>
    %748 = arith.negf %747 : vector<16x32xf32>
    %749 = math.exp %748 : vector<16x32xf32>
    %cst_235 = arith.constant 1.000000e+00 : f32
    %750 = vector.broadcast %cst_235 : f32 to vector<16x32xf32>
    %751 = arith.addf %750, %749 : vector<16x32xf32>
    %752 = arith.divf %750, %751 : vector<16x32xf32>
    %753 = vector.extract_strided_slice %746 {offsets = [0, 32], sizes = [16, 32], strides = [1, 1]} : vector<16x128xf32> to vector<16x32xf32>
    %754 = arith.negf %753 : vector<16x32xf32>
    %755 = math.exp %754 : vector<16x32xf32>
    %cst_236 = arith.constant 1.000000e+00 : f32
    %756 = vector.broadcast %cst_236 : f32 to vector<16x32xf32>
    %757 = arith.addf %756, %755 : vector<16x32xf32>
    %758 = arith.divf %756, %757 : vector<16x32xf32>
    %759 = vector.extract_strided_slice %746 {offsets = [0, 64], sizes = [16, 32], strides = [1, 1]} : vector<16x128xf32> to vector<16x32xf32>
    %760 = math.tanh %759 : vector<16x32xf32>
    %761 = vector.extract_strided_slice %746 {offsets = [0, 96], sizes = [16, 32], strides = [1, 1]} : vector<16x128xf32> to vector<16x32xf32>
    %762 = arith.negf %761 : vector<16x32xf32>
    %763 = math.exp %762 : vector<16x32xf32>
    %cst_237 = arith.constant 1.000000e+00 : f32
    %764 = vector.broadcast %cst_237 : f32 to vector<16x32xf32>
    %765 = arith.addf %764, %763 : vector<16x32xf32>
    %766 = arith.divf %764, %765 : vector<16x32xf32>
    %767 = arith.mulf %758, %733 : vector<16x32xf32>
    %768 = arith.mulf %752, %760 : vector<16x32xf32>
    %769 = arith.addf %767, %768 : vector<16x32xf32>
    %770 = math.tanh %769 : vector<16x32xf32>
    %771 = arith.mulf %766, %770 : vector<16x32xf32>
    %772 = arith.truncf %771 : vector<16x32xf32> to vector<16x32xbf16>
    %773 = arith.index_cast %c3_i32_231 : i32 to index
    %c0_238 = arith.constant 0 : index
    %c0_239 = arith.constant 0 : index
    %774 = vector.load %arg18[%773, %c0_238, %c0_239] : memref<8x16x32xbf16, #tpu.memory_space<vmem>>, vector<1x16x32xbf16>
    %775 = vector.shape_cast %774 : vector<1x16x32xbf16> to vector<16x32xbf16>
    %776 = vector.shape_cast %772 : vector<16x32xbf16> to vector<1x16x32xbf16>
    tpu.vector_store %arg18[%773, %c0_238, %c0_239], %776 {strides = array<i32>} : memref<8x16x32xbf16, #tpu.memory_space<vmem>>, vector<1x16x32xbf16>,
    %c4_i32_240 = arith.constant 4 : i32
    %777 = arith.index_cast %c4_i32_240 : i32 to index
    %c0_241 = arith.constant 0 : index
    %c0_242 = arith.constant 0 : index
    %778 = vector.load %arg17[%777, %c0_241, %c0_242] : memref<8x16x128xf32, #tpu.memory_space<vmem>>, vector<1x16x128xf32>
    %779 = vector.shape_cast %778 : vector<1x16x128xf32> to vector<16x128xf32>
    %780 = arith.truncf %771 : vector<16x32xf32> to vector<16x32xbf16>
    %cst_243 = arith.constant dense<0.000000e+00> : vector<16x128xf32>
    %781 = tpu.matmul %780, %628, %cst_243 {dimension_numbers = #tpu.dot_dimension_numbers<[1], [0], [0], [1], [0, 0, 1, 1], [], []>} : vector<16x32xbf16>, vector<32x128xbf16>, vector<16x128xf32> -> vector<16x128xf32>
    %782 = arith.addf %779, %781 : vector<16x128xf32>
    %783 = vector.extract_strided_slice %782 {offsets = [0, 0], sizes = [16, 32], strides = [1, 1]} : vector<16x128xf32> to vector<16x32xf32>
    %784 = arith.negf %783 : vector<16x32xf32>
    %785 = math.exp %784 : vector<16x32xf32>
    %cst_244 = arith.constant 1.000000e+00 : f32
    %786 = vector.broadcast %cst_244 : f32 to vector<16x32xf32>
    %787 = arith.addf %786, %785 : vector<16x32xf32>
    %788 = arith.divf %786, %787 : vector<16x32xf32>
    %789 = vector.extract_strided_slice %782 {offsets = [0, 32], sizes = [16, 32], strides = [1, 1]} : vector<16x128xf32> to vector<16x32xf32>
    %790 = arith.negf %789 : vector<16x32xf32>
    %791 = math.exp %790 : vector<16x32xf32>
    %cst_245 = arith.constant 1.000000e+00 : f32
    %792 = vector.broadcast %cst_245 : f32 to vector<16x32xf32>
    %793 = arith.addf %792, %791 : vector<16x32xf32>
    %794 = arith.divf %792, %793 : vector<16x32xf32>
    %795 = vector.extract_strided_slice %782 {offsets = [0, 64], sizes = [16, 32], strides = [1, 1]} : vector<16x128xf32> to vector<16x32xf32>
    %796 = math.tanh %795 : vector<16x32xf32>
    %797 = vector.extract_strided_slice %782 {offsets = [0, 96], sizes = [16, 32], strides = [1, 1]} : vector<16x128xf32> to vector<16x32xf32>
    %798 = arith.negf %797 : vector<16x32xf32>
    %799 = math.exp %798 : vector<16x32xf32>
    %cst_246 = arith.constant 1.000000e+00 : f32
    %800 = vector.broadcast %cst_246 : f32 to vector<16x32xf32>
    %801 = arith.addf %800, %799 : vector<16x32xf32>
    %802 = arith.divf %800, %801 : vector<16x32xf32>
    %803 = arith.mulf %794, %769 : vector<16x32xf32>
    %804 = arith.mulf %788, %796 : vector<16x32xf32>
    %805 = arith.addf %803, %804 : vector<16x32xf32>
    %806 = math.tanh %805 : vector<16x32xf32>
    %807 = arith.mulf %802, %806 : vector<16x32xf32>
    %808 = arith.truncf %807 : vector<16x32xf32> to vector<16x32xbf16>
    %809 = arith.index_cast %c4_i32_240 : i32 to index
    %c0_247 = arith.constant 0 : index
    %c0_248 = arith.constant 0 : index
    %810 = vector.load %arg18[%809, %c0_247, %c0_248] : memref<8x16x32xbf16, #tpu.memory_space<vmem>>, vector<1x16x32xbf16>
    %811 = vector.shape_cast %810 : vector<1x16x32xbf16> to vector<16x32xbf16>
    %812 = vector.shape_cast %808 : vector<16x32xbf16> to vector<1x16x32xbf16>
    tpu.vector_store %arg18[%809, %c0_247, %c0_248], %812 {strides = array<i32>} : memref<8x16x32xbf16, #tpu.memory_space<vmem>>, vector<1x16x32xbf16>,
    %c5_i32_249 = arith.constant 5 : i32
    %813 = arith.index_cast %c5_i32_249 : i32 to index
    %c0_250 = arith.constant 0 : index
    %c0_251 = arith.constant 0 : index
    %814 = vector.load %arg17[%813, %c0_250, %c0_251] : memref<8x16x128xf32, #tpu.memory_space<vmem>>, vector<1x16x128xf32>
    %815 = vector.shape_cast %814 : vector<1x16x128xf32> to vector<16x128xf32>
    %816 = arith.truncf %807 : vector<16x32xf32> to vector<16x32xbf16>
    %cst_252 = arith.constant dense<0.000000e+00> : vector<16x128xf32>
    %817 = tpu.matmul %816, %628, %cst_252 {dimension_numbers = #tpu.dot_dimension_numbers<[1], [0], [0], [1], [0, 0, 1, 1], [], []>} : vector<16x32xbf16>, vector<32x128xbf16>, vector<16x128xf32> -> vector<16x128xf32>
    %818 = arith.addf %815, %817 : vector<16x128xf32>
    %819 = vector.extract_strided_slice %818 {offsets = [0, 0], sizes = [16, 32], strides = [1, 1]} : vector<16x128xf32> to vector<16x32xf32>
    %820 = arith.negf %819 : vector<16x32xf32>
    %821 = math.exp %820 : vector<16x32xf32>
    %cst_253 = arith.constant 1.000000e+00 : f32
    %822 = vector.broadcast %cst_253 : f32 to vector<16x32xf32>
    %823 = arith.addf %822, %821 : vector<16x32xf32>
    %824 = arith.divf %822, %823 : vector<16x32xf32>
    %825 = vector.extract_strided_slice %818 {offsets = [0, 32], sizes = [16, 32], strides = [1, 1]} : vector<16x128xf32> to vector<16x32xf32>
    %826 = arith.negf %825 : vector<16x32xf32>
    %827 = math.exp %826 : vector<16x32xf32>
    %cst_254 = arith.constant 1.000000e+00 : f32
    %828 = vector.broadcast %cst_254 : f32 to vector<16x32xf32>
    %829 = arith.addf %828, %827 : vector<16x32xf32>
    %830 = arith.divf %828, %829 : vector<16x32xf32>
    %831 = vector.extract_strided_slice %818 {offsets = [0, 64], sizes = [16, 32], strides = [1, 1]} : vector<16x128xf32> to vector<16x32xf32>
    %832 = math.tanh %831 : vector<16x32xf32>
    %833 = vector.extract_strided_slice %818 {offsets = [0, 96], sizes = [16, 32], strides = [1, 1]} : vector<16x128xf32> to vector<16x32xf32>
    %834 = arith.negf %833 : vector<16x32xf32>
    %835 = math.exp %834 : vector<16x32xf32>
    %cst_255 = arith.constant 1.000000e+00 : f32
    %836 = vector.broadcast %cst_255 : f32 to vector<16x32xf32>
    %837 = arith.addf %836, %835 : vector<16x32xf32>
    %838 = arith.divf %836, %837 : vector<16x32xf32>
    %839 = arith.mulf %830, %805 : vector<16x32xf32>
    %840 = arith.mulf %824, %832 : vector<16x32xf32>
    %841 = arith.addf %839, %840 : vector<16x32xf32>
    %842 = math.tanh %841 : vector<16x32xf32>
    %843 = arith.mulf %838, %842 : vector<16x32xf32>
    %844 = arith.truncf %843 : vector<16x32xf32> to vector<16x32xbf16>
    %845 = arith.index_cast %c5_i32_249 : i32 to index
    %c0_256 = arith.constant 0 : index
    %c0_257 = arith.constant 0 : index
    %846 = vector.load %arg18[%845, %c0_256, %c0_257] : memref<8x16x32xbf16, #tpu.memory_space<vmem>>, vector<1x16x32xbf16>
    %847 = vector.shape_cast %846 : vector<1x16x32xbf16> to vector<16x32xbf16>
    %848 = vector.shape_cast %844 : vector<16x32xbf16> to vector<1x16x32xbf16>
    tpu.vector_store %arg18[%845, %c0_256, %c0_257], %848 {strides = array<i32>} : memref<8x16x32xbf16, #tpu.memory_space<vmem>>, vector<1x16x32xbf16>,
    %c6_i32_258 = arith.constant 6 : i32
    %849 = arith.index_cast %c6_i32_258 : i32 to index
    %c0_259 = arith.constant 0 : index
    %c0_260 = arith.constant 0 : index
    %850 = vector.load %arg17[%849, %c0_259, %c0_260] : memref<8x16x128xf32, #tpu.memory_space<vmem>>, vector<1x16x128xf32>
    %851 = vector.shape_cast %850 : vector<1x16x128xf32> to vector<16x128xf32>
    %852 = arith.truncf %843 : vector<16x32xf32> to vector<16x32xbf16>
    %cst_261 = arith.constant dense<0.000000e+00> : vector<16x128xf32>
    %853 = tpu.matmul %852, %628, %cst_261 {dimension_numbers = #tpu.dot_dimension_numbers<[1], [0], [0], [1], [0, 0, 1, 1], [], []>} : vector<16x32xbf16>, vector<32x128xbf16>, vector<16x128xf32> -> vector<16x128xf32>
    %854 = arith.addf %851, %853 : vector<16x128xf32>
    %855 = vector.extract_strided_slice %854 {offsets = [0, 0], sizes = [16, 32], strides = [1, 1]} : vector<16x128xf32> to vector<16x32xf32>
    %856 = arith.negf %855 : vector<16x32xf32>
    %857 = math.exp %856 : vector<16x32xf32>
    %cst_262 = arith.constant 1.000000e+00 : f32
    %858 = vector.broadcast %cst_262 : f32 to vector<16x32xf32>
    %859 = arith.addf %858, %857 : vector<16x32xf32>
    %860 = arith.divf %858, %859 : vector<16x32xf32>
    %861 = vector.extract_strided_slice %854 {offsets = [0, 32], sizes = [16, 32], strides = [1, 1]} : vector<16x128xf32> to vector<16x32xf32>
    %862 = arith.negf %861 : vector<16x32xf32>
    %863 = math.exp %862 : vector<16x32xf32>
    %cst_263 = arith.constant 1.000000e+00 : f32
    %864 = vector.broadcast %cst_263 : f32 to vector<16x32xf32>
    %865 = arith.addf %864, %863 : vector<16x32xf32>
    %866 = arith.divf %864, %865 : vector<16x32xf32>
    %867 = vector.extract_strided_slice %854 {offsets = [0, 64], sizes = [16, 32], strides = [1, 1]} : vector<16x128xf32> to vector<16x32xf32>
    %868 = math.tanh %867 : vector<16x32xf32>
    %869 = vector.extract_strided_slice %854 {offsets = [0, 96], sizes = [16, 32], strides = [1, 1]} : vector<16x128xf32> to vector<16x32xf32>
    %870 = arith.negf %869 : vector<16x32xf32>
    %871 = math.exp %870 : vector<16x32xf32>
    %cst_264 = arith.constant 1.000000e+00 : f32
    %872 = vector.broadcast %cst_264 : f32 to vector<16x32xf32>
    %873 = arith.addf %872, %871 : vector<16x32xf32>
    %874 = arith.divf %872, %873 : vector<16x32xf32>
    %875 = arith.mulf %866, %841 : vector<16x32xf32>
    %876 = arith.mulf %860, %868 : vector<16x32xf32>
    %877 = arith.addf %875, %876 : vector<16x32xf32>
    %878 = math.tanh %877 : vector<16x32xf32>
    %879 = arith.mulf %874, %878 : vector<16x32xf32>
    %880 = arith.truncf %879 : vector<16x32xf32> to vector<16x32xbf16>
    %881 = arith.index_cast %c6_i32_258 : i32 to index
    %c0_265 = arith.constant 0 : index
    %c0_266 = arith.constant 0 : index
    %882 = vector.load %arg18[%881, %c0_265, %c0_266] : memref<8x16x32xbf16, #tpu.memory_space<vmem>>, vector<1x16x32xbf16>
    %883 = vector.shape_cast %882 : vector<1x16x32xbf16> to vector<16x32xbf16>
    %884 = vector.shape_cast %880 : vector<16x32xbf16> to vector<1x16x32xbf16>
    tpu.vector_store %arg18[%881, %c0_265, %c0_266], %884 {strides = array<i32>} : memref<8x16x32xbf16, #tpu.memory_space<vmem>>, vector<1x16x32xbf16>,
    %c7_i32_267 = arith.constant 7 : i32
    %885 = arith.index_cast %c7_i32_267 : i32 to index
    %c0_268 = arith.constant 0 : index
    %c0_269 = arith.constant 0 : index
    %886 = vector.load %arg17[%885, %c0_268, %c0_269] : memref<8x16x128xf32, #tpu.memory_space<vmem>>, vector<1x16x128xf32>
    %887 = vector.shape_cast %886 : vector<1x16x128xf32> to vector<16x128xf32>
    %888 = arith.truncf %879 : vector<16x32xf32> to vector<16x32xbf16>
    %cst_270 = arith.constant dense<0.000000e+00> : vector<16x128xf32>
    %889 = tpu.matmul %888, %628, %cst_270 {dimension_numbers = #tpu.dot_dimension_numbers<[1], [0], [0], [1], [0, 0, 1, 1], [], []>} : vector<16x32xbf16>, vector<32x128xbf16>, vector<16x128xf32> -> vector<16x128xf32>
    %890 = arith.addf %887, %889 : vector<16x128xf32>
    %891 = vector.extract_strided_slice %890 {offsets = [0, 0], sizes = [16, 32], strides = [1, 1]} : vector<16x128xf32> to vector<16x32xf32>
    %892 = arith.negf %891 : vector<16x32xf32>
    %893 = math.exp %892 : vector<16x32xf32>
    %cst_271 = arith.constant 1.000000e+00 : f32
    %894 = vector.broadcast %cst_271 : f32 to vector<16x32xf32>
    %895 = arith.addf %894, %893 : vector<16x32xf32>
    %896 = arith.divf %894, %895 : vector<16x32xf32>
    %897 = vector.extract_strided_slice %890 {offsets = [0, 32], sizes = [16, 32], strides = [1, 1]} : vector<16x128xf32> to vector<16x32xf32>
    %898 = arith.negf %897 : vector<16x32xf32>
    %899 = math.exp %898 : vector<16x32xf32>
    %cst_272 = arith.constant 1.000000e+00 : f32
    %900 = vector.broadcast %cst_272 : f32 to vector<16x32xf32>
    %901 = arith.addf %900, %899 : vector<16x32xf32>
    %902 = arith.divf %900, %901 : vector<16x32xf32>
    %903 = vector.extract_strided_slice %890 {offsets = [0, 64], sizes = [16, 32], strides = [1, 1]} : vector<16x128xf32> to vector<16x32xf32>
    %904 = math.tanh %903 : vector<16x32xf32>
    %905 = vector.extract_strided_slice %890 {offsets = [0, 96], sizes = [16, 32], strides = [1, 1]} : vector<16x128xf32> to vector<16x32xf32>
    %906 = arith.negf %905 : vector<16x32xf32>
    %907 = math.exp %906 : vector<16x32xf32>
    %cst_273 = arith.constant 1.000000e+00 : f32
    %908 = vector.broadcast %cst_273 : f32 to vector<16x32xf32>
    %909 = arith.addf %908, %907 : vector<16x32xf32>
    %910 = arith.divf %908, %909 : vector<16x32xf32>
    %911 = arith.mulf %902, %877 : vector<16x32xf32>
    %912 = arith.mulf %896, %904 : vector<16x32xf32>
    %913 = arith.addf %911, %912 : vector<16x32xf32>
    %914 = math.tanh %913 : vector<16x32xf32>
    %915 = arith.mulf %910, %914 : vector<16x32xf32>
    %916 = arith.truncf %915 : vector<16x32xf32> to vector<16x32xbf16>
    %917 = arith.index_cast %c7_i32_267 : i32 to index
    %c0_274 = arith.constant 0 : index
    %c0_275 = arith.constant 0 : index
    %918 = vector.load %arg18[%917, %c0_274, %c0_275] : memref<8x16x32xbf16, #tpu.memory_space<vmem>>, vector<1x16x32xbf16>
    %919 = vector.shape_cast %918 : vector<1x16x32xbf16> to vector<16x32xbf16>
    %920 = vector.shape_cast %916 : vector<16x32xbf16> to vector<1x16x32xbf16>
    tpu.vector_store %arg18[%917, %c0_274, %c0_275], %920 {strides = array<i32>} : memref<8x16x32xbf16, #tpu.memory_space<vmem>>, vector<1x16x32xbf16>,
    %c8_i32_276 = arith.constant 8 : i32
    %c2_277 = arith.constant 2 : index
    %c0_278 = arith.constant 0 : index
    %c0_279 = arith.constant 0 : index
    %921 = vector.load %arg15[%c2_277, %c0_278, %c0_279] : memref<3x16x32xf32, #tpu.memory_space<vmem>>, vector<1x16x32xf32>
    %922 = vector.shape_cast %921 : vector<1x16x32xf32> to vector<16x32xf32>
    %923 = vector.shape_cast %915 : vector<16x32xf32> to vector<1x16x32xf32>
    tpu.vector_store %arg15[%c2_277, %c0_278, %c0_279], %923 {strides = array<i32>} : memref<3x16x32xf32, #tpu.memory_space<vmem>>, vector<1x16x32xf32>,
    %c2_280 = arith.constant 2 : index
    %c0_281 = arith.constant 0 : index
    %c0_282 = arith.constant 0 : index
    %924 = vector.load %arg16[%c2_280, %c0_281, %c0_282] : memref<3x16x32xf32, #tpu.memory_space<vmem>>, vector<1x16x32xf32>
    %925 = vector.shape_cast %924 : vector<1x16x32xf32> to vector<16x32xf32>
    %926 = vector.shape_cast %913 : vector<16x32xf32> to vector<1x16x32xf32>
    tpu.vector_store %arg16[%c2_280, %c0_281, %c0_282], %926 {strides = array<i32>} : memref<3x16x32xf32, #tpu.memory_space<vmem>>, vector<1x16x32xf32>,
    %c0_283 = arith.constant 0 : index
    %c0_284 = arith.constant 0 : index
    %c0_285 = arith.constant 0 : index
    %927 = vector.load %arg18[%c0_283, %c0_284, %c0_285] : memref<8x16x32xbf16, #tpu.memory_space<vmem>>, vector<8x16x32xbf16>
    %c0_286 = arith.constant 0 : index
    %c0_287 = arith.constant 0 : index
    %c0_288 = arith.constant 0 : index
    %928 = vector.load %arg14[%c0_286, %c0_287, %c0_288] : memref<8x16x32xbf16, #tpu.memory_space<vmem>>, vector<8x16x32xbf16>
    tpu.vector_store %arg14[%c0_286, %c0_287, %c0_288], %927 {strides = array<i32>} : memref<8x16x32xbf16, #tpu.memory_space<vmem>>, vector<8x16x32xbf16>,
    return
  }
  func.func @transform_0(%arg0: i32, %arg1: i32) -> (i32, i32, i32) {
    %c0_i32 = arith.constant 0 : i32
    %c0_i32_0 = arith.constant 0 : i32
    return %arg1, %arg0, %c0_i32 : i32, i32, i32
  }
  func.func @transform_1(%arg0: i32, %arg1: i32) -> (i32, i32) {
    %c0_i32 = arith.constant 0 : i32
    %c0_i32_0 = arith.constant 0 : i32
    %c0_i32_1 = arith.constant 0 : i32
    return %c0_i32, %c0_i32_0 : i32, i32
  }
  func.func @transform_2(%arg0: i32, %arg1: i32) -> (i32, i32) {
    %c0_i32 = arith.constant 0 : i32
    %c0_i32_0 = arith.constant 0 : i32
    %c0_i32_1 = arith.constant 0 : i32
    return %c0_i32, %c0_i32_0 : i32, i32
  }
  func.func @transform_3(%arg0: i32, %arg1: i32) -> (i32, i32) {
    %c0_i32 = arith.constant 0 : i32
    %c0_i32_0 = arith.constant 0 : i32
    %c0_i32_1 = arith.constant 0 : i32
    return %c0_i32, %c0_i32_0 : i32, i32
  }
  func.func @transform_4(%arg0: i32, %arg1: i32) -> (i32, i32) {
    %c0_i32 = arith.constant 0 : i32
    %c0_i32_0 = arith.constant 0 : i32
    %c0_i32_1 = arith.constant 0 : i32
    return %c0_i32, %c0_i32_0 : i32, i32
  }
  func.func @transform_5(%arg0: i32, %arg1: i32) -> (i32, i32) {
    %c0_i32 = arith.constant 0 : i32
    %c0_i32_0 = arith.constant 0 : i32
    %c0_i32_1 = arith.constant 0 : i32
    return %c0_i32, %c0_i32_0 : i32, i32
  }
  func.func @transform_6(%arg0: i32, %arg1: i32) -> (i32, i32) {
    %c0_i32 = arith.constant 0 : i32
    %c0_i32_0 = arith.constant 0 : i32
    %c0_i32_1 = arith.constant 0 : i32
    return %c0_i32, %c0_i32_0 : i32, i32
  }
  func.func @transform_7(%arg0: i32, %arg1: i32) -> (i32, i32) {
    %c0_i32 = arith.constant 0 : i32
    %c0_i32_0 = arith.constant 0 : i32
    %c0_i32_1 = arith.constant 0 : i32
    return %c0_i32, %c0_i32_0 : i32, i32
  }
  func.func @transform_8(%arg0: i32, %arg1: i32) -> (i32, i32) {
    %c0_i32 = arith.constant 0 : i32
    %c0_i32_0 = arith.constant 0 : i32
    %c0_i32_1 = arith.constant 0 : i32
    return %c0_i32, %c0_i32_0 : i32, i32
  }
  func.func @transform_9(%arg0: i32, %arg1: i32) -> (i32, i32) {
    %c0_i32 = arith.constant 0 : i32
    %c0_i32_0 = arith.constant 0 : i32
    %c0_i32_1 = arith.constant 0 : i32
    return %c0_i32, %c0_i32_0 : i32, i32
  }
  func.func @transform_10(%arg0: i32, %arg1: i32) -> (i32, i32, i32) {
    %c0_i32 = arith.constant 0 : i32
    %c0_i32_0 = arith.constant 0 : i32
    %c0_i32_1 = arith.constant 0 : i32
    return %c0_i32, %arg0, %c0_i32_0 : i32, i32, i32
  }
  func.func @transform_11(%arg0: i32, %arg1: i32) -> (i32, i32, i32) {
    %c0_i32 = arith.constant 0 : i32
    %c0_i32_0 = arith.constant 0 : i32
    %c0_i32_1 = arith.constant 0 : i32
    return %c0_i32, %arg0, %c0_i32_0 : i32, i32, i32
  }
  func.func @transform_12(%arg0: i32, %arg1: i32) -> (i32, i32, i32) {
    %c0_i32 = arith.constant 0 : i32
    %c0_i32_0 = arith.constant 0 : i32
    return %arg1, %arg0, %c0_i32 : i32, i32, i32
  }
  func.func @transform_13(%arg0: i32, %arg1: i32) -> (i32, i32, i32) {
    %c0_i32 = arith.constant 0 : i32
    %c0_i32_0 = arith.constant 0 : i32
    %c0_i32_1 = arith.constant 0 : i32
    return %c0_i32, %arg0, %c0_i32_0 : i32, i32, i32
  }
  func.func @transform_14(%arg0: i32, %arg1: i32) -> (i32, i32, i32) {
    %c0_i32 = arith.constant 0 : i32
    %c0_i32_0 = arith.constant 0 : i32
    %c0_i32_1 = arith.constant 0 : i32
    return %c0_i32, %arg0, %c0_i32_0 : i32, i32, i32
  }
}

</mosaic_0001>

<bundles_post_ra>
// kernel: mymodel_forward.3
= control target key start
LH: loop header
LB: loop body
LE: loop exit
PB: predicated region body
PF: predicated region fallthrough
CT: control target
= control target key end

     0   :  { %v158_v1 = vmov 0.0   ;;  %vm159_vm0 = vmmov 0   ;;  %s207_s0 = inlined_call_operand.vmem [shape: bf16[16,32], index: 0, kind: input, shape index: {}]   ;;  %s208_s1 = inlined_call_operand.vmem [shape: bf16[32,64], index: 1, kind: input, shape index: {}]   ;;  %s209_s2 = inlined_call_operand.vmem [shape: f32[1,64], index: 2, kind: input, shape index: {}]   ;;  %s210_s3 = inlined_call_operand.hbm [shape: f32[16,64], index: 3, kind: output, shape index: {}]  }
   0x1   :  { %v131_v0 = vld [vmem:[%s208_s1] sm:$0xff]   ;;  %118 = vmatprep.subr.bf16.mxu0 %v158_v1  ;;  %v132_v2 = vld [vmem:[%s208_s1 + $0x8] sm:$0xff]   ;;  %122 = vmatprep.mubr.msk.bf16.mxu0 %vm159_vm0, %v158_v1 }
   0x2   :  { %119 = vmatpush3.bf16.msra.mxu0 %v131_v0 }
   0x3   :  { %120 = vmatprep.subr.bf16.mxu0 %v158_v1 }
   0x4   :  { %8 = vsyncpa [#allocation3], 0  ;;  %v133_v3 = vld [vmem:[%s207_s0] sm:$0xff]   ;;  %vm46_vm1 = vcmask 261120   ;;  %s160_s20 = smov [#allocation2]   ;;  %vm91_vm2 = vcmask 523264  }
   0x5   :  { %v110_v4 = vld [vmem:[%s209_s2] ss:$0 sm:$0xff]  ;;  %s99_s21 = sshll.u32 %s160_s20, 4  ;;  %s100_s21 = int_to_ptr.vmem [resolvable:$true] %s99_s21 }
   0x6   :  { %121 = vmatpush3.bf16.msra.mxu0 %v132_v2  ;;  %s134_s0 = scalar_lea.vmem %s100_s21, 256  ;;  %p139_p1 = scmp.lt.s32.totalorder %s100_s21, %s100_s21 }
   0x7   :  { %p135_p0 = scmp.ne.s32.totalorder %s100_s21, %s134_s0  ;;  %p140_p2 = scmp.lt.s32.totalorder %s134_s0, %s134_s0 }
   0x9   :  { %123 = vmatmul.mubr.msk.bf16.vlgmr.msra.gmra.mrb[0].mxu0 %vm46_vm1, %v133_v3  ;;  %p141_p3 = por %p140_p2, %p139_p1 }
   0xb   :  { %p142_p4 = pnand %p141_p3, %p135_p0 }
  0xdc   :  { %v84_v5 = vpop.f32.mrb[0].mxu0 }
  0xdd   :  { %v85_v6 = vadd.f32 %v110_v4, %v84_v5  ;;  %v124_v7 = vpop.f32.mrb[1].mxu0 }
  0xde   :  { %v87_v8 = vpop.f32.mrb[2].mxu0 }
  0xdf   :  { %92 = vst.msk [vmem:[#allocation2] sm:$0xff] %vm91_vm2, %v85_v6  ;;  %v88_v9 = vadd.f32 %v110_v4, %v87_v8  ;;  %v125_v10 = vpop.f32.mrb[3].mxu0 }
  0xe1   :  { %93 = vst.msk [vmem:[#allocation2 + $0x8] sm:$0xff] %vm91_vm2, %v88_v9 }
  0xe2   :  { %145 = shalt.err (!%p142_p4)
}
  0xe3   :  { %s146_s22 = scalar_lea.hbm %s210_s3, 256 }
  0xe4   :  { %p147_p5 = scmp.ne.s32.totalorder %s210_s3, %s146_s22  ;;  %p150_p6 = scmp.lt.u32.totalorder %s146_s22, %s210_s3 }
  0xe6   :  { %p152_p7 = pnand %p150_p6, %p147_p5 }
  0xe8   :  { %155 = shalt.err (!%p152_p7)
}
  0xe9   :  { %s161_s27 = smov 128   ;;  %s162_s28 = smov 8  }
  0xea   :  { %105 = dma.vmem_to_hbm [thread:$0]  %s100_s21, 256, %s210_s3, [#allocation3], %s161_s27, %s161_s27, %s162_s28  }
  0xeb   :  { %156 = dma.done.wait [#allocation3], 256  }
  0xec   :  { %157 = vsyncadd [#allocation3], 4294967040 }
  0xed   :  { %109 = vsyncpa [#allocation3], 1 }

// kernel: mymodel_forward.2
= control target key start
LH: loop header
LB: loop body
LE: loop exit
PB: predicated region body
PF: predicated region fallthrough
CT: control target
= control target key end

     0   :  { %v4252_v1 = vmov 0.0   ;;  %vm4253_vm0 = vmmov 0   ;;  %vm145_vm1 = vcmask 130048   ;;  %vm55_vm2 = vcmask 261120   ;;  %s4254_s26 = smov 32   ;;  %s4255_s30 = smov 64   ;;  %s5357_s1 = inlined_call_operand.vmem [shape: bf16[16,128], index: 1, kind: input, shape index: {}]   ;;  %s5358_s4 = inlined_call_operand.vmem [shape: bf16[32,128], index: 4, kind: input, shape index: {}]   ;;  %s5359_s0 = inlined_call_operand.vmem [shape: bf16[8,16,16], index: 0, kind: input, shape index: {}]   ;;  %s5360_s10 = inlined_call_operand.vmem [shape: f32[3,16,32], index: 10, kind: input, shape index: {}, may-alias: {10,11}]   ;;  %s5361_s11 = inlined_call_operand.vmem [shape: f32[3,16,32], index: 11, kind: input, shape index: {}, may-alias: {10,11}]   ;;  %s5362_s13 = inlined_call_operand.vmem [shape: f32[3,16,32], index: 13, kind: output, shape index: {1}]   ;;  %s5363_s14 = inlined_call_operand.vmem [shape: f32[3,16,32], index: 14, kind: output, shape index: {2}]   ;;  %s5364_s7 = inlined_call_operand.vmem [shape: f32[1,128], index: 7, kind: input, shape index: {}]   ;;  %s5365_s2 = inlined_call_operand.vmem [shape: bf16[32,128], index: 2, kind: input, shape index: {}]   ;;  %s5366_s5 = inlined_call_operand.vmem [shape: bf16[32,128], index: 5, kind: input, shape index: {}]   ;;  %s5367_s8 = inlined_call_operand.vmem [shape: f32[1,128], index: 8, kind: input, shape index: {}]   ;;  %s5368_s3 = inlined_call_operand.vmem [shape: bf16[32,128], index: 3, kind: input, shape index: {}]   ;;  %s5369_s6 = inlined_call_operand.vmem [shape: bf16[32,128], index: 6, kind: input, shape index: {}]   ;;  %s5370_s9 = inlined_call_operand.vmem [shape: f32[1,128], index: 9, kind: input, shape index: {}]   ;;  %s5371_s12 = inlined_call_operand.vmem [shape: bf16[8,16,32], index: 12, kind: output, shape index: {0}]  }
   0x1   :  { %v3832_v0 = vld [vmem:[%s5357_s1] sm:$0xff]   ;;  %3595 = vmatprep.subr.bf16.mxu1 %v4252_v1  ;;  %3599 = vmatprep.mubr.msk.bf16.mxu1 %vm4253_vm0, %v4252_v1  ;;  %v3835_v4 = vld [vmem:[%s5359_s0 + $0x8] sm:$0xff]   ;;  %vm3297_vm3 = vcmask 257024  }
   0x2   :  { %v4341_v2 = vld [vmem:[%s5358_s4] sm:$0xff]   ;;  %3577 = vmatprep.subr.bf16.mxu0 %v3832_v0  ;;  %v4355_v5 = vld [vmem:[%s5358_s4 + $0x8] sm:$0xff]   ;;  %s4256_s4 = smov 96  }
   0x3   :  { %v3834_v3 = vld [vmem:[%s5359_s0] sm:$0xff]   ;;  %3578 = vmatpush3.bf16.msra.mxu0 %v3832_v0  ;;  %3596 = vmatpush3.bf16.msra.mxu1 %v4341_v2  ;;  %v50_v7 = vld [vmem:[%s5360_s10 + $0x8] sm:$0xff] }
   0x4   :  { %3579 = vmatprep.mubr.msk.bf16.mxu0 %vm145_vm1, %v3834_v3  ;;  %3597 = vmatprep.subr.bf16.mxu1 %v4252_v1  ;;  %v49_v6 = vld [vmem:[%s5360_s10] sm:$0xff]  ;;  %57 = vst.msk [vmem:[%s5362_s13 + $0x8] sm:$0xff] %vm55_vm2, %v50_v7  ;;  %v63_v9 = vld [vmem:[%s5361_s11 + $0x8] sm:$0xff] }
   0x5   :  { %v62_v8 = vld [vmem:[%s5361_s11] sm:$0xff]  ;;  %3627 = vmatprep.subr.bf16.mxu0 %v4252_v1  ;;  %56 = vst.msk [vmem:[%s5362_s13] sm:$0xff] %vm55_vm2, %v49_v6  ;;  %69 = vst.msk [vmem:[%s5363_s14 + $0x8] sm:$0xff] %vm55_vm2, %v63_v9 }
   0x6   :  { %3580 = vmatmul.mubr.msk.bf16.vlgmr.msra.gmra.mrb[0].mxu0 %vm145_vm1, %v3835_v4  ;;  %68 = vst.msk [vmem:[%s5363_s14] sm:$0xff] %vm55_vm2, %v62_v8  ;;  %v4421_v19 = vld [vmem:[%s5364_s7] ss:$0 sm:$0xff] }
   0x7   :  { %3598 = vmatpush3.bf16.msra.mxu1 %v4355_v5  ;;  %3628 = vmatpush3.bf16.msra.mxu0 %v4341_v2 }
   0x8   :  { %3603 = vmatprep.subr.bf16.mxu1 %v4252_v1  ;;  %3629 = vmatprep.subr.bf16.mxu0 %v4252_v1 }
   0xb   :  { %3630 = vmatpush3.bf16.msra.mxu0 %v4355_v5  ;;  %v288_v11 = vld [vmem:[%s5362_s13 + $0x8] sm:$0xff] }
   0xc   :  { %3643 = vmatprep.subr.bf16.mxu0 %v4252_v1  ;;  %v287_v10 = vld [vmem:[%s5362_s13] sm:$0xff]  ;;  %v290_v14 = vld [vmem:[%s5363_s14 + $0x8] sm:$0xff] }
   0xd   :  { %v289_v12 = vld [vmem:[%s5363_s14] sm:$0xff]  ;;  %v293_v13 = vpack.c.bf16 %v288_v11, %v287_v10 }
   0xe   :  { %369 = vrot.lane.b32.xlu1 %v289_v12, %s4254_s26 }
   0xf   :  { %3600 = vmatmul.mubr.msk.bf16.vlgmr.msra.gmra.mrb[0].mxu1 %vm55_vm2, %v293_v13 }
  0x10   :  { %3604 = vmatpush3.bf16.msra.mxu1 %v4341_v2  ;;  %3607 = vmatprep.mubr.msk.bf16.mxu1 %vm4253_vm0, %v4252_v1 }
  0x11   :  { %3605 = vmatprep.subr.bf16.mxu1 %v4252_v1 }
  0x12   :  { %371 = vrot.lane.b32.xlu1 %v290_v14, %s4254_s26 }
  0x14   :  { %3606 = vmatpush3.bf16.msra.mxu1 %v4355_v5 }
  0x15   :  { %3611 = vmatprep.subr.bf16.mxu1 %v4252_v1 }
  0x80   :  { %v370_v42 = vpop.permute.xlu1 %369 }
  0x84   :  { %v372_v44 = vpop.permute.xlu1 %371 }
  0xd9   :  { %v4414_v15 = vpop.f32.mrb[0].mxu0 }
  0xda   :  { %v204_v16 = vpop.f32.mrb[1].mxu0  ;;  %v213_v58 = vadd.f32 %v4414_v15, %v4421_v19 }
  0xdb   :  { %v4416_v17 = vpop.f32.mrb[2].mxu0  ;;  %v205_v20 = vadd.f32 %v4421_v19, %v204_v16 }
  0xdc   :  { %v207_v18 = vpop.f32.mrb[3].mxu0  ;;  %v216_v60 = vadd.f32 %v4416_v17, %v4421_v19 }
  0xdd   :  { %v208_v22 = vadd.f32 %v4421_v19, %v207_v18 }
  0xe2   :  { %v344_v21 = vpop.f32.mrb[0].mxu1 }
  0xe3   :  { %v351_v23 = vadd.f32 %v344_v21, %v205_v20  ;;  %v3601_v24 = vpop.f32.mrb[1].mxu1 }
  0xe4   :  { %v347_v25 = vpop.f32.mrb[2].mxu1 }
  0xe5   :  { %3867 = vtanh.f32 %v351_v23  ;;  %v352_v26 = vadd.f32 %v347_v25, %v208_v22  ;;  %v3602_v27 = vpop.f32.mrb[3].mxu1  ;;  %v3347_v30 = vmul.f32 -1.442695, %v351_v23 }
  0xe6   :  { %v3838_v27 = vld [vmem:[%s5359_s0 + $0x18] sm:$0xff]  }
  0xe7   :  { %3869 = vtanh.f32 %v352_v26  ;;  %v3348_v31 = vmul.f32 -1.442695, %v352_v26  ;;  %v3837_v26 = vld [vmem:[%s5359_s0 + $0x10] sm:$0xff]  }
  0xe8   :  { %3871 = vpow2.f32 %v3347_v30  ;;  %3583 = vmatprep.mubr.msk.bf16.mxu0 %vm145_vm1, %v3837_v26 }
  0xe9   :  { %3873 = vpow2.f32 %v3348_v31  ;;  %3584 = vmatmul.mubr.msk.bf16.gmra.mrb[4].mxu0 %vm145_vm1, %v3838_v27 }
  0xef   :  { %v3868_v28 = vpop.eup %3867 }
  0xf0   :  { %379 = vrot.lane.b32.xlu0 %v3868_v28, %s4255_s30 }
  0xf1   :  { %v3870_v29 = vpop.eup %3869 }
  0xf2   :  { %v3872_v32 = vpop.eup %3871 }
  0xf3   :  { %v359_v33 = vadd.f32 1.0, %v3872_v32  ;;  %v3874_v34 = vpop.eup %3873 }
  0xf4   :  { %381 = vrot.lane.b32.xlu0 %v3870_v29, %s4255_s30  ;;  %v360_v35 = vadd.f32 1.0, %v3874_v34 }
  0xf5   :  { %3875 = vrcp.f32 %v359_v33 }
  0xf6   :  { %3877 = vrcp.f32 %v360_v35 }
  0xff   :  { %v3876_v36 = vpop.eup %3875 }
 0x100   :  { %v3878_v39 = vpop.eup %3877  ;;  %v375_v43 = vmul.f32 %v3876_v36, %v370_v42 }
 0x101   :  { %v376_v47 = vmul.f32 %v3878_v39, %v372_v44 }
 0x162   :  { %v380_v37 = vpop.permute.xlu0 %379 }
 0x163   :  { %v385_v38 = vmul.f32 %v3876_v36, %v380_v37 }
 0x165   :  { %389 = vrot.lane.b32.xlu0 %v385_v38, %s4254_s26 }
 0x166   :  { %v382_v40 = vpop.permute.xlu0 %381 }
 0x167   :  { %v386_v41 = vmul.f32 %v3878_v39, %v382_v40 }
 0x169   :  { %391 = vrot.lane.b32.xlu1 %v386_v41, %s4254_s26 }
 0x1bc   :  { %v4465_v35 = vpop.f32.mrb[4].mxu0 }
 0x1d7   :  { %v390_v45 = vpop.permute.xlu0 %389 }
 0x1d8   :  { %v395_v46 = vadd.f32 %v390_v45, %v375_v43 }
 0x1da   :  { %3879 = vtanh.f32 %v395_v46 }
 0x1db   :  { %v392_v48 = vpop.permute.xlu1 %391 }
 0x1dc   :  { %v396_v49 = vadd.f32 %v392_v48, %v376_v47 }
 0x1de   :  { %3881 = vtanh.f32 %v396_v49 }
 0x1e4   :  { %v3880_v50 = vpop.eup %3879 }
 0x1e5   :  { %401 = vrot.lane.b32.xlu0 %v3880_v50, %s4255_s30 }
 0x1e8   :  { %v3882_v51 = vpop.eup %3881 }
 0x1e9   :  { %403 = vrot.lane.b32.xlu1 %v3882_v51, %s4255_s30 }
 0x257   :  { %v402_v52 = vpop.permute.xlu0 %401 }
 0x258   :  { %v407_v54 = vmul.f32 %v3876_v36, %v402_v52  ;;  %v220_v36 = vpop.f32.mrb[5].mxu0 }
 0x259   :  { %v4467_v37 = vpop.f32.mrb[6].mxu0  ;;  %v221_v40 = vadd.f32 %v4421_v19, %v220_v36 }
 0x25a   :  { %v223_v38 = vpop.f32.mrb[7].mxu0 }
 0x25b   :  { %v404_v53 = vpop.permute.xlu1 %403  ;;  %v224_v42 = vadd.f32 %v4421_v19, %v223_v38 }
 0x25c   :  { %v408_v55 = vmul.f32 %v3878_v39, %v404_v53 }
 0x25e   :  { %v409_v56 = vpack.c.bf16 %v408_v55, %v407_v54 }
 0x260   :  { %411 = vrot.lane.b32.xlu0 %v409_v56, %s4254_s26 }
 0x2d2   :  { %v412_v57 = vpop.permute.xlu0 %411 }
 0x2d3   :  { %414 = vst.msk [vmem:[#allocation3] sm:$0xff] %vm55_vm2, %v412_v57  ;;  %3608 = vmatmul.mubr.msk.bf16.vlgmr.msra.gmra.mrb[4].mxu1 %vm55_vm2, %v412_v57 }
 0x2d4   :  { %3612 = vmatpush3.bf16.msra.mxu1 %v4341_v2  ;;  %3615 = vmatprep.mubr.msk.bf16.mxu1 %vm4253_vm0, %v4252_v1 }
 0x2d5   :  { %3613 = vmatprep.subr.bf16.mxu1 %v4252_v1 }
 0x2d8   :  { %3614 = vmatpush3.bf16.msra.mxu1 %v4355_v5 }
 0x2d9   :  { %3619 = vmatprep.subr.bf16.mxu1 %v4252_v1 }
 0x3a6   :  { %v455_v59 = vpop.f32.mrb[4].mxu1 }
 0x3a7   :  { %v462_v61 = vadd.f32 %v455_v59, %v213_v58  ;;  %v3609_v62 = vpop.f32.mrb[5].mxu1 }
 0x3a8   :  { %v458_v63 = vpop.f32.mrb[6].mxu1 }
 0x3a9   :  { %3883 = vtanh.f32 %v462_v61  ;;  %v463_v0 = vadd.f32 %v458_v63, %v216_v60  ;;  %v3610_v3 = vpop.f32.mrb[7].mxu1  ;;  %v3350_v7 = vmul.f32 -1.442695, %v462_v61 }
 0x3ab   :  { %3885 = vtanh.f32 %v463_v0  ;;  %v3351_v8 = vmul.f32 -1.442695, %v463_v0 }
 0x3ac   :  { %3887 = vpow2.f32 %v3350_v7 }
 0x3ad   :  { %3889 = vpow2.f32 %v3351_v8 }
 0x3b3   :  { %v3884_v4 = vpop.eup %3883 }
 0x3b4   :  { %482 = vrot.lane.b32.xlu1 %v3884_v4, %s4255_s30 }
 0x3b5   :  { %v3886_v6 = vpop.eup %3885 }
 0x3b6   :  { %484 = vrot.lane.b32.xlu0 %v3886_v6, %s4255_s30  ;;  %v3888_v9 = vpop.eup %3887 }
 0x3b7   :  { %v3890_v10 = vpop.eup %3889  ;;  %v470_v11 = vadd.f32 1.0, %v3888_v9 }
 0x3b8   :  { %v471_v12 = vadd.f32 1.0, %v3890_v10 }
 0x3b9   :  { %3891 = vrcp.f32 %v470_v11 }
 0x3ba   :  { %3893 = vrcp.f32 %v471_v12 }
 0x3c3   :  { %v3892_v13 = vpop.eup %3891 }
 0x3c4   :  { %v3894_v16 = vpop.eup %3893  ;;  %v478_v20 = vmul.f32 %v3892_v13, %v395_v46 }
 0x3c5   :  { %v479_v23 = vmul.f32 %v3894_v16, %v396_v49 }
 0x426   :  { %v483_v14 = vpop.permute.xlu1 %482 }
 0x427   :  { %v488_v15 = vmul.f32 %v3892_v13, %v483_v14 }
 0x428   :  { %v485_v17 = vpop.permute.xlu0 %484 }
 0x429   :  { %492 = vrot.lane.b32.xlu1 %v488_v15, %s4254_s26  ;;  %v489_v18 = vmul.f32 %v3894_v16, %v485_v17  ;;  %v229_v15 = vadd.f32 %v4465_v35, %v4421_v19  ;;  %v232_v17 = vadd.f32 %v4467_v37, %v4421_v19 }
 0x42b   :  { %494 = vrot.lane.b32.xlu0 %v489_v18, %s4254_s26 }
 0x49b   :  { %v493_v21 = vpop.permute.xlu1 %492 }
 0x49c   :  { %v4448_v22 = vadd.f32 %v493_v21, %v478_v20 }
 0x49d   :  { %v495_v24 = vpop.permute.xlu0 %494 }
 0x49e   :  { %3895 = vtanh.f32 %v4448_v22  ;;  %v4451_v25 = vadd.f32 %v495_v24, %v479_v23 }
 0x4a0   :  { %3897 = vtanh.f32 %v4451_v25 }
 0x4a8   :  { %v3896_v28 = vpop.eup %3895 }
 0x4a9   :  { %504 = vrot.lane.b32.xlu1 %v3896_v28, %s4255_s30 }
 0x4aa   :  { %v3898_v29 = vpop.eup %3897 }
 0x4ab   :  { %506 = vrot.lane.b32.xlu0 %v3898_v29, %s4255_s30 }
 0x51b   :  { %v505_v30 = vpop.permute.xlu1 %504 }
 0x51c   :  { %v510_v32 = vmul.f32 %v3892_v13, %v505_v30 }
 0x51d   :  { %v507_v31 = vpop.permute.xlu0 %506 }
 0x51e   :  { %v511_v33 = vmul.f32 %v3894_v16, %v507_v31 }
 0x520   :  { %v512_v34 = vpack.c.bf16 %v511_v33, %v510_v32 }
 0x522   :  { %514 = vrot.lane.b32.xlu1 %v512_v34, %s4254_s26 }
 0x594   :  { %v515_v39 = vpop.permute.xlu1 %514 }
 0x595   :  { %518 = vst.msk [vmem:[#allocation3 + $0x8] sm:$0xff] %vm55_vm2, %v515_v39  ;;  %3616 = vmatmul.mubr.msk.bf16.vlgmr.msra.gmra.mrb[8].mxu1 %vm55_vm2, %v515_v39 }
 0x596   :  { %3620 = vmatpush3.bf16.msra.mxu1 %v4341_v2  ;;  %3623 = vmatprep.mubr.msk.bf16.mxu1 %vm4253_vm0, %v4252_v1 }
 0x597   :  { %3621 = vmatprep.subr.bf16.mxu1 %v4252_v1 }
 0x59a   :  { %3622 = vmatpush3.bf16.msra.mxu1 %v4355_v5 }
 0x59b   :  { %3635 = vmatprep.subr.bf16.mxu1 %v4252_v1 }
 0x668   :  { %v559_v41 = vpop.f32.mrb[8].mxu1 }
 0x669   :  { %v566_v43 = vadd.f32 %v559_v41, %v221_v40  ;;  %v3617_v44 = vpop.f32.mrb[9].mxu1 }
 0x66a   :  { %v562_v45 = vpop.f32.mrb[10].mxu1  ;;  %v3839_v44 = vld [vmem:[%s5359_s0 + $0x20] sm:$0xff]  }
 0x66b   :  { %3899 = vtanh.f32 %v566_v43  ;;  %v567_v46 = vadd.f32 %v562_v45, %v224_v42  ;;  %v3618_v47 = vpop.f32.mrb[11].mxu1  ;;  %v3353_v50 = vmul.f32 -1.442695, %v566_v43  ;;  %v3840_v45 = vld [vmem:[%s5359_s0 + $0x28] sm:$0xff]   ;;  %3587 = vmatprep.mubr.msk.bf16.mxu0 %vm145_vm1, %v3839_v44 }
 0x66c   :  { %3588 = vmatmul.mubr.msk.bf16.gmra.mrb[8].mxu0 %vm145_vm1, %v3840_v45 }
 0x66d   :  { %3901 = vtanh.f32 %v567_v46  ;;  %v3354_v51 = vmul.f32 -1.442695, %v567_v46  ;;  %v3841_v46 = vld [vmem:[%s5359_s0 + $0x30] sm:$0xff]  }
 0x66e   :  { %3903 = vpow2.f32 %v3353_v50  ;;  %3591 = vmatprep.mubr.msk.bf16.mxu0 %vm145_vm1, %v3841_v46 }
 0x66f   :  { %3905 = vpow2.f32 %v3354_v51 }
 0x675   :  { %v3900_v48 = vpop.eup %3899 }
 0x676   :  { %586 = vrot.lane.b32.xlu0 %v3900_v48, %s4255_s30  ;;  %v3842_v48 = vld [vmem:[%s5359_s0 + $0x38] sm:$0xff]  }
 0x677   :  { %v3902_v49 = vpop.eup %3901  ;;  %3592 = vmatmul.mubr.msk.bf16.gmra.mrb[12].mxu0 %vm145_vm1, %v3842_v48 }
 0x678   :  { %588 = vrot.lane.b32.xlu1 %v3902_v49, %s4255_s30  ;;  %v3904_v52 = vpop.eup %3903  ;;  %3631 = vmatprep.mubr.msk.bf16.mxu0 %vm4253_vm0, %v4252_v1 }
 0x679   :  { %v3906_v53 = vpop.eup %3905  ;;  %v574_v54 = vadd.f32 1.0, %v3904_v52 }
 0x67a   :  { %v575_v55 = vadd.f32 1.0, %v3906_v53 }
 0x67b   :  { %3907 = vrcp.f32 %v574_v54 }
 0x67c   :  { %3909 = vrcp.f32 %v575_v55 }
 0x685   :  { %v3908_v56 = vpop.eup %3907 }
 0x686   :  { %v3910_v59 = vpop.eup %3909  ;;  %v582_v62 = vmul.f32 %v3908_v56, %v4448_v22 }
 0x687   :  { %v583_v3 = vmul.f32 %v3910_v59, %v4451_v25 }
 0x6e8   :  { %v587_v57 = vpop.permute.xlu0 %586 }
 0x6e9   :  { %v592_v58 = vmul.f32 %v3908_v56, %v587_v57 }
 0x6ea   :  { %v589_v60 = vpop.permute.xlu1 %588 }
 0x6eb   :  { %596 = vrot.lane.b32.xlu0 %v592_v58, %s4254_s26  ;;  %v593_v61 = vmul.f32 %v3910_v59, %v589_v60 }
 0x6ed   :  { %598 = vrot.lane.b32.xlu1 %v593_v61, %s4254_s26 }
 0x73f   :  { %v4531_v55 = vpop.f32.mrb[8].mxu0 }
 0x75d   :  { %v597_v63 = vpop.permute.xlu0 %596 }
 0x75e   :  { %v602_v0 = vadd.f32 %v597_v63, %v582_v62 }
 0x75f   :  { %v599_v4 = vpop.permute.xlu1 %598 }
 0x760   :  { %3911 = vtanh.f32 %v602_v0  ;;  %v603_v6 = vadd.f32 %v599_v4, %v583_v3 }
 0x762   :  { %3913 = vtanh.f32 %v603_v6 }
 0x76a   :  { %v3912_v7 = vpop.eup %3911 }
 0x76b   :  { %608 = vrot.lane.b32.xlu0 %v3912_v7, %s4255_s30 }
 0x76c   :  { %v3914_v8 = vpop.eup %3913 }
 0x76d   :  { %610 = vrot.lane.b32.xlu1 %v3914_v8, %s4255_s30 }
 0x7dd   :  { %v609_v9 = vpop.permute.xlu0 %608 }
 0x7de   :  { %v614_v11 = vmul.f32 %v3908_v56, %v609_v9  ;;  %v236_v56 = vpop.f32.mrb[9].mxu0 }
 0x7df   :  { %v611_v10 = vpop.permute.xlu1 %610  ;;  %v4533_v57 = vpop.f32.mrb[10].mxu0 }
 0x7e0   :  { %v615_v12 = vmul.f32 %v3910_v59, %v611_v10  ;;  %v239_v58 = vpop.f32.mrb[11].mxu0 }
 0x7e1   :  { %v4535_v59 = vpop.f32.mrb[12].mxu0  ;;  %v240_v4 = vadd.f32 %v4421_v19, %v239_v58 }
 0x7e2   :  { %v616_v13 = vpack.c.bf16 %v615_v12, %v614_v11  ;;  %v4537_v60 = vpop.f32.mrb[13].mxu0 }
 0x7e3   :  { %v4539_v61 = vpop.f32.mrb[14].mxu0 }
 0x7e4   :  { %618 = vrot.lane.b32.xlu0 %v616_v13, %s4254_s26  ;;  %v4541_v62 = vpop.f32.mrb[15].mxu0 }
 0x856   :  { %v619_v14 = vpop.permute.xlu0 %618 }
 0x857   :  { %622 = vst.msk [vmem:[#allocation3 + $0x10] sm:$0xff] %vm55_vm2, %v619_v14  ;;  %3624 = vmatmul.mubr.msk.bf16.vlgmr.msra.gmra.mrb[12].mxu1 %vm55_vm2, %v619_v14 }
 0x858   :  { %3636 = vmatpush3.bf16.msra.mxu1 %v4341_v2  ;;  %3639 = vmatprep.mubr.msk.bf16.mxu1 %vm4253_vm0, %v4252_v1 }
 0x859   :  { %3637 = vmatprep.subr.bf16.mxu1 %v4252_v1 }
 0x85c   :  { %3638 = vmatpush3.bf16.msra.mxu1 %v4355_v5 }
 0x85d   :  { %3651 = vmatprep.subr.bf16.mxu1 %v4252_v1 }
 0x92a   :  { %v663_v16 = vpop.f32.mrb[12].mxu1 }
 0x92b   :  { %v670_v18 = vadd.f32 %v663_v16, %v229_v15  ;;  %v3625_v20 = vpop.f32.mrb[13].mxu1 }
 0x92c   :  { %v666_v21 = vpop.f32.mrb[14].mxu1 }
 0x92d   :  { %3915 = vtanh.f32 %v670_v18  ;;  %v671_v22 = vadd.f32 %v666_v21, %v232_v17  ;;  %v3626_v23 = vpop.f32.mrb[15].mxu1  ;;  %v3356_v26 = vmul.f32 -1.442695, %v670_v18 }
 0x92f   :  { %3917 = vtanh.f32 %v671_v22  ;;  %v3357_v27 = vmul.f32 -1.442695, %v671_v22 }
 0x930   :  { %3919 = vpow2.f32 %v3356_v26 }
 0x931   :  { %3921 = vpow2.f32 %v3357_v27 }
 0x937   :  { %v3916_v24 = vpop.eup %3915 }
 0x938   :  { %690 = vrot.lane.b32.xlu1 %v3916_v24, %s4255_s30 }
 0x939   :  { %v3918_v25 = vpop.eup %3917 }
 0x93a   :  { %692 = vrot.lane.b32.xlu0 %v3918_v25, %s4255_s30  ;;  %v3920_v28 = vpop.eup %3919 }
 0x93b   :  { %v3922_v29 = vpop.eup %3921  ;;  %v678_v30 = vadd.f32 1.0, %v3920_v28 }
 0x93c   :  { %v679_v31 = vadd.f32 1.0, %v3922_v29 }
 0x93d   :  { %3923 = vrcp.f32 %v678_v30 }
 0x93e   :  { %3925 = vrcp.f32 %v679_v31 }
 0x947   :  { %v3924_v32 = vpop.eup %3923 }
 0x948   :  { %v3926_v35 = vpop.eup %3925  ;;  %v686_v38 = vmul.f32 %v3924_v32, %v602_v0  ;;  %v237_v0 = vadd.f32 %v4421_v19, %v236_v56 }
 0x949   :  { %v687_v41 = vmul.f32 %v3926_v35, %v603_v6 }
 0x9aa   :  { %v691_v33 = vpop.permute.xlu1 %690 }
 0x9ab   :  { %v696_v34 = vmul.f32 %v3924_v32, %v691_v33 }
 0x9ac   :  { %v693_v36 = vpop.permute.xlu0 %692 }
 0x9ad   :  { %700 = vrot.lane.b32.xlu1 %v696_v34, %s4254_s26  ;;  %v697_v37 = vmul.f32 %v3926_v35, %v693_v36 }
 0x9af   :  { %702 = vrot.lane.b32.xlu0 %v697_v37, %s4254_s26 }
 0xa1f   :  { %v701_v39 = vpop.permute.xlu1 %700 }
 0xa20   :  { %v4504_v40 = vadd.f32 %v701_v39, %v686_v38 }
 0xa21   :  { %v703_v42 = vpop.permute.xlu0 %702 }
 0xa22   :  { %3927 = vtanh.f32 %v4504_v40  ;;  %v4507_v43 = vadd.f32 %v703_v42, %v687_v41  ;;  %v248_v42 = vadd.f32 %v4533_v57, %v4421_v19 }
 0xa24   :  { %3929 = vtanh.f32 %v4507_v43 }
 0xa2c   :  { %v3928_v47 = vpop.eup %3927 }
 0xa2d   :  { %712 = vrot.lane.b32.xlu1 %v3928_v47, %s4255_s30 }
 0xa2e   :  { %v3930_v49 = vpop.eup %3929 }
 0xa2f   :  { %714 = vrot.lane.b32.xlu0 %v3930_v49, %s4255_s30 }
 0xa9f   :  { %v713_v50 = vpop.permute.xlu1 %712 }
 0xaa0   :  { %v718_v52 = vmul.f32 %v3924_v32, %v713_v50 }
 0xaa1   :  { %v715_v51 = vpop.permute.xlu0 %714 }
 0xaa2   :  { %v719_v53 = vmul.f32 %v3926_v35, %v715_v51 }
 0xaa4   :  { %v720_v54 = vpack.c.bf16 %v719_v53, %v718_v52 }
 0xaa6   :  { %722 = vrot.lane.b32.xlu1 %v720_v54, %s4254_s26 }
 0xb18   :  { %v723_v63 = vpop.permute.xlu1 %722 }
 0xb19   :  { %726 = vst.msk [vmem:[#allocation3 + $0x18] sm:$0xff] %vm55_vm2, %v723_v63  ;;  %3632 = vmatmul.mubr.msk.bf16.vlgmr.msra.gmra.mrb[16].mxu0 %vm55_vm2, %v723_v63 }
 0xb1a   :  { %3644 = vmatpush3.bf16.msra.mxu0 %v4341_v2  ;;  %3647 = vmatprep.mubr.msk.bf16.mxu0 %vm4253_vm0, %v4252_v1 }
 0xb1b   :  { %3645 = vmatprep.subr.bf16.mxu0 %v4252_v1 }
 0xb1e   :  { %3646 = vmatpush3.bf16.msra.mxu0 %v4355_v5 }
 0xbec   :  { %v767_v3 = vpop.f32.mrb[16].mxu0 }
 0xbed   :  { %v774_v6 = vadd.f32 %v767_v3, %v237_v0  ;;  %v3633_v7 = vpop.f32.mrb[17].mxu0 }
 0xbee   :  { %v770_v8 = vpop.f32.mrb[18].mxu0 }
 0xbef   :  { %3931 = vtanh.f32 %v774_v6  ;;  %v775_v9 = vadd.f32 %v770_v8, %v240_v4  ;;  %v3634_v10 = vpop.f32.mrb[19].mxu0  ;;  %v3359_v13 = vmul.f32 -1.442695, %v774_v6 }
 0xbf1   :  { %3933 = vtanh.f32 %v775_v9  ;;  %v3360_v14 = vmul.f32 -1.442695, %v775_v9 }
 0xbf2   :  { %3935 = vpow2.f32 %v3359_v13 }
 0xbf3   :  { %3937 = vpow2.f32 %v3360_v14 }
 0xbf9   :  { %v3932_v11 = vpop.eup %3931 }
 0xbfa   :  { %794 = vrot.lane.b32.xlu0 %v3932_v11, %s4255_s30  ;;  %v3843_v11 = vld [vmem:[%s5365_s2] sm:$0xff]  }
 0xbfb   :  { %v3934_v12 = vpop.eup %3933  ;;  %3659 = vmatprep.subr.bf16.mxu0 %v3843_v11 }
 0xbfc   :  { %796 = vrot.lane.b32.xlu1 %v3934_v12, %s4255_s30  ;;  %v3936_v15 = vpop.eup %3935 }
 0xbfd   :  { %v3938_v16 = vpop.eup %3937  ;;  %v782_v17 = vadd.f32 1.0, %v3936_v15 }
 0xbfe   :  { %v783_v18 = vadd.f32 1.0, %v3938_v16 }
 0xbff   :  { %3939 = vrcp.f32 %v782_v17  ;;  %v3844_v17 = vld [vmem:[%s5365_s2 + $0x8] sm:$0xff]  }
 0xc00   :  { %3941 = vrcp.f32 %v783_v18 }
 0xc09   :  { %v3940_v20 = vpop.eup %3939 }
 0xc0a   :  { %v3942_v23 = vpop.eup %3941  ;;  %v790_v26 = vmul.f32 %v3940_v20, %v4504_v40  ;;  %v245_v40 = vadd.f32 %v4531_v55, %v4421_v19 }
 0xc0b   :  { %v791_v29 = vmul.f32 %v3942_v23, %v4507_v43 }
 0xc6c   :  { %v795_v21 = vpop.permute.xlu0 %794 }
 0xc6d   :  { %v800_v22 = vmul.f32 %v3940_v20, %v795_v21  ;;  %v1164_v21 = vld [vmem:[#allocation3 + $0x8] sm:$0xff] }
 0xc6e   :  { %v797_v24 = vpop.permute.xlu1 %796 }
 0xc6f   :  { %804 = vrot.lane.b32.xlu0 %v800_v22, %s4254_s26  ;;  %v801_v25 = vmul.f32 %v3942_v23, %v797_v24  ;;  %v1165_v22 = vld [vmem:[#allocation3 + $0x10] sm:$0xff] }
 0xc71   :  { %806 = vrot.lane.b32.xlu1 %v801_v25, %s4254_s26 }
 0xce1   :  { %v805_v27 = vpop.permute.xlu0 %804 }
 0xce2   :  { %v810_v28 = vadd.f32 %v805_v27, %v790_v26  ;;  %v253_v26 = vadd.f32 %v4421_v19, %v4537_v60 }
 0xce3   :  { %v807_v30 = vpop.permute.xlu1 %806 }
 0xce4   :  { %3943 = vtanh.f32 %v810_v28  ;;  %v811_v31 = vadd.f32 %v807_v30, %v791_v29 }
 0xce6   :  { %3945 = vtanh.f32 %v811_v31 }
 0xcee   :  { %v3944_v32 = vpop.eup %3943 }
 0xcef   :  { %816 = vrot.lane.b32.xlu0 %v3944_v32, %s4255_s30 }
 0xcf0   :  { %v3946_v33 = vpop.eup %3945 }
 0xcf1   :  { %818 = vrot.lane.b32.xlu1 %v3946_v33, %s4255_s30 }
 0xd61   :  { %v817_v34 = vpop.permute.xlu0 %816 }
 0xd62   :  { %v822_v36 = vmul.f32 %v3940_v20, %v817_v34  ;;  %v1163_v20 = vld [vmem:[#allocation3] sm:$0xff] }
 0xd63   :  { %v819_v35 = vpop.permute.xlu1 %818 }
 0xd64   :  { %v823_v37 = vmul.f32 %v3942_v23, %v819_v35  ;;  %v1166_v23 = vld [vmem:[#allocation3 + $0x18] sm:$0xff] }
 0xd66   :  { %v824_v38 = vpack.c.bf16 %v823_v37, %v822_v36 }
 0xd68   :  { %826 = vrot.lane.b32.xlu0 %v824_v38, %s4254_s26 }
 0xdda   :  { %v827_v39 = vpop.permute.xlu0 %826 }
 0xddb   :  { %830 = vst.msk [vmem:[#allocation3 + $0x20] sm:$0xff] %vm55_vm2, %v827_v39  ;;  %3640 = vmatmul.mubr.msk.bf16.vlgmr.msra.gmra.mrb[16].mxu1 %vm55_vm2, %v827_v39 }
 0xddc   :  { %3652 = vmatpush3.bf16.msra.mxu1 %v4341_v2  ;;  %3655 = vmatprep.mubr.msk.bf16.mxu1 %vm4253_vm0, %v4252_v1 }
 0xddd   :  { %3653 = vmatprep.subr.bf16.mxu1 %v4252_v1 }
 0xde0   :  { %3654 = vmatpush3.bf16.msra.mxu1 %v4355_v5 }
 0xde1   :  { %3679 = vmatprep.subr.bf16.mxu1 %v4252_v1 }
 0xde2   :  { %v1167_v24 = vld [vmem:[#allocation3 + $0x20] sm:$0xff] }
 0xeae   :  { %v871_v41 = vpop.f32.mrb[16].mxu1 }
 0xeaf   :  { %v878_v43 = vadd.f32 %v871_v41, %v245_v40  ;;  %v3641_v44 = vpop.f32.mrb[17].mxu1 }
 0xeb0   :  { %v874_v45 = vpop.f32.mrb[18].mxu1 }
 0xeb1   :  { %3947 = vtanh.f32 %v878_v43  ;;  %v879_v2 = vadd.f32 %v874_v45, %v248_v42  ;;  %v3642_v46 = vpop.f32.mrb[19].mxu1  ;;  %v3362_v48 = vmul.f32 -1.442695, %v878_v43 }
 0xeb3   :  { %3949 = vtanh.f32 %v879_v2  ;;  %v3363_v49 = vmul.f32 -1.442695, %v879_v2 }
 0xeb4   :  { %3951 = vpow2.f32 %v3362_v48 }
 0xeb5   :  { %3953 = vpow2.f32 %v3363_v49 }
 0xebb   :  { %v3948_v47 = vpop.eup %3947 }
 0xebc   :  { %898 = vrot.lane.b32.xlu1 %v3948_v47, %s4255_s30 }
 0xebd   :  { %v3950_v5 = vpop.eup %3949 }
 0xebe   :  { %900 = vrot.lane.b32.xlu0 %v3950_v5, %s4255_s30  ;;  %v3952_v50 = vpop.eup %3951 }
 0xebf   :  { %v3954_v51 = vpop.eup %3953  ;;  %v886_v52 = vadd.f32 1.0, %v3952_v50 }
 0xec0   :  { %v887_v53 = vadd.f32 1.0, %v3954_v51 }
 0xec1   :  { %3955 = vrcp.f32 %v886_v52 }
 0xec2   :  { %3957 = vrcp.f32 %v887_v53 }
 0xecb   :  { %v3956_v54 = vpop.eup %3955 }
 0xecc   :  { %v3958_v57 = vpop.eup %3957  ;;  %v894_v0 = vmul.f32 %v3956_v54, %v810_v28  ;;  %v256_v28 = vadd.f32 %v4421_v19, %v4541_v62 }
 0xecd   :  { %v895_v6 = vmul.f32 %v3958_v57, %v811_v31 }
 0xf2e   :  { %v899_v55 = vpop.permute.xlu1 %898 }
 0xf2f   :  { %v904_v56 = vmul.f32 %v3956_v54, %v899_v55 }
 0xf30   :  { %v901_v58 = vpop.permute.xlu0 %900 }
 0xf31   :  { %908 = vrot.lane.b32.xlu1 %v904_v56, %s4254_s26  ;;  %v905_v63 = vmul.f32 %v3958_v57, %v901_v58 }
 0xf33   :  { %910 = vrot.lane.b32.xlu0 %v905_v63, %s4254_s26 }
 0xfa3   :  { %v909_v3 = vpop.permute.xlu1 %908 }
 0xfa4   :  { %v4577_v4 = vadd.f32 %v909_v3, %v894_v0 }
 0xfa5   :  { %v911_v7 = vpop.permute.xlu0 %910 }
 0xfa6   :  { %3959 = vtanh.f32 %v4577_v4  ;;  %v4580_v8 = vadd.f32 %v911_v7, %v895_v6 }
 0xfa8   :  { %3961 = vtanh.f32 %v4580_v8 }
 0xfb0   :  { %v3960_v9 = vpop.eup %3959 }
 0xfb1   :  { %920 = vrot.lane.b32.xlu1 %v3960_v9, %s4255_s30  ;;  %v4660_v9 = vld [vmem:[%s5366_s5] sm:$0xff]  }
 0xfb2   :  { %v3962_v10 = vpop.eup %3961 }
 0xfb3   :  { %922 = vrot.lane.b32.xlu0 %v3962_v10, %s4255_s30  ;;  %v4667_v10 = vld [vmem:[%s5366_s5 + $0x8] sm:$0xff]  }
0x1023   :  { %v921_v12 = vpop.permute.xlu1 %920 }
0x1024   :  { %v926_v14 = vmul.f32 %v3956_v54, %v921_v12 }
0x1025   :  { %v923_v13 = vpop.permute.xlu0 %922 }
0x1026   :  { %v927_v15 = vmul.f32 %v3958_v57, %v923_v13 }
0x1028   :  { %v928_v16 = vpack.c.bf16 %v927_v15, %v926_v14 }
0x102a   :  { %930 = vrot.lane.b32.xlu1 %v928_v16, %s4254_s26 }
0x109c   :  { %v931_v18 = vpop.permute.xlu1 %930 }
0x109d   :  { %934 = vst.msk [vmem:[#allocation3 + $0x28] sm:$0xff] %vm55_vm2, %v931_v18  ;;  %3648 = vmatmul.mubr.msk.bf16.vlgmr.msra.gmra.mrb[20].mxu0 %vm55_vm2, %v931_v18 }
0x109e   :  { %3660 = vmatpush3.bf16.msra.mxu0 %v3843_v11  ;;  %3663 = vmatprep.mubr.msk.bf16.mxu0 %vm55_vm2, %v1163_v20 }
0x109f   :  { %3661 = vmatprep.subr.bf16.mxu0 %v3844_v17 }
0x10a2   :  { %3662 = vmatpush3.bf16.msra.mxu0 %v3844_v17 }
0x10a3   :  { %3711 = vmatprep.subr.bf16.mxu0 %v4252_v1 }
0x10a4   :  { %v1168_v25 = vld [vmem:[#allocation3 + $0x28] sm:$0xff] }
0x10a5   :  { %3664 = vmatmul.mubr.msk.bf16.vlgmr.msra.gmra.mrb[24].mxu0 %vm55_vm2, %v1164_v21 }
0x10a6   :  { %3667 = vmatprep.mubr.msk.bf16.mxu0 %vm55_vm2, %v1165_v22  ;;  %3712 = vmatpush3.bf16.msra.mxu0 %v4660_v9  ;;  %v64_v22 = vld [vmem:[%s5361_s11 + $0x10] sm:$0xff] }
0x10a7   :  { %3713 = vmatprep.subr.bf16.mxu0 %v4252_v1  ;;  %70 = vst.msk [vmem:[%s5363_s14 + $0x10] sm:$0xff] %vm55_vm2, %v64_v22 }
0x10aa   :  { %3714 = vmatpush3.bf16.msra.mxu0 %v4667_v10 }
0x10ab   :  { %3727 = vmatprep.subr.bf16.mxu0 %v4252_v1 }
0x10ad   :  { %3668 = vmatmul.mubr.msk.bf16.gmra.mrb[28].mxu0 %vm55_vm2, %v1166_v23  ;;  %v65_v23 = vld [vmem:[%s5361_s11 + $0x18] sm:$0xff] }
0x10ae   :  { %3671 = vmatprep.mubr.msk.bf16.mxu0 %vm55_vm2, %v1167_v24  ;;  %71 = vst.msk [vmem:[%s5363_s14 + $0x18] sm:$0xff] %vm55_vm2, %v65_v23  ;;  %v261_v24 = vadd.f32 %v4535_v59, %v4421_v19 }
0x10b5   :  { %3672 = vmatmul.mubr.msk.bf16.gmra.mrb[32].mxu0 %vm55_vm2, %v1168_v25 }
0x1170   :  { %v975_v27 = vpop.f32.mrb[20].mxu0 }
0x1171   :  { %v982_v29 = vadd.f32 %v975_v27, %v253_v26  ;;  %v3649_v30 = vpop.f32.mrb[21].mxu0  ;;  %v264_v26 = vadd.f32 %v4539_v61, %v4421_v19 }
0x1172   :  { %v978_v31 = vpop.f32.mrb[22].mxu0 }
0x1173   :  { %3963 = vtanh.f32 %v982_v29  ;;  %v983_v32 = vadd.f32 %v978_v31, %v256_v28  ;;  %v3650_v33 = vpop.f32.mrb[23].mxu0  ;;  %v3365_v2 = vmul.f32 -1.442695, %v982_v29 }
0x1175   :  { %3965 = vtanh.f32 %v983_v32  ;;  %v3366_v46 = vmul.f32 -1.442695, %v983_v32  ;;  %v4719_v32 = vld [vmem:[%s5367_s8] ss:$0 sm:$0xff] }
0x1176   :  { %3967 = vpow2.f32 %v3365_v2 }
0x1177   :  { %3969 = vpow2.f32 %v3366_v46 }
0x1178   :  { %v4605_v34 = vpop.f32.mrb[24].mxu0 }
0x1179   :  { %v4607_v35 = vpop.f32.mrb[25].mxu0 }
0x117a   :  { %v4609_v36 = vpop.f32.mrb[26].mxu0  ;;  %v1253_v33 = vadd.f32 %v4719_v32, %v4607_v35  ;;  %v3384_v35 = vld [vmem:[%s5363_s14 + $0x18] sm:$0xff] }
0x117b   :  { %v4611_v37 = vpop.f32.mrb[27].mxu0 }
0x117d   :  { %v3964_v60 = vpop.eup %3963 }
0x117e   :  { %1002 = vrot.lane.b32.xlu0 %v3964_v60, %s4255_s30  ;;  %v1256_v60 = vadd.f32 %v4719_v32, %v4611_v37 }
0x117f   :  { %v3966_v38 = vpop.eup %3965 }
0x1180   :  { %v4614_v62 = vpop.f32.mrb[28].mxu0  ;;  %1004 = vrot.lane.b32.xlu1 %v3966_v38, %s4255_s30  ;;  %v3968_v47 = vpop.eup %3967 }
0x1181   :  { %v4617_v39 = vpop.f32.mrb[29].mxu0  ;;  %v3970_v5 = vpop.eup %3969  ;;  %v990_v48 = vadd.f32 1.0, %v3968_v47 }
0x1182   :  { %v4619_v40 = vpop.f32.mrb[30].mxu0  ;;  %v991_v49 = vadd.f32 1.0, %v3970_v5  ;;  %v3383_v5 = vld [vmem:[%s5363_s14 + $0x10] sm:$0xff] }
0x1183   :  { %v4621_v41 = vpop.f32.mrb[31].mxu0  ;;  %3971 = vrcp.f32 %v990_v48 }
0x1184   :  { %3973 = vrcp.f32 %v991_v49 }
0x1188   :  { %v4623_v42 = vpop.f32.mrb[32].mxu0 }
0x1189   :  { %v4625_v43 = vpop.f32.mrb[33].mxu0 }
0x118a   :  { %v4627_v44 = vpop.f32.mrb[34].mxu0 }
0x118b   :  { %v4629_v45 = vpop.f32.mrb[35].mxu0 }
0x118d   :  { %v3972_v50 = vpop.eup %3971 }
0x118e   :  { %v3974_v53 = vpop.eup %3973  ;;  %v998_v56 = vmul.f32 %v3972_v50, %v4577_v4  ;;  %v51_v4 = vld [vmem:[%s5360_s10 + $0x10] sm:$0xff] }
0x118f   :  { %v999_v63 = vmul.f32 %v3974_v53, %v4580_v8  ;;  %v52_v8 = vld [vmem:[%s5360_s10 + $0x18] sm:$0xff]  ;;  %58 = vst.msk [vmem:[%s5362_s13 + $0x10] sm:$0xff] %vm55_vm2, %v51_v4 }
0x1190   :  { %59 = vst.msk [vmem:[%s5362_s13 + $0x18] sm:$0xff] %vm55_vm2, %v52_v8 }
0x1196   :  { %v3381_v17 = vld [vmem:[%s5362_s13 + $0x10] sm:$0xff] }
0x1197   :  { %v3382_v18 = vld [vmem:[%s5362_s13 + $0x18] sm:$0xff] }
0x1198   :  { %v1343_v20 = vpack.c.bf16 %v3382_v18, %v3381_v17 }
0x11f0   :  { %v1003_v51 = vpop.permute.xlu0 %1002 }
0x11f1   :  { %v1008_v52 = vmul.f32 %v3972_v50, %v1003_v51 }
0x11f2   :  { %v1005_v54 = vpop.permute.xlu1 %1004 }
0x11f3   :  { %1012 = vrot.lane.b32.xlu0 %v1008_v52, %s4254_s26  ;;  %v1009_v55 = vmul.f32 %v3974_v53, %v1005_v54 }
0x11f5   :  { %1014 = vrot.lane.b32.xlu1 %v1009_v55, %s4254_s26 }
0x1265   :  { %v1013_v57 = vpop.permute.xlu0 %1012 }
0x1266   :  { %v4634_v58 = vadd.f32 %v1013_v57, %v998_v56 }
0x1267   :  { %v1015_v0 = vpop.permute.xlu1 %1014 }
0x1268   :  { %3975 = vtanh.f32 %v4634_v58  ;;  %v4638_v3 = vadd.f32 %v1015_v0, %v999_v63 }
0x126a   :  { %3977 = vtanh.f32 %v4638_v3 }
0x1272   :  { %v3976_v6 = vpop.eup %3975 }
0x1273   :  { %1024 = vrot.lane.b32.xlu0 %v3976_v6, %s4255_s30 }
0x1274   :  { %v3978_v7 = vpop.eup %3977 }
0x1275   :  { %1026 = vrot.lane.b32.xlu1 %v3978_v7, %s4255_s30 }
0x12e5   :  { %v1025_v11 = vpop.permute.xlu0 %1024 }
0x12e6   :  { %v1030_v13 = vmul.f32 %v3972_v50, %v1025_v11 }
0x12e7   :  { %v1027_v12 = vpop.permute.xlu1 %1026 }
0x12e8   :  { %v1031_v14 = vmul.f32 %v3974_v53, %v1027_v12 }
0x12ea   :  { %v1032_v15 = vpack.c.bf16 %v1031_v14, %v1030_v13 }
0x12ec   :  { %1034 = vrot.lane.b32.xlu0 %v1032_v15, %s4254_s26 }
0x135e   :  { %v1035_v16 = vpop.permute.xlu0 %1034 }
0x135f   :  { %1038 = vst.msk [vmem:[#allocation3 + $0x30] sm:$0xff] %vm55_vm2, %v1035_v16  ;;  %3656 = vmatmul.mubr.msk.bf16.vlgmr.msra.gmra.mrb[20].mxu1 %vm55_vm2, %v1035_v16 }
0x1360   :  { %3680 = vmatpush3.bf16.msra.mxu1 %v4660_v9  ;;  %3683 = vmatprep.mubr.msk.bf16.mxu1 %vm4253_vm0, %v4252_v1 }
0x1361   :  { %3681 = vmatprep.subr.bf16.mxu1 %v4252_v1 }
0x1364   :  { %3682 = vmatpush3.bf16.msra.mxu1 %v4667_v10 }
0x1365   :  { %3687 = vmatprep.subr.bf16.mxu1 %v4252_v1 }
0x1366   :  { %v1169_v21 = vld [vmem:[#allocation3 + $0x30] sm:$0xff] }
0x1367   :  { %3675 = vmatprep.mubr.msk.bf16.mxu0 %vm55_vm2, %v1169_v21  ;;  %3684 = vmatmul.mubr.msk.bf16.vlgmr.msra.gmra.mrb[24].mxu1 %vm55_vm2, %v1343_v20 }
0x1368   :  { %3688 = vmatpush3.bf16.msra.mxu1 %v4660_v9  ;;  %3691 = vmatprep.mubr.msk.bf16.mxu1 %vm4253_vm0, %v4252_v1 }
0x1369   :  { %3689 = vmatprep.subr.bf16.mxu1 %v4252_v1 }
0x136c   :  { %3690 = vmatpush3.bf16.msra.mxu1 %v4667_v10 }
0x136d   :  { %3695 = vmatprep.subr.bf16.mxu1 %v4252_v1 }
0x1432   :  { %v1079_v25 = vpop.f32.mrb[20].mxu1 }
0x1433   :  { %v4712_v27 = vadd.f32 %v1079_v25, %v261_v24  ;;  %v3657_v28 = vpop.f32.mrb[21].mxu1  ;;  %v1261_v24 = vadd.f32 %v4605_v34, %v4719_v32 }
0x1434   :  { %v1082_v29 = vpop.f32.mrb[22].mxu1 }
0x1435   :  { %v4714_v30 = vadd.f32 %v1082_v29, %v264_v26  ;;  %v3658_v31 = vpop.f32.mrb[23].mxu1  ;;  %v1264_v26 = vadd.f32 %v4609_v36, %v4719_v32 }
0x143a   :  { %v1393_v59 = vpop.f32.mrb[24].mxu1 }
0x143b   :  { %v1400_v19 = vadd.f32 %v1393_v59, %v1253_v33  ;;  %v3685_v61 = vpop.f32.mrb[25].mxu1 }
0x143c   :  { %v1396_v38 = vpop.f32.mrb[26].mxu1 }
0x143d   :  { %3979 = vtanh.f32 %v1400_v19  ;;  %v1401_v2 = vadd.f32 %v1396_v38, %v1256_v60  ;;  %v3686_v46 = vpop.f32.mrb[27].mxu1  ;;  %v3388_v37 = vmul.f32 -1.442695, %v1400_v19 }
0x143f   :  { %3981 = vtanh.f32 %v1401_v2  ;;  %v3389_v49 = vmul.f32 -1.442695, %v1401_v2 }
0x1440   :  { %3983 = vpow2.f32 %v3388_v37 }
0x1441   :  { %3985 = vpow2.f32 %v3389_v49 }
0x1447   :  { %v3980_v47 = vpop.eup %3979 }
0x1448   :  { %1428 = vrot.lane.b32.xlu1 %v3980_v47, %s4255_s30 }
0x1449   :  { %v3982_v48 = vpop.eup %3981 }
0x144a   :  { %1430 = vrot.lane.b32.xlu0 %v3982_v48, %s4255_s30  ;;  %v3984_v50 = vpop.eup %3983 }
0x144b   :  { %v3986_v51 = vpop.eup %3985  ;;  %v1408_v52 = vadd.f32 1.0, %v3984_v50 }
0x144c   :  { %1418 = vrot.lane.b32.xlu1 %v3383_v5, %s4254_s26  ;;  %v1409_v53 = vadd.f32 1.0, %v3986_v51 }
0x144d   :  { %3987 = vrcp.f32 %v1408_v52 }
0x144e   :  { %1420 = vrot.lane.b32.xlu0 %v3384_v35, %s4254_s26  ;;  %3989 = vrcp.f32 %v1409_v53 }
0x1457   :  { %v3988_v54 = vpop.eup %3987 }
0x1458   :  { %v3990_v57 = vpop.eup %3989 }
0x14ba   :  { %v1429_v55 = vpop.permute.xlu1 %1428 }
0x14bb   :  { %v1434_v56 = vmul.f32 %v3988_v54, %v1429_v55 }
0x14bc   :  { %v1431_v63 = vpop.permute.xlu0 %1430 }
0x14bd   :  { %1438 = vrot.lane.b32.xlu1 %v1434_v56, %s4254_s26  ;;  %v1435_v0 = vmul.f32 %v3990_v57, %v1431_v63 }
0x14be   :  { %v1419_v6 = vpop.permute.xlu1 %1418 }
0x14bf   :  { %1440 = vrot.lane.b32.xlu0 %v1435_v0, %s4254_s26  ;;  %v1424_v7 = vmul.f32 %v3988_v54, %v1419_v6 }
0x14c0   :  { %v1421_v4 = vpop.permute.xlu0 %1420 }
0x14c1   :  { %v1425_v12 = vmul.f32 %v3990_v57, %v1421_v4 }
0x152f   :  { %v1439_v8 = vpop.permute.xlu1 %1438 }
0x1530   :  { %v1444_v11 = vadd.f32 %v1439_v8, %v1424_v7 }
0x1531   :  { %v1441_v13 = vpop.permute.xlu0 %1440 }
0x1532   :  { %3991 = vtanh.f32 %v1444_v11  ;;  %v1445_v14 = vadd.f32 %v1441_v13, %v1425_v12  ;;  %v1272_v13 = vadd.f32 %v4719_v32, %v4621_v41 }
0x1534   :  { %3993 = vtanh.f32 %v1445_v14 }
0x153c   :  { %v3992_v15 = vpop.eup %3991 }
0x153d   :  { %1450 = vrot.lane.b32.xlu1 %v3992_v15, %s4255_s30 }
0x153e   :  { %v3994_v16 = vpop.eup %3993 }
0x153f   :  { %1452 = vrot.lane.b32.xlu0 %v3994_v16, %s4255_s30 }
0x15af   :  { %v1451_v17 = vpop.permute.xlu1 %1450 }
0x15b0   :  { %v1456_v20 = vmul.f32 %v3988_v54, %v1451_v17 }
0x15b1   :  { %v1453_v18 = vpop.permute.xlu0 %1452 }
0x15b2   :  { %v1457_v21 = vmul.f32 %v3990_v57, %v1453_v18 }
0x15b4   :  { %v1458_v22 = vpack.c.bf16 %v1457_v21, %v1456_v20 }
0x15b6   :  { %1460 = vrot.lane.b32.xlu1 %v1458_v22, %s4254_s26 }
0x1628   :  { %v1461_v23 = vpop.permute.xlu1 %1460 }
0x1629   :  { %1463 = vst.msk [vmem:[#allocation3] sm:$0xff] %vm55_vm2, %v1461_v23  ;;  %3692 = vmatmul.mubr.msk.bf16.vlgmr.msra.gmra.mrb[28].mxu1 %vm55_vm2, %v1461_v23 }
0x162a   :  { %3696 = vmatpush3.bf16.msra.mxu1 %v4660_v9  ;;  %3699 = vmatprep.mubr.msk.bf16.mxu1 %vm4253_vm0, %v4252_v1 }
0x162b   :  { %3697 = vmatprep.subr.bf16.mxu1 %v4252_v1 }
0x162e   :  { %3698 = vmatpush3.bf16.msra.mxu1 %v4667_v10 }
0x162f   :  { %3703 = vmatprep.subr.bf16.mxu1 %v4252_v1 }
0x16fc   :  { %v1503_v25 = vpop.f32.mrb[28].mxu1 }
0x16fd   :  { %v1510_v28 = vadd.f32 %v1503_v25, %v1261_v24  ;;  %v3693_v29 = vpop.f32.mrb[29].mxu1 }
0x16fe   :  { %v1506_v31 = vpop.f32.mrb[30].mxu1 }
0x16ff   :  { %3995 = vtanh.f32 %v1510_v28  ;;  %v1511_v33 = vadd.f32 %v1506_v31, %v1264_v26  ;;  %v3694_v59 = vpop.f32.mrb[31].mxu1  ;;  %v3391_v61 = vmul.f32 -1.442695, %v1510_v28 }
0x1701   :  { %3997 = vtanh.f32 %v1511_v33  ;;  %v3392_v38 = vmul.f32 -1.442695, %v1511_v33 }
0x1702   :  { %3999 = vpow2.f32 %v3391_v61 }
0x1703   :  { %4001 = vpow2.f32 %v3392_v38 }
0x1709   :  { %v3996_v60 = vpop.eup %3995 }
0x170a   :  { %1530 = vrot.lane.b32.xlu0 %v3996_v60, %s4255_s30 }
0x170b   :  { %v3998_v19 = vpop.eup %3997 }
0x170c   :  { %1532 = vrot.lane.b32.xlu1 %v3998_v19, %s4255_s30  ;;  %v4000_v34 = vpop.eup %3999 }
0x170d   :  { %v4002_v2 = vpop.eup %4001  ;;  %v1518_v36 = vadd.f32 1.0, %v4000_v34 }
0x170e   :  { %v1519_v46 = vadd.f32 1.0, %v4002_v2 }
0x170f   :  { %4003 = vrcp.f32 %v1518_v36 }
0x1710   :  { %4005 = vrcp.f32 %v1519_v46 }
0x1719   :  { %v4004_v47 = vpop.eup %4003 }
0x171a   :  { %v4006_v35 = vpop.eup %4005  ;;  %v1526_v50 = vmul.f32 %v4004_v47, %v1444_v11  ;;  %v1269_v11 = vadd.f32 %v4719_v32, %v4617_v39 }
0x171b   :  { %v1527_v53 = vmul.f32 %v4006_v35, %v1445_v14 }
0x177c   :  { %v1531_v5 = vpop.permute.xlu0 %1530 }
0x177d   :  { %v1536_v48 = vmul.f32 %v4004_v47, %v1531_v5 }
0x177e   :  { %v1533_v37 = vpop.permute.xlu1 %1532 }
0x177f   :  { %1540 = vrot.lane.b32.xlu0 %v1536_v48, %s4254_s26  ;;  %v1537_v49 = vmul.f32 %v4006_v35, %v1533_v37 }
0x1781   :  { %1542 = vrot.lane.b32.xlu1 %v1537_v49, %s4254_s26 }
0x17f1   :  { %v1541_v51 = vpop.permute.xlu0 %1540 }
0x17f2   :  { %v1546_v52 = vadd.f32 %v1541_v51, %v1526_v50 }
0x17f3   :  { %v1543_v54 = vpop.permute.xlu1 %1542 }
0x17f4   :  { %4007 = vtanh.f32 %v1546_v52  ;;  %v1547_v55 = vadd.f32 %v1543_v54, %v1527_v53  ;;  %v3369_v53 = vmul.f32 -1.442695, %v4714_v30 }
0x17f6   :  { %4009 = vtanh.f32 %v1547_v55 }
0x17fe   :  { %v4008_v56 = vpop.eup %4007 }
0x17ff   :  { %1552 = vrot.lane.b32.xlu0 %v4008_v56, %s4255_s30 }
0x1800   :  { %v4010_v57 = vpop.eup %4009 }
0x1801   :  { %1554 = vrot.lane.b32.xlu1 %v4010_v57, %s4255_s30 }
0x1871   :  { %v1553_v63 = vpop.permute.xlu0 %1552 }
0x1872   :  { %v1558_v6 = vmul.f32 %v4004_v47, %v1553_v63  ;;  %v1280_v63 = vadd.f32 %v4619_v40, %v4719_v32 }
0x1873   :  { %v1555_v0 = vpop.permute.xlu1 %1554 }
0x1874   :  { %v1559_v7 = vmul.f32 %v4006_v35, %v1555_v0 }
0x1876   :  { %v1560_v4 = vpack.c.bf16 %v1559_v7, %v1558_v6 }
0x1878   :  { %1562 = vrot.lane.b32.xlu0 %v1560_v4, %s4254_s26 }
0x18ea   :  { %v1563_v8 = vpop.permute.xlu0 %1562 }
0x18eb   :  { %1565 = vst.msk [vmem:[#allocation3 + $0x8] sm:$0xff] %vm55_vm2, %v1563_v8  ;;  %3700 = vmatmul.mubr.msk.bf16.vlgmr.msra.gmra.mrb[32].mxu1 %vm55_vm2, %v1563_v8 }
0x18ec   :  { %3704 = vmatpush3.bf16.msra.mxu1 %v4660_v9  ;;  %3707 = vmatprep.mubr.msk.bf16.mxu1 %vm4253_vm0, %v4252_v1 }
0x18ed   :  { %3705 = vmatprep.subr.bf16.mxu1 %v4252_v1 }
0x18f0   :  { %3706 = vmatpush3.bf16.msra.mxu1 %v4667_v10 }
0x18f1   :  { %3719 = vmatprep.subr.bf16.mxu1 %v4252_v1 }
0x19be   :  { %v1605_v12 = vpop.f32.mrb[32].mxu1 }
0x19bf   :  { %v1612_v14 = vadd.f32 %v1605_v12, %v1269_v11  ;;  %v3701_v15 = vpop.f32.mrb[33].mxu1 }
0x19c0   :  { %v1608_v16 = vpop.f32.mrb[34].mxu1 }
0x19c1   :  { %4011 = vtanh.f32 %v1612_v14  ;;  %v1613_v17 = vadd.f32 %v1608_v16, %v1272_v13  ;;  %v3702_v18 = vpop.f32.mrb[35].mxu1  ;;  %v3394_v22 = vmul.f32 -1.442695, %v1612_v14 }
0x19c3   :  { %4013 = vtanh.f32 %v1613_v17  ;;  %v3395_v23 = vmul.f32 -1.442695, %v1613_v17 }
0x19c4   :  { %4015 = vpow2.f32 %v3394_v22 }
0x19c5   :  { %4017 = vpow2.f32 %v3395_v23 }
0x19cb   :  { %v4012_v20 = vpop.eup %4011 }
0x19cc   :  { %1632 = vrot.lane.b32.xlu1 %v4012_v20, %s4255_s30 }
0x19cd   :  { %v4014_v21 = vpop.eup %4013 }
0x19ce   :  { %1634 = vrot.lane.b32.xlu0 %v4014_v21, %s4255_s30  ;;  %v4016_v39 = vpop.eup %4015 }
0x19cf   :  { %v4018_v24 = vpop.eup %4017  ;;  %v1620_v41 = vadd.f32 1.0, %v4016_v39 }
0x19d0   :  { %v1621_v25 = vadd.f32 1.0, %v4018_v24 }
0x19d1   :  { %4019 = vrcp.f32 %v1620_v41 }
0x19d2   :  { %4021 = vrcp.f32 %v1621_v25 }
0x19db   :  { %v4020_v26 = vpop.eup %4019 }
0x19dc   :  { %v4022_v31 = vpop.eup %4021  ;;  %v1628_v60 = vmul.f32 %v4020_v26, %v1546_v52  ;;  %v3368_v52 = vmul.f32 -1.442695, %v4712_v27 }
0x19dd   :  { %v1629_v38 = vmul.f32 %v4022_v31, %v1547_v55  ;;  %v1277_v55 = vadd.f32 %v4614_v62, %v4719_v32 }
0x1a3e   :  { %v1633_v28 = vpop.permute.xlu1 %1632 }
0x1a3f   :  { %v1638_v29 = vmul.f32 %v4020_v26, %v1633_v28 }
0x1a40   :  { %v1635_v33 = vpop.permute.xlu0 %1634 }
0x1a41   :  { %1642 = vrot.lane.b32.xlu1 %v1638_v29, %s4254_s26  ;;  %v1639_v59 = vmul.f32 %v4022_v31, %v1635_v33 }
0x1a43   :  { %1644 = vrot.lane.b32.xlu0 %v1639_v59, %s4254_s26 }
0x1ab3   :  { %v1643_v19 = vpop.permute.xlu1 %1642 }
0x1ab4   :  { %v4775_v61 = vadd.f32 %v1643_v19, %v1628_v60 }
0x1ab5   :  { %v1645_v34 = vpop.permute.xlu0 %1644 }
0x1ab6   :  { %4023 = vtanh.f32 %v4775_v61  ;;  %v4778_v2 = vadd.f32 %v1645_v34, %v1629_v38 }
0x1ab8   :  { %4025 = vtanh.f32 %v4778_v2 }
0x1ab9   :  { %4027 = vtanh.f32 %v4712_v27 }
0x1aba   :  { %4029 = vtanh.f32 %v4714_v30 }
0x1abb   :  { %4031 = vpow2.f32 %v3368_v52 }
0x1abc   :  { %4033 = vpow2.f32 %v3369_v53 }
0x1ac0   :  { %v4024_v36 = vpop.eup %4023 }
0x1ac1   :  { %1654 = vrot.lane.b32.xlu1 %v4024_v36, %s4255_s30 }
0x1ac2   :  { %v4026_v46 = vpop.eup %4025 }
0x1ac3   :  { %1656 = vrot.lane.b32.xlu0 %v4026_v46, %s4255_s30  ;;  %v4028_v47 = vpop.eup %4027 }
0x1ac4   :  { %v4030_v50 = vpop.eup %4029 }
0x1ac5   :  { %v4032_v54 = vpop.eup %4031 }
0x1ac6   :  { %v4034_v57 = vpop.eup %4033  ;;  %v1094_v0 = vadd.f32 1.0, %v4032_v54 }
0x1ac7   :  { %1106 = vrot.lane.b32.xlu0 %v4028_v47, %s4255_s30  ;;  %v1095_v11 = vadd.f32 1.0, %v4034_v57 }
0x1b33   :  { %v1655_v5 = vpop.permute.xlu1 %1654 }
0x1b34   :  { %v1660_v35 = vmul.f32 %v4020_v26, %v1655_v5 }
0x1b35   :  { %v1657_v48 = vpop.permute.xlu0 %1656 }
0x1b36   :  { %v1661_v37 = vmul.f32 %v4022_v31, %v1657_v48 }
0x1b38   :  { %v1662_v49 = vpack.c.bf16 %v1661_v37, %v1660_v35 }
0x1b39   :  { %v1107_v12 = vpop.permute.xlu0 %1106 }
0x1b3a   :  { %1664 = vrot.lane.b32.xlu1 %v1662_v49, %s4254_s26 }
0x1b3e   :  { %1108 = vrot.lane.b32.xlu1 %v4030_v50, %s4255_s30 }
0x1bac   :  { %v1665_v51 = vpop.permute.xlu1 %1664 }
0x1bad   :  { %1667 = vst.msk [vmem:[#allocation3 + $0x10] sm:$0xff] %vm55_vm2, %v1665_v51  ;;  %3708 = vmatmul.mubr.msk.bf16.vlgmr.msra.gmra.mrb[36].mxu1 %vm55_vm2, %v1665_v51 }
0x1bae   :  { %3720 = vmatpush3.bf16.msra.mxu1 %v4660_v9  ;;  %3723 = vmatprep.mubr.msk.bf16.mxu1 %vm4253_vm0, %v4252_v1 }
0x1baf   :  { %3721 = vmatprep.subr.bf16.mxu1 %v4252_v1 }
0x1bb0   :  { %v1109_v15 = vpop.permute.xlu1 %1108 }
0x1bb2   :  { %3722 = vmatpush3.bf16.msra.mxu1 %v4667_v10 }
0x1bb3   :  { %3735 = vmatprep.subr.bf16.mxu1 %v4252_v1 }
0x1c80   :  { %v1707_v56 = vpop.f32.mrb[36].mxu1 }
0x1c81   :  { %v1714_v6 = vadd.f32 %v1707_v56, %v1277_v55  ;;  %v3709_v7 = vpop.f32.mrb[37].mxu1 }
0x1c82   :  { %v1710_v4 = vpop.f32.mrb[38].mxu1 }
0x1c83   :  { %4035 = vtanh.f32 %v1714_v6  ;;  %v1715_v8 = vadd.f32 %v1710_v4, %v1280_v63  ;;  %v3710_v27 = vpop.f32.mrb[39].mxu1  ;;  %v3397_v17 = vmul.f32 -1.442695, %v1714_v6 }
0x1c84   :  { %4037 = vrcp.f32 %v1094_v0 }
0x1c85   :  { %4039 = vtanh.f32 %v1715_v8  ;;  %v3398_v18 = vmul.f32 -1.442695, %v1715_v8  ;;  %v1285_v8 = vadd.f32 %v4719_v32, %v4625_v43 }
0x1c86   :  { %4041 = vrcp.f32 %v1095_v11  ;;  %v1288_v11 = vadd.f32 %v4719_v32, %v4629_v45 }
0x1c87   :  { %4043 = vpow2.f32 %v3397_v17 }
0x1c88   :  { %4045 = vpow2.f32 %v3398_v18 }
0x1c8d   :  { %v4036_v30 = vpop.eup %4035 }
0x1c8e   :  { %1734 = vrot.lane.b32.xlu0 %v4036_v30, %s4255_s30  ;;  %v4038_v62 = vpop.eup %4037 }
0x1c8f   :  { %v4040_v13 = vpop.eup %4039  ;;  %v1112_v14 = vmul.f32 %v4038_v62, %v1107_v12  ;;  %v1102_v28 = vmul.f32 %v4038_v62, %v4634_v58 }
0x1c90   :  { %1736 = vrot.lane.b32.xlu1 %v4040_v13, %s4255_s30  ;;  %v4042_v40 = vpop.eup %4041 }
0x1c91   :  { %v1113_v16 = vmul.f32 %v4042_v40, %v1109_v15  ;;  %v4044_v20 = vpop.eup %4043  ;;  %v1103_v59 = vmul.f32 %v4042_v40, %v4638_v3 }
0x1c92   :  { %1116 = vrot.lane.b32.xlu0 %v1112_v14, %s4254_s26  ;;  %v4046_v21 = vpop.eup %4045  ;;  %v1722_v22 = vadd.f32 1.0, %v4044_v20 }
0x1c93   :  { %v1723_v23 = vadd.f32 1.0, %v4046_v21 }
0x1c94   :  { %1118 = vrot.lane.b32.xlu1 %v1113_v16, %s4254_s26  ;;  %4047 = vrcp.f32 %v1722_v22 }
0x1c95   :  { %4049 = vrcp.f32 %v1723_v23 }
0x1c9e   :  { %v4048_v39 = vpop.eup %4047 }
0x1c9f   :  { %v4050_v25 = vpop.eup %4049  ;;  %v1730_v58 = vmul.f32 %v4048_v39, %v4775_v61 }
0x1ca0   :  { %v1731_v3 = vmul.f32 %v4050_v25, %v4778_v2 }
0x1d00   :  { %v1735_v24 = vpop.permute.xlu0 %1734 }
0x1d01   :  { %v1740_v41 = vmul.f32 %v4048_v39, %v1735_v24 }
0x1d02   :  { %v1737_v26 = vpop.permute.xlu1 %1736 }
0x1d03   :  { %1744 = vrot.lane.b32.xlu0 %v1740_v41, %s4254_s26  ;;  %v1741_v29 = vmul.f32 %v4050_v25, %v1737_v26 }
0x1d04   :  { %v1117_v31 = vpop.permute.xlu0 %1116 }
0x1d05   :  { %v4808_v33 = vadd.f32 %v1117_v31, %v1102_v28  ;;  %1746 = vrot.lane.b32.xlu1 %v1741_v29, %s4254_s26 }
0x1d06   :  { %v1119_v60 = vpop.permute.xlu1 %1118 }
0x1d07   :  { %4051 = vtanh.f32 %v4808_v33  ;;  %v4813_v19 = vadd.f32 %v1119_v60, %v1103_v59 }
0x1d09   :  { %4053 = vtanh.f32 %v4813_v19 }
0x1d11   :  { %v4052_v38 = vpop.eup %4051 }
0x1d12   :  { %1128 = vrot.lane.b32.xlu0 %v4052_v38, %s4255_s30 }
0x1d13   :  { %v4054_v34 = vpop.eup %4053 }
0x1d14   :  { %1130 = vrot.lane.b32.xlu1 %v4054_v34, %s4255_s30 }
0x1d75   :  { %v1745_v36 = vpop.permute.xlu0 %1744 }
0x1d76   :  { %v4819_v46 = vadd.f32 %v1745_v36, %v1730_v58 }
0x1d77   :  { %v1747_v47 = vpop.permute.xlu1 %1746 }
0x1d78   :  { %4055 = vtanh.f32 %v4819_v46  ;;  %v4823_v5 = vadd.f32 %v1747_v47, %v1731_v3 }
0x1d7a   :  { %4057 = vtanh.f32 %v4823_v5 }
0x1d82   :  { %v4056_v48 = vpop.eup %4055 }
0x1d83   :  { %1756 = vrot.lane.b32.xlu0 %v4056_v48, %s4255_s30 }
0x1d84   :  { %v4058_v35 = vpop.eup %4057  ;;  %v1129_v37 = vpop.permute.xlu0 %1128 }
0x1d85   :  { %1758 = vrot.lane.b32.xlu1 %v4058_v35, %s4255_s30  ;;  %v4828_v49 = vmul.f32 %v4038_v62, %v1129_v37  ;;  %v1296_v35 = vadd.f32 %v4627_v44, %v4719_v32 }
0x1d86   :  { %v1131_v61 = vpop.permute.xlu1 %1130 }
0x1d87   :  { %v4830_v50 = vmul.f32 %v4042_v40, %v1131_v61 }
0x1d89   :  { %v1136_v2 = vpack.c.bf16 %v4830_v50, %v4828_v49 }
0x1d8b   :  { %1138 = vrot.lane.b32.xlu0 %v1136_v2, %s4254_s26 }
0x1df5   :  { %v1757_v51 = vpop.permute.xlu0 %1756 }
0x1df6   :  { %v1762_v53 = vmul.f32 %v4048_v39, %v1757_v51 }
0x1df7   :  { %v1759_v52 = vpop.permute.xlu1 %1758 }
0x1df8   :  { %v1763_v54 = vmul.f32 %v4050_v25, %v1759_v52 }
0x1dfa   :  { %v1764_v55 = vpack.c.bf16 %v1763_v54, %v1762_v53 }
0x1dfc   :  { %1766 = vrot.lane.b32.xlu1 %v1764_v55, %s4254_s26 }
0x1dfd   :  { %v1139_v56 = vpop.permute.xlu0 %1138 }
0x1dfe   :  { %1142 = vst.msk [vmem:[#allocation3 + $0x38] sm:$0xff] %vm55_vm2, %v1139_v56 }
0x1e05   :  { %v1170_v57 = vld [vmem:[#allocation3 + $0x38] sm:$0xff] }
0x1e06   :  { %3676 = vmatmul.mubr.msk.bf16.gmra.mrb[36].mxu0 %vm55_vm2, %v1170_v57 }
0x1e07   :  { %3715 = vmatprep.mubr.msk.bf16.mxu0 %vm4253_vm0, %v4252_v1 }
0x1e6e   :  { %v1767_v63 = vpop.permute.xlu1 %1766 }
0x1e6f   :  { %1769 = vst.msk [vmem:[#allocation3 + $0x18] sm:$0xff] %vm55_vm2, %v1767_v63  ;;  %3716 = vmatmul.mubr.msk.bf16.vlgmr.msra.gmra.mrb[40].mxu0 %vm55_vm2, %v1767_v63 }
0x1e70   :  { %3728 = vmatpush3.bf16.msra.mxu0 %v4660_v9  ;;  %3731 = vmatprep.mubr.msk.bf16.mxu0 %vm4253_vm0, %v4252_v1 }
0x1e71   :  { %3729 = vmatprep.subr.bf16.mxu0 %v4252_v1 }
0x1e74   :  { %3730 = vmatpush3.bf16.msra.mxu0 %v4667_v10 }
0x1ed9   :  { %v4847_v0 = vpop.f32.mrb[36].mxu0 }
0x1eda   :  { %v4849_v6 = vpop.f32.mrb[37].mxu0 }
0x1edb   :  { %v4851_v7 = vpop.f32.mrb[38].mxu0 }
0x1edc   :  { %v4853_v4 = vpop.f32.mrb[39].mxu0 }
0x1f42   :  { %v1809_v27 = vpop.f32.mrb[40].mxu0 }
0x1f43   :  { %v1816_v30 = vadd.f32 %v1809_v27, %v1285_v8  ;;  %v3717_v12 = vpop.f32.mrb[41].mxu0 }
0x1f44   :  { %v1812_v62 = vpop.f32.mrb[42].mxu0 }
0x1f45   :  { %4059 = vtanh.f32 %v1816_v30  ;;  %v1817_v13 = vadd.f32 %v1812_v62, %v1288_v11  ;;  %v3718_v14 = vpop.f32.mrb[43].mxu0  ;;  %v3400_v16 = vmul.f32 -1.442695, %v1816_v30 }
0x1f47   :  { %4061 = vtanh.f32 %v1817_v13  ;;  %v3401_v17 = vmul.f32 -1.442695, %v1817_v13 }
0x1f48   :  { %4063 = vpow2.f32 %v3400_v16 }
0x1f49   :  { %4065 = vpow2.f32 %v3401_v17 }
0x1f4f   :  { %v4060_v15 = vpop.eup %4059 }
0x1f50   :  { %1836 = vrot.lane.b32.xlu0 %v4060_v15, %s4255_s30 }
0x1f51   :  { %v4062_v40 = vpop.eup %4061 }
0x1f52   :  { %1838 = vrot.lane.b32.xlu1 %v4062_v40, %s4255_s30  ;;  %v4064_v43 = vpop.eup %4063 }
0x1f53   :  { %v4066_v18 = vpop.eup %4065  ;;  %v1824_v45 = vadd.f32 1.0, %v4064_v43  ;;  %v3847_v43 = vld [vmem:[%s5368_s3] sm:$0xff]  }
0x1f54   :  { %v1825_v20 = vadd.f32 1.0, %v4066_v18  ;;  %3743 = vmatprep.subr.bf16.mxu0 %v3847_v43 }
0x1f55   :  { %4067 = vrcp.f32 %v1824_v45 }
0x1f56   :  { %4069 = vrcp.f32 %v1825_v20 }
0x1f5f   :  { %v4068_v21 = vpop.eup %4067 }
0x1f60   :  { %v4070_v39 = vpop.eup %4069  ;;  %v1832_v25 = vmul.f32 %v4068_v21, %v4819_v46 }
0x1f61   :  { %v1833_v29 = vmul.f32 %v4070_v39, %v4823_v5  ;;  %v1293_v5 = vadd.f32 %v4623_v42, %v4719_v32 }
0x1fc2   :  { %v1837_v22 = vpop.permute.xlu0 %1836 }
0x1fc3   :  { %v1842_v23 = vmul.f32 %v4068_v21, %v1837_v22 }
0x1fc4   :  { %v1839_v24 = vpop.permute.xlu1 %1838 }
0x1fc5   :  { %1846 = vrot.lane.b32.xlu0 %v1842_v23, %s4254_s26  ;;  %v1843_v41 = vmul.f32 %v4070_v39, %v1839_v24  ;;  %v3848_v23 = vld [vmem:[%s5368_s3 + $0x8] sm:$0xff]   ;;  %v2198_v24 = vld [vmem:[#allocation3] sm:$0xff] }
0x1fc7   :  { %1848 = vrot.lane.b32.xlu1 %v1843_v41, %s4254_s26  ;;  %v2199_v41 = vld [vmem:[#allocation3 + $0x8] sm:$0xff] }
0x2037   :  { %v1847_v26 = vpop.permute.xlu0 %1846 }
0x2038   :  { %v1852_v28 = vadd.f32 %v1847_v26, %v1832_v25  ;;  %v2200_v25 = vld [vmem:[#allocation3 + $0x10] sm:$0xff]  ;;  %v2201_v26 = vld [vmem:[#allocation3 + $0x18] sm:$0xff] }
0x2039   :  { %v1849_v31 = vpop.permute.xlu1 %1848 }
0x203a   :  { %4071 = vtanh.f32 %v1852_v28  ;;  %v1853_v59 = vadd.f32 %v1849_v31, %v1833_v29  ;;  %v1301_v31 = vadd.f32 %v4719_v32, %v4849_v6 }
0x203c   :  { %4073 = vtanh.f32 %v1853_v59 }
0x2044   :  { %v4072_v60 = vpop.eup %4071 }
0x2045   :  { %1858 = vrot.lane.b32.xlu0 %v4072_v60, %s4255_s30  ;;  %v1304_v60 = vadd.f32 %v4719_v32, %v4853_v4 }
0x2046   :  { %v4074_v38 = vpop.eup %4073 }
0x2047   :  { %1860 = vrot.lane.b32.xlu1 %v4074_v38, %s4255_s30 }
0x20b7   :  { %v1859_v34 = vpop.permute.xlu0 %1858 }
0x20b8   :  { %v1864_v36 = vmul.f32 %v4068_v21, %v1859_v34 }
0x20b9   :  { %v1861_v58 = vpop.permute.xlu1 %1860 }
0x20ba   :  { %v1865_v3 = vmul.f32 %v4070_v39, %v1861_v58 }
0x20bc   :  { %v1866_v47 = vpack.c.bf16 %v1865_v3, %v1864_v36 }
0x20be   :  { %1868 = vrot.lane.b32.xlu0 %v1866_v47, %s4254_s26 }
0x2130   :  { %v1869_v46 = vpop.permute.xlu0 %1868 }
0x2131   :  { %1871 = vst.msk [vmem:[#allocation3 + $0x20] sm:$0xff] %vm55_vm2, %v1869_v46  ;;  %3724 = vmatmul.mubr.msk.bf16.vlgmr.msra.gmra.mrb[40].mxu1 %vm55_vm2, %v1869_v46 }
0x2132   :  { %3736 = vmatpush3.bf16.msra.mxu1 %v4660_v9  ;;  %3739 = vmatprep.mubr.msk.bf16.mxu1 %vm4253_vm0, %v4252_v1 }
0x2133   :  { %3737 = vmatprep.subr.bf16.mxu1 %v4252_v1 }
0x2136   :  { %3738 = vmatpush3.bf16.msra.mxu1 %v4667_v10 }
0x2137   :  { %3763 = vmatprep.subr.bf16.mxu1 %v4252_v1 }
0x2204   :  { %v1911_v48 = vpop.f32.mrb[40].mxu1 }
0x2205   :  { %v1918_v37 = vadd.f32 %v1911_v48, %v1293_v5  ;;  %v3725_v61 = vpop.f32.mrb[41].mxu1 }
0x2206   :  { %v1914_v2 = vpop.f32.mrb[42].mxu1 }
0x2207   :  { %4075 = vtanh.f32 %v1918_v37  ;;  %v1919_v9 = vadd.f32 %v1914_v2, %v1296_v35  ;;  %v3726_v51 = vpop.f32.mrb[43].mxu1  ;;  %v3403_v53 = vmul.f32 -1.442695, %v1918_v37 }
0x2209   :  { %4077 = vtanh.f32 %v1919_v9  ;;  %v3404_v54 = vmul.f32 -1.442695, %v1919_v9 }
0x220a   :  { %4079 = vpow2.f32 %v3403_v53 }
0x220b   :  { %4081 = vpow2.f32 %v3404_v54 }
0x2211   :  { %v4076_v52 = vpop.eup %4075 }
0x2212   :  { %1938 = vrot.lane.b32.xlu1 %v4076_v52, %s4255_s30 }
0x2213   :  { %v4078_v10 = vpop.eup %4077 }
0x2214   :  { %1940 = vrot.lane.b32.xlu0 %v4078_v10, %s4255_s30  ;;  %v4080_v42 = vpop.eup %4079 }
0x2215   :  { %v4082_v55 = vpop.eup %4081  ;;  %v1926_v44 = vadd.f32 1.0, %v4080_v42 }
0x2216   :  { %v1927_v56 = vadd.f32 1.0, %v4082_v55 }
0x2217   :  { %4083 = vrcp.f32 %v1926_v44 }
0x2218   :  { %4085 = vrcp.f32 %v1927_v56 }
0x2221   :  { %v4084_v57 = vpop.eup %4083 }
0x2222   :  { %v4086_v27 = vpop.eup %4085  ;;  %v1934_v12 = vmul.f32 %v4084_v57, %v1852_v28  ;;  %v2202_v28 = vld [vmem:[#allocation3 + $0x20] sm:$0xff] }
0x2223   :  { %v1935_v14 = vmul.f32 %v4086_v27, %v1853_v59 }
0x2284   :  { %v1939_v63 = vpop.permute.xlu1 %1938 }
0x2285   :  { %v1944_v8 = vmul.f32 %v4084_v57, %v1939_v63 }
0x2286   :  { %v1941_v11 = vpop.permute.xlu0 %1940 }
0x2287   :  { %1948 = vrot.lane.b32.xlu1 %v1944_v8, %s4254_s26  ;;  %v1945_v30 = vmul.f32 %v4086_v27, %v1941_v11 }
0x2289   :  { %1950 = vrot.lane.b32.xlu0 %v1945_v30, %s4254_s26 }
0x22f9   :  { %v1949_v62 = vpop.permute.xlu1 %1948 }
0x22fa   :  { %v4884_v13 = vadd.f32 %v1949_v62, %v1934_v12 }
0x22fb   :  { %v1951_v15 = vpop.permute.xlu0 %1950 }
0x22fc   :  { %4087 = vtanh.f32 %v4884_v13  ;;  %v4887_v40 = vadd.f32 %v1951_v15, %v1935_v14 }
0x22fe   :  { %4089 = vtanh.f32 %v4887_v40 }
0x2306   :  { %v4088_v16 = vpop.eup %4087 }
0x2307   :  { %1960 = vrot.lane.b32.xlu1 %v4088_v16, %s4255_s30 }
0x2308   :  { %v4090_v17 = vpop.eup %4089 }
0x2309   :  { %1962 = vrot.lane.b32.xlu0 %v4090_v17, %s4255_s30 }
0x2379   :  { %v1961_v18 = vpop.permute.xlu1 %1960 }
0x237a   :  { %v1966_v20 = vmul.f32 %v4084_v57, %v1961_v18  ;;  %v4967_v18 = vld [vmem:[%s5369_s6] sm:$0xff]  }
0x237b   :  { %v1963_v45 = vpop.permute.xlu0 %1962 }
0x237c   :  { %v1967_v21 = vmul.f32 %v4086_v27, %v1963_v45  ;;  %v4974_v45 = vld [vmem:[%s5369_s6 + $0x8] sm:$0xff]  }
0x237e   :  { %v1968_v22 = vpack.c.bf16 %v1967_v21, %v1966_v20 }
0x2380   :  { %1970 = vrot.lane.b32.xlu1 %v1968_v22, %s4254_s26 }
0x23f2   :  { %v1971_v39 = vpop.permute.xlu1 %1970 }
0x23f3   :  { %1973 = vst.msk [vmem:[#allocation3 + $0x28] sm:$0xff] %vm55_vm2, %v1971_v39  ;;  %3732 = vmatmul.mubr.msk.bf16.vlgmr.msra.gmra.mrb[44].mxu0 %vm55_vm2, %v1971_v39 }
0x23f4   :  { %3744 = vmatpush3.bf16.msra.mxu0 %v3847_v43  ;;  %3747 = vmatprep.mubr.msk.bf16.mxu0 %vm55_vm2, %v2198_v24 }
0x23f5   :  { %3745 = vmatprep.subr.bf16.mxu0 %v3848_v23 }
0x23f8   :  { %3746 = vmatpush3.bf16.msra.mxu0 %v3848_v23 }
0x23f9   :  { %3795 = vmatprep.subr.bf16.mxu0 %v4252_v1 }
0x23fa   :  { %v2203_v29 = vld [vmem:[#allocation3 + $0x28] sm:$0xff] }
0x23fb   :  { %3748 = vmatmul.mubr.msk.bf16.vlgmr.msra.gmra.mrb[48].mxu0 %vm55_vm2, %v2199_v41 }
0x23fc   :  { %3751 = vmatprep.mubr.msk.bf16.mxu0 %vm55_vm2, %v2200_v25  ;;  %3796 = vmatpush3.bf16.msra.mxu0 %v4967_v18 }
0x23fd   :  { %3797 = vmatprep.subr.bf16.mxu0 %v4252_v1 }
0x2400   :  { %3798 = vmatpush3.bf16.msra.mxu0 %v4974_v45 }
0x2401   :  { %3811 = vmatprep.subr.bf16.mxu0 %v4252_v1 }
0x2403   :  { %3752 = vmatmul.mubr.msk.bf16.gmra.mrb[52].mxu0 %vm55_vm2, %v2201_v26 }
0x2404   :  { %3755 = vmatprep.mubr.msk.bf16.mxu0 %vm55_vm2, %v2202_v28 }
0x240b   :  { %3756 = vmatmul.mubr.msk.bf16.gmra.mrb[56].mxu0 %vm55_vm2, %v2203_v29  ;;  %v66_v29 = vld [vmem:[%s5361_s11 + $0x20] sm:$0xff] }
0x240c   :  { %72 = vst.msk [vmem:[%s5363_s14 + $0x20] sm:$0xff] %vm55_vm2, %v66_v29 }
0x24c6   :  { %v2013_v59 = vpop.f32.mrb[44].mxu0 }
0x24c7   :  { %v2020_v38 = vadd.f32 %v2013_v59, %v1301_v31  ;;  %v3733_v34 = vpop.f32.mrb[45].mxu0  ;;  %v67_v31 = vld [vmem:[%s5361_s11 + $0x28] sm:$0xff]  ;;  %v4251_v59 = vld [vmem:[%s5367_s8] ss:$0 sm:$0xff] }
0x24c8   :  { %v2016_v58 = vpop.f32.mrb[46].mxu0  ;;  %73 = vst.msk [vmem:[%s5363_s14 + $0x28] sm:$0xff] %vm55_vm2, %v67_v31  ;;  %v1312_v34 = vadd.f32 %v4251_v59, %v4851_v7 }
0x24c9   :  { %4091 = vtanh.f32 %v2020_v38  ;;  %v2021_v36 = vadd.f32 %v2016_v58, %v1304_v60  ;;  %v3734_v3 = vpop.f32.mrb[47].mxu0  ;;  %v3406_v10 = vmul.f32 -1.442695, %v2020_v38  ;;  %v1309_v60 = vadd.f32 %v4251_v59, %v4847_v0 }
0x24cb   :  { %4093 = vtanh.f32 %v2021_v36  ;;  %v3407_v53 = vmul.f32 -1.442695, %v2021_v36 }
0x24cc   :  { %4095 = vpow2.f32 %v3406_v10  ;;  %v5027_v10 = vld [vmem:[%s5370_s9] ss:$0 sm:$0xff] }
0x24cd   :  { %4097 = vpow2.f32 %v3407_v53 }
0x24ce   :  { %v4912_v47 = vpop.f32.mrb[48].mxu0 }
0x24cf   :  { %v4914_v46 = vpop.f32.mrb[49].mxu0 }
0x24d0   :  { %v4916_v5 = vpop.f32.mrb[50].mxu0  ;;  %v2288_v53 = vadd.f32 %v5027_v10, %v4914_v46  ;;  %v3429_v46 = vld [vmem:[%s5363_s14 + $0x28] sm:$0xff] }
0x24d1   :  { %v4918_v48 = vpop.f32.mrb[51].mxu0 }
0x24d2   :  { %v2291_v0 = vadd.f32 %v5027_v10, %v4918_v48 }
0x24d3   :  { %v4092_v6 = vpop.eup %4091 }
0x24d4   :  { %2040 = vrot.lane.b32.xlu0 %v4092_v6, %s4255_s30 }
0x24d5   :  { %v4094_v35 = vpop.eup %4093 }
0x24d6   :  { %v4921_v32 = vpop.f32.mrb[52].mxu0  ;;  %2042 = vrot.lane.b32.xlu1 %v4094_v35, %s4255_s30  ;;  %v4096_v54 = vpop.eup %4095 }
0x24d7   :  { %v4924_v4 = vpop.f32.mrb[53].mxu0  ;;  %v4098_v42 = vpop.eup %4097  ;;  %v2028_v55 = vadd.f32 1.0, %v4096_v54 }
0x24d8   :  { %v4926_v37 = vpop.f32.mrb[54].mxu0  ;;  %v2029_v44 = vadd.f32 1.0, %v4098_v42 }
0x24d9   :  { %v4928_v61 = vpop.f32.mrb[55].mxu0  ;;  %4099 = vrcp.f32 %v2028_v55 }
0x24da   :  { %4101 = vrcp.f32 %v2029_v44 }
0x24de   :  { %v4930_v2 = vpop.f32.mrb[56].mxu0 }
0x24df   :  { %v4932_v9 = vpop.f32.mrb[57].mxu0 }
0x24e0   :  { %v4934_v51 = vpop.f32.mrb[58].mxu0 }
0x24e1   :  { %v4936_v52 = vpop.f32.mrb[59].mxu0 }
0x24e3   :  { %v4100_v56 = vpop.eup %4099 }
0x24e4   :  { %v4102_v8 = vpop.eup %4101  ;;  %v2036_v30 = vmul.f32 %v4100_v56, %v4884_v13  ;;  %v53_v13 = vld [vmem:[%s5360_s10 + $0x20] sm:$0xff] }
0x24e5   :  { %v2037_v14 = vmul.f32 %v4102_v8, %v4887_v40  ;;  %v54_v40 = vld [vmem:[%s5360_s10 + $0x28] sm:$0xff]  ;;  %60 = vst.msk [vmem:[%s5362_s13 + $0x20] sm:$0xff] %vm55_vm2, %v53_v13 }
0x24e6   :  { %61 = vst.msk [vmem:[%s5362_s13 + $0x28] sm:$0xff] %vm55_vm2, %v54_v40 }
0x24ec   :  { %v3426_v41 = vld [vmem:[%s5362_s13 + $0x20] sm:$0xff] }
0x24ed   :  { %v3427_v25 = vld [vmem:[%s5362_s13 + $0x28] sm:$0xff] }
0x24ee   :  { %v2378_v26 = vpack.c.bf16 %v3427_v25, %v3426_v41 }
0x2546   :  { %v2041_v57 = vpop.permute.xlu0 %2040 }
0x2547   :  { %v2046_v63 = vmul.f32 %v4100_v56, %v2041_v57 }
0x2548   :  { %v2043_v27 = vpop.permute.xlu1 %2042 }
0x2549   :  { %2050 = vrot.lane.b32.xlu0 %v2046_v63, %s4254_s26  ;;  %v2047_v11 = vmul.f32 %v4102_v8, %v2043_v27  ;;  %v3428_v63 = vld [vmem:[%s5363_s14 + $0x20] sm:$0xff] }
0x254b   :  { %2052 = vrot.lane.b32.xlu1 %v2047_v11, %s4254_s26 }
0x25bb   :  { %v2051_v12 = vpop.permute.xlu0 %2050 }
0x25bc   :  { %v4941_v62 = vadd.f32 %v2051_v12, %v2036_v30 }
0x25bd   :  { %v2053_v15 = vpop.permute.xlu1 %2052 }
0x25be   :  { %4103 = vtanh.f32 %v4941_v62  ;;  %v4945_v16 = vadd.f32 %v2053_v15, %v2037_v14 }
0x25c0   :  { %4105 = vtanh.f32 %v4945_v16 }
0x25c8   :  { %v4104_v17 = vpop.eup %4103 }
0x25c9   :  { %2062 = vrot.lane.b32.xlu0 %v4104_v17, %s4255_s30 }
0x25ca   :  { %v4106_v43 = vpop.eup %4105 }
0x25cb   :  { %2064 = vrot.lane.b32.xlu1 %v4106_v43, %s4255_s30 }
0x263b   :  { %v2063_v20 = vpop.permute.xlu0 %2062 }
0x263c   :  { %v2068_v22 = vmul.f32 %v4100_v56, %v2063_v20 }
0x263d   :  { %v2065_v21 = vpop.permute.xlu1 %2064 }
0x263e   :  { %v2069_v23 = vmul.f32 %v4102_v8, %v2065_v21 }
0x2640   :  { %v2070_v39 = vpack.c.bf16 %v2069_v23, %v2068_v22 }
0x2642   :  { %2072 = vrot.lane.b32.xlu0 %v2070_v39, %s4254_s26 }
0x26b4   :  { %v2073_v24 = vpop.permute.xlu0 %2072 }
0x26b5   :  { %2075 = vst.msk [vmem:[#allocation3 + $0x30] sm:$0xff] %vm55_vm2, %v2073_v24  ;;  %3740 = vmatmul.mubr.msk.bf16.vlgmr.msra.gmra.mrb[44].mxu1 %vm55_vm2, %v2073_v24 }
0x26b6   :  { %3764 = vmatpush3.bf16.msra.mxu1 %v4967_v18  ;;  %3767 = vmatprep.mubr.msk.bf16.mxu1 %vm4253_vm0, %v4252_v1 }
0x26b7   :  { %3765 = vmatprep.subr.bf16.mxu1 %v4252_v1 }
0x26ba   :  { %3766 = vmatpush3.bf16.msra.mxu1 %v4974_v45 }
0x26bb   :  { %3771 = vmatprep.subr.bf16.mxu1 %v4252_v1 }
0x26bc   :  { %v2204_v28 = vld [vmem:[#allocation3 + $0x30] sm:$0xff] }
0x26bd   :  { %3759 = vmatprep.mubr.msk.bf16.mxu0 %vm55_vm2, %v2204_v28  ;;  %3768 = vmatmul.mubr.msk.bf16.vlgmr.msra.gmra.mrb[48].mxu1 %vm55_vm2, %v2378_v26 }
0x26be   :  { %3772 = vmatpush3.bf16.msra.mxu1 %v4967_v18  ;;  %3775 = vmatprep.mubr.msk.bf16.mxu1 %vm4253_vm0, %v4252_v1 }
0x26bf   :  { %3773 = vmatprep.subr.bf16.mxu1 %v4252_v1 }
0x26c2   :  { %3774 = vmatpush3.bf16.msra.mxu1 %v4974_v45 }
0x26c3   :  { %3779 = vmatprep.subr.bf16.mxu1 %v4252_v1 }
0x2788   :  { %v2115_v38 = vpop.f32.mrb[44].mxu1 }
0x2789   :  { %v5020_v58 = vadd.f32 %v2115_v38, %v1309_v60  ;;  %v3741_v36 = vpop.f32.mrb[45].mxu1 }
0x278a   :  { %v2118_v3 = vpop.f32.mrb[46].mxu1 }
0x278b   :  { %v5022_v6 = vadd.f32 %v2118_v3, %v1312_v34  ;;  %v3742_v35 = vpop.f32.mrb[47].mxu1 }
0x2790   :  { %v2428_v54 = vpop.f32.mrb[48].mxu1 }
0x2791   :  { %v2435_v7 = vadd.f32 %v2428_v54, %v2288_v53  ;;  %v3769_v42 = vpop.f32.mrb[49].mxu1  ;;  %v2296_v54 = vadd.f32 %v4912_v47, %v5027_v10 }
0x2792   :  { %v2431_v55 = vpop.f32.mrb[50].mxu1 }
0x2793   :  { %4107 = vtanh.f32 %v2435_v7  ;;  %v2436_v44 = vadd.f32 %v2431_v55, %v2291_v0  ;;  %v3770_v56 = vpop.f32.mrb[51].mxu1  ;;  %v3433_v48 = vmul.f32 -1.442695, %v2435_v7  ;;  %v2299_v7 = vadd.f32 %v4916_v5, %v5027_v10 }
0x2795   :  { %4109 = vtanh.f32 %v2436_v44  ;;  %v3434_v27 = vmul.f32 -1.442695, %v2436_v44 }
0x2796   :  { %4111 = vpow2.f32 %v3433_v48 }
0x2797   :  { %4113 = vpow2.f32 %v3434_v27 }
0x279d   :  { %v4108_v57 = vpop.eup %4107 }
0x279e   :  { %2463 = vrot.lane.b32.xlu1 %v4108_v57, %s4255_s30 }
0x279f   :  { %v4110_v8 = vpop.eup %4109 }
0x27a0   :  { %2465 = vrot.lane.b32.xlu0 %v4110_v8, %s4255_s30  ;;  %v4112_v11 = vpop.eup %4111 }
0x27a1   :  { %v4114_v30 = vpop.eup %4113  ;;  %v2443_v12 = vadd.f32 1.0, %v4112_v11 }
0x27a2   :  { %2453 = vrot.lane.b32.xlu1 %v3428_v63, %s4254_s26  ;;  %v2444_v14 = vadd.f32 1.0, %v4114_v30 }
0x27a3   :  { %4115 = vrcp.f32 %v2443_v12 }
0x27a4   :  { %2455 = vrot.lane.b32.xlu0 %v3429_v46, %s4254_s26  ;;  %4117 = vrcp.f32 %v2444_v14 }
0x27ad   :  { %v4116_v15 = vpop.eup %4115 }
0x27ae   :  { %v4118_v13 = vpop.eup %4117 }
0x2810   :  { %v2464_v17 = vpop.permute.xlu1 %2463 }
0x2811   :  { %v2469_v43 = vmul.f32 %v4116_v15, %v2464_v17 }
0x2812   :  { %v2466_v40 = vpop.permute.xlu0 %2465 }
0x2813   :  { %2473 = vrot.lane.b32.xlu1 %v2469_v43, %s4254_s26  ;;  %v2470_v20 = vmul.f32 %v4118_v13, %v2466_v40 }
0x2814   :  { %v2454_v21 = vpop.permute.xlu1 %2453 }
0x2815   :  { %2475 = vrot.lane.b32.xlu0 %v2470_v20, %s4254_s26  ;;  %v2459_v22 = vmul.f32 %v4116_v15, %v2454_v21 }
0x2816   :  { %v2456_v23 = vpop.permute.xlu0 %2455 }
0x2817   :  { %v2460_v41 = vmul.f32 %v4118_v13, %v2456_v23 }
0x2885   :  { %v2474_v39 = vpop.permute.xlu1 %2473 }
0x2886   :  { %v5045_v24 = vadd.f32 %v2474_v39, %v2459_v22 }
0x2887   :  { %v2476_v25 = vpop.permute.xlu0 %2475 }
0x2888   :  { %4119 = vtanh.f32 %v5045_v24  ;;  %v2480_v26 = vadd.f32 %v2476_v25, %v2460_v41 }
0x288a   :  { %4121 = vtanh.f32 %v2480_v26 }
0x2892   :  { %v4120_v28 = vpop.eup %4119 }
0x2893   :  { %2485 = vrot.lane.b32.xlu1 %v4120_v28, %s4255_s30 }
0x2894   :  { %v4122_v29 = vpop.eup %4121 }
0x2895   :  { %2487 = vrot.lane.b32.xlu0 %v4122_v29, %s4255_s30 }
0x2905   :  { %v2486_v31 = vpop.permute.xlu1 %2485 }
0x2906   :  { %v2491_v60 = vmul.f32 %v4116_v15, %v2486_v31 }
0x2907   :  { %v2488_v59 = vpop.permute.xlu0 %2487 }
0x2908   :  { %v2492_v38 = vmul.f32 %v4118_v13, %v2488_v59 }
0x290a   :  { %v2493_v34 = vpack.c.bf16 %v2492_v38, %v2491_v60 }
0x290c   :  { %2495 = vrot.lane.b32.xlu1 %v2493_v34, %s4254_s26  ;;  %v2304_v34 = vadd.f32 %v5027_v10, %v4924_v4 }
0x297e   :  { %v2496_v36 = vpop.permute.xlu1 %2495 }
0x297f   :  { %2498 = vst.msk [vmem:[#allocation3] sm:$0xff] %vm55_vm2, %v2496_v36  ;;  %3776 = vmatmul.mubr.msk.bf16.vlgmr.msra.gmra.mrb[52].mxu1 %vm55_vm2, %v2496_v36 }
0x2980   :  { %3780 = vmatpush3.bf16.msra.mxu1 %v4967_v18  ;;  %3783 = vmatprep.mubr.msk.bf16.mxu1 %vm4253_vm0, %v4252_v1 }
0x2981   :  { %3781 = vmatprep.subr.bf16.mxu1 %v4252_v1 }
0x2984   :  { %3782 = vmatpush3.bf16.msra.mxu1 %v4974_v45 }
0x2985   :  { %3787 = vmatprep.subr.bf16.mxu1 %v4252_v1 }
0x2986   :  { %v3233_v3 = vld [vmem:[#allocation3] sm:$0xff] }
0x2987   :  { %v3460_v35 = vcombine.low %v3233_v3, %v3233_v3  ;;  %v3461_v53 = vcombine.high %v3233_v3, %v3233_v3  ;;  %v2307_v3 = vadd.f32 %v5027_v10, %v4928_v61 }
0x2989   :  { %3298 = vst.msk [vmem:[%s5371_s12] sm:$0xf] %vm3297_vm3, %v3460_v35  ;;  %3299 = vst.msk [vmem:[%s5371_s12 + $0x4] sm:$0xf] %vm3297_vm3, %v3461_v53 }
0x2a52   :  { %v2538_v0 = vpop.f32.mrb[52].mxu1 }
0x2a53   :  { %v2545_v42 = vadd.f32 %v2538_v0, %v2296_v54  ;;  %v3777_v55 = vpop.f32.mrb[53].mxu1 }
0x2a54   :  { %v2541_v44 = vpop.f32.mrb[54].mxu1 }
0x2a55   :  { %4123 = vtanh.f32 %v2545_v42  ;;  %v2546_v56 = vadd.f32 %v2541_v44, %v2299_v7  ;;  %v3778_v57 = vpop.f32.mrb[55].mxu1  ;;  %v3436_v46 = vmul.f32 -1.442695, %v2545_v42 }
0x2a57   :  { %4125 = vtanh.f32 %v2546_v56  ;;  %v3437_v48 = vmul.f32 -1.442695, %v2546_v56 }
0x2a58   :  { %4127 = vpow2.f32 %v3436_v46 }
0x2a59   :  { %4129 = vpow2.f32 %v3437_v48 }
0x2a5f   :  { %v4124_v63 = vpop.eup %4123 }
0x2a60   :  { %2565 = vrot.lane.b32.xlu0 %v4124_v63, %s4255_s30 }
0x2a61   :  { %v4126_v8 = vpop.eup %4125 }
0x2a62   :  { %2567 = vrot.lane.b32.xlu1 %v4126_v8, %s4255_s30  ;;  %v4128_v47 = vpop.eup %4127 }
0x2a63   :  { %v4130_v27 = vpop.eup %4129  ;;  %v2553_v5 = vadd.f32 1.0, %v4128_v47 }
0x2a64   :  { %v2554_v11 = vadd.f32 1.0, %v4130_v27 }
0x2a65   :  { %4131 = vrcp.f32 %v2553_v5 }
0x2a66   :  { %4133 = vrcp.f32 %v2554_v11 }
0x2a6f   :  { %v4132_v30 = vpop.eup %4131 }
0x2a70   :  { %v4134_v15 = vpop.eup %4133  ;;  %v2561_v13 = vmul.f32 %v4132_v30, %v5045_v24 }
0x2a71   :  { %v2562_v21 = vmul.f32 %v4134_v15, %v2480_v26 }
0x2ad2   :  { %v2566_v12 = vpop.permute.xlu0 %2565 }
0x2ad3   :  { %v2571_v14 = vmul.f32 %v4132_v30, %v2566_v12 }
0x2ad4   :  { %v2568_v17 = vpop.permute.xlu1 %2567 }
0x2ad5   :  { %2575 = vrot.lane.b32.xlu0 %v2571_v14, %s4254_s26  ;;  %v2572_v43 = vmul.f32 %v4134_v15, %v2568_v17 }
0x2ad7   :  { %2577 = vrot.lane.b32.xlu1 %v2572_v43, %s4254_s26 }
0x2b47   :  { %v2576_v40 = vpop.permute.xlu0 %2575 }
0x2b48   :  { %v2581_v20 = vadd.f32 %v2576_v40, %v2561_v13 }
0x2b49   :  { %v2578_v22 = vpop.permute.xlu1 %2577 }
0x2b4a   :  { %4135 = vtanh.f32 %v2581_v20  ;;  %v2582_v23 = vadd.f32 %v2578_v22, %v2562_v21 }
0x2b4c   :  { %4137 = vtanh.f32 %v2582_v23 }
0x2b54   :  { %v4136_v39 = vpop.eup %4135 }
0x2b55   :  { %2587 = vrot.lane.b32.xlu0 %v4136_v39, %s4255_s30 }
0x2b56   :  { %v4138_v41 = vpop.eup %4137 }
0x2b57   :  { %2589 = vrot.lane.b32.xlu1 %v4138_v41, %s4255_s30 }
0x2bc7   :  { %v2588_v25 = vpop.permute.xlu0 %2587 }
0x2bc8   :  { %v2593_v29 = vmul.f32 %v4132_v30, %v2588_v25 }
0x2bc9   :  { %v2590_v28 = vpop.permute.xlu1 %2589 }
0x2bca   :  { %v2594_v31 = vmul.f32 %v4134_v15, %v2590_v28 }
0x2bcc   :  { %v2595_v59 = vpack.c.bf16 %v2594_v31, %v2593_v29 }
0x2bce   :  { %2597 = vrot.lane.b32.xlu0 %v2595_v59, %s4254_s26  ;;  %v3409_v59 = vmul.f32 -1.442695, %v5020_v58 }
0x2c40   :  { %v2598_v24 = vpop.permute.xlu0 %2597 }
0x2c41   :  { %2600 = vst.msk [vmem:[#allocation3 + $0x8] sm:$0xff] %vm55_vm2, %v2598_v24  ;;  %3784 = vmatmul.mubr.msk.bf16.vlgmr.msra.gmra.mrb[56].mxu1 %vm55_vm2, %v2598_v24  ;;  %v3410_v24 = vmul.f32 -1.442695, %v5022_v6 }
0x2c42   :  { %3788 = vmatpush3.bf16.msra.mxu1 %v4967_v18  ;;  %3791 = vmatprep.mubr.msk.bf16.mxu1 %vm4253_vm0, %v4252_v1 }
0x2c43   :  { %3789 = vmatprep.subr.bf16.mxu1 %v4252_v1 }
0x2c46   :  { %3790 = vmatpush3.bf16.msra.mxu1 %v4974_v45 }
0x2c47   :  { %3803 = vmatprep.subr.bf16.mxu1 %v4252_v1 }
0x2c48   :  { %v3234_v26 = vld [vmem:[#allocation3 + $0x8] sm:$0xff] }
0x2c49   :  { %v3462_v60 = vcombine.low %v3234_v26, %v3234_v26  ;;  %v3463_v38 = vcombine.high %v3234_v26, %v3234_v26 }
0x2c4b   :  { %3300 = vst.msk [vmem:[%s5371_s12 + $0x8] sm:$0xf] %vm3297_vm3, %v3462_v60  ;;  %3301 = vst.msk [vmem:[%s5371_s12 + $0xc] sm:$0xf] %vm3297_vm3, %v3463_v38  ;;  %v2312_v60 = vadd.f32 %v4921_v32, %v5027_v10 }
0x2d14   :  { %v2640_v36 = vpop.f32.mrb[56].mxu1 }
0x2d15   :  { %v2647_v35 = vadd.f32 %v2640_v36, %v2304_v34  ;;  %v3785_v53 = vpop.f32.mrb[57].mxu1  ;;  %v2315_v36 = vadd.f32 %v4926_v37, %v5027_v10 }
0x2d16   :  { %v2643_v54 = vpop.f32.mrb[58].mxu1 }
0x2d17   :  { %4139 = vtanh.f32 %v2647_v35  ;;  %v2648_v0 = vadd.f32 %v2643_v54, %v2307_v3  ;;  %v3786_v7 = vpop.f32.mrb[59].mxu1  ;;  %v3439_v44 = vmul.f32 -1.442695, %v2647_v35 }
0x2d19   :  { %4141 = vtanh.f32 %v2648_v0  ;;  %v3440_v56 = vmul.f32 -1.442695, %v2648_v0 }
0x2d1a   :  { %4143 = vpow2.f32 %v3439_v44 }
0x2d1b   :  { %4145 = vpow2.f32 %v3440_v56 }
0x2d21   :  { %v4140_v42 = vpop.eup %4139 }
0x2d22   :  { %2667 = vrot.lane.b32.xlu1 %v4140_v42, %s4255_s30 }
0x2d23   :  { %v4142_v55 = vpop.eup %4141 }
0x2d24   :  { %2669 = vrot.lane.b32.xlu0 %v4142_v55, %s4255_s30  ;;  %v4144_v4 = vpop.eup %4143 }
0x2d25   :  { %v4146_v57 = vpop.eup %4145  ;;  %v2655_v61 = vadd.f32 1.0, %v4144_v4 }
0x2d26   :  { %v2656_v63 = vadd.f32 1.0, %v4146_v57 }
0x2d27   :  { %4147 = vrcp.f32 %v2655_v61 }
0x2d28   :  { %4149 = vrcp.f32 %v2656_v63 }
0x2d31   :  { %v4148_v8 = vpop.eup %4147 }
0x2d32   :  { %v4150_v47 = vpop.eup %4149  ;;  %v2663_v11 = vmul.f32 %v4148_v8, %v2581_v20 }
0x2d33   :  { %v2664_v14 = vmul.f32 %v4150_v47, %v2582_v23 }
0x2d94   :  { %v2668_v46 = vpop.permute.xlu1 %2667 }
0x2d95   :  { %v2673_v48 = vmul.f32 %v4148_v8, %v2668_v46 }
0x2d96   :  { %v2670_v27 = vpop.permute.xlu0 %2669 }
0x2d97   :  { %2677 = vrot.lane.b32.xlu1 %v2673_v48, %s4254_s26  ;;  %v2674_v5 = vmul.f32 %v4150_v47, %v2670_v27 }
0x2d99   :  { %2679 = vrot.lane.b32.xlu0 %v2674_v5, %s4254_s26 }
0x2e09   :  { %v2678_v30 = vpop.permute.xlu1 %2677 }
0x2e0a   :  { %v5103_v12 = vadd.f32 %v2678_v30, %v2663_v11 }
0x2e0b   :  { %v2680_v15 = vpop.permute.xlu0 %2679 }
0x2e0c   :  { %4151 = vtanh.f32 %v5103_v12  ;;  %v5106_v17 = vadd.f32 %v2680_v15, %v2664_v14 }
0x2e0e   :  { %4153 = vtanh.f32 %v5106_v17 }
0x2e0f   :  { %4155 = vtanh.f32 %v5020_v58 }
0x2e10   :  { %4157 = vtanh.f32 %v5022_v6 }
0x2e11   :  { %4159 = vpow2.f32 %v3409_v59 }
0x2e12   :  { %4161 = vpow2.f32 %v3410_v24 }
0x2e16   :  { %v4152_v43 = vpop.eup %4151 }
0x2e17   :  { %2689 = vrot.lane.b32.xlu1 %v4152_v43, %s4255_s30 }
0x2e18   :  { %v4154_v13 = vpop.eup %4153 }
0x2e19   :  { %2691 = vrot.lane.b32.xlu0 %v4154_v13, %s4255_s30  ;;  %v4156_v40 = vpop.eup %4155 }
0x2e1a   :  { %v4158_v41 = vpop.eup %4157 }
0x2e1b   :  { %v4160_v26 = vpop.eup %4159 }
0x2e1c   :  { %v4162_v34 = vpop.eup %4161  ;;  %v2130_v3 = vadd.f32 1.0, %v4160_v26 }
0x2e1d   :  { %2142 = vrot.lane.b32.xlu0 %v4156_v40, %s4255_s30  ;;  %v2131_v7 = vadd.f32 1.0, %v4162_v34 }
0x2e89   :  { %v2690_v20 = vpop.permute.xlu1 %2689 }
0x2e8a   :  { %v2695_v22 = vmul.f32 %v4148_v8, %v2690_v20 }
0x2e8b   :  { %v2692_v21 = vpop.permute.xlu0 %2691 }
0x2e8c   :  { %v2696_v23 = vmul.f32 %v4150_v47, %v2692_v21 }
0x2e8e   :  { %v2697_v39 = vpack.c.bf16 %v2696_v23, %v2695_v22 }
0x2e8f   :  { %v2143_v42 = vpop.permute.xlu0 %2142 }
0x2e90   :  { %2699 = vrot.lane.b32.xlu1 %v2697_v39, %s4254_s26 }
0x2e94   :  { %2144 = vrot.lane.b32.xlu1 %v4158_v41, %s4255_s30 }
0x2f02   :  { %v2700_v25 = vpop.permute.xlu1 %2699 }
0x2f03   :  { %2702 = vst.msk [vmem:[#allocation3 + $0x10] sm:$0xff] %vm55_vm2, %v2700_v25  ;;  %3792 = vmatmul.mubr.msk.bf16.vlgmr.msra.gmra.mrb[60].mxu1 %vm55_vm2, %v2700_v25 }
0x2f04   :  { %3804 = vmatpush3.bf16.msra.mxu1 %v4967_v18  ;;  %3807 = vmatprep.mubr.msk.bf16.mxu1 %vm4253_vm0, %v4252_v1 }
0x2f05   :  { %3805 = vmatprep.subr.bf16.mxu1 %v4252_v1 }
0x2f06   :  { %v2145_v56 = vpop.permute.xlu1 %2144 }
0x2f08   :  { %3806 = vmatpush3.bf16.msra.mxu1 %v4974_v45 }
0x2f09   :  { %3819 = vmatprep.subr.bf16.mxu1 %v4252_v1 }
0x2f0a   :  { %v3235_v28 = vld [vmem:[#allocation3 + $0x10] sm:$0xff] }
0x2f0b   :  { %v3464_v29 = vcombine.low %v3235_v28, %v3235_v28  ;;  %v3465_v31 = vcombine.high %v3235_v28, %v3235_v28 }
0x2f0d   :  { %3302 = vst.msk [vmem:[%s5371_s12 + $0x10] sm:$0xf] %vm3297_vm3, %v3464_v29  ;;  %3303 = vst.msk [vmem:[%s5371_s12 + $0x14] sm:$0xf] %vm3297_vm3, %v3465_v31 }
0x2fd6   :  { %v2742_v38 = vpop.f32.mrb[60].mxu1 }
0x2fd7   :  { %v2749_v35 = vadd.f32 %v2742_v38, %v2312_v60  ;;  %v3793_v53 = vpop.f32.mrb[61].mxu1 }
0x2fd8   :  { %v2745_v54 = vpop.f32.mrb[62].mxu1 }
0x2fd9   :  { %4163 = vtanh.f32 %v2749_v35  ;;  %v2750_v0 = vadd.f32 %v2745_v54, %v2315_v36  ;;  %v3794_v58 = vpop.f32.mrb[63].mxu1  ;;  %v3442_v57 = vmul.f32 -1.442695, %v2749_v35 }
0x2fda   :  { %4165 = vrcp.f32 %v2130_v3 }
0x2fdb   :  { %4167 = vtanh.f32 %v2750_v0  ;;  %v3443_v61 = vmul.f32 -1.442695, %v2750_v0 }
0x2fdc   :  { %4169 = vrcp.f32 %v2131_v7 }
0x2fdd   :  { %4171 = vpow2.f32 %v3442_v57 }
0x2fde   :  { %4173 = vpow2.f32 %v3443_v61 }
0x2fe3   :  { %v4164_v6 = vpop.eup %4163 }
0x2fe4   :  { %2769 = vrot.lane.b32.xlu0 %v4164_v6, %s4255_s30  ;;  %v4166_v32 = vpop.eup %4165 }
0x2fe5   :  { %v4168_v55 = vpop.eup %4167  ;;  %v2148_v44 = vmul.f32 %v4166_v32, %v2143_v42  ;;  %v2138_v14 = vmul.f32 %v4166_v32, %v4941_v62 }
0x2fe6   :  { %2771 = vrot.lane.b32.xlu1 %v4168_v55, %s4255_s30  ;;  %v4170_v37 = vpop.eup %4169 }
0x2fe7   :  { %v2149_v4 = vmul.f32 %v4170_v37, %v2145_v56  ;;  %v4172_v63 = vpop.eup %4171  ;;  %v2139_v40 = vmul.f32 %v4170_v37, %v4945_v16 }
0x2fe8   :  { %2152 = vrot.lane.b32.xlu0 %v2148_v44, %s4254_s26  ;;  %v4174_v8 = vpop.eup %4173  ;;  %v2757_v46 = vadd.f32 1.0, %v4172_v63  ;;  %v2320_v44 = vadd.f32 %v5027_v10, %v4932_v9 }
0x2fe9   :  { %v2758_v48 = vadd.f32 1.0, %v4174_v8 }
0x2fea   :  { %2154 = vrot.lane.b32.xlu1 %v2149_v4, %s4254_s26  ;;  %4175 = vrcp.f32 %v2757_v46 }
0x2feb   :  { %4177 = vrcp.f32 %v2758_v48 }
0x2ff4   :  { %v4176_v47 = vpop.eup %4175 }
0x2ff5   :  { %v4178_v11 = vpop.eup %4177  ;;  %v2765_v62 = vmul.f32 %v4176_v47, %v5103_v12 }
0x2ff6   :  { %v2766_v16 = vmul.f32 %v4178_v11, %v5106_v17 }
0x3056   :  { %v2770_v27 = vpop.permute.xlu0 %2769 }
0x3057   :  { %v2775_v5 = vmul.f32 %v4176_v47, %v2770_v27 }
0x3058   :  { %v2772_v30 = vpop.permute.xlu1 %2771 }
0x3059   :  { %2779 = vrot.lane.b32.xlu0 %v2775_v5, %s4254_s26  ;;  %v2776_v15 = vmul.f32 %v4178_v11, %v2772_v30 }
0x305a   :  { %v2153_v43 = vpop.permute.xlu0 %2152 }
0x305b   :  { %v5144_v13 = vadd.f32 %v2153_v43, %v2138_v14  ;;  %2781 = vrot.lane.b32.xlu1 %v2776_v15, %s4254_s26 }
0x305c   :  { %v2155_v20 = vpop.permute.xlu1 %2154 }
0x305d   :  { %4179 = vtanh.f32 %v5144_v13  ;;  %v5149_v21 = vadd.f32 %v2155_v20, %v2139_v40 }
0x305f   :  { %4181 = vtanh.f32 %v5149_v21 }
0x3067   :  { %v4180_v22 = vpop.eup %4179 }
0x3068   :  { %2164 = vrot.lane.b32.xlu0 %v4180_v22, %s4255_s30 }
0x3069   :  { %v4182_v23 = vpop.eup %4181 }
0x306a   :  { %2166 = vrot.lane.b32.xlu1 %v4182_v23, %s4255_s30 }
0x30cb   :  { %v2780_v39 = vpop.permute.xlu0 %2779 }
0x30cc   :  { %v5155_v41 = vadd.f32 %v2780_v39, %v2765_v62 }
0x30cd   :  { %v2782_v25 = vpop.permute.xlu1 %2781 }
0x30ce   :  { %4183 = vtanh.f32 %v5155_v41  ;;  %v5159_v28 = vadd.f32 %v2782_v25, %v2766_v16 }
0x30d0   :  { %4185 = vtanh.f32 %v5159_v28 }
0x30d8   :  { %v4184_v29 = vpop.eup %4183 }
0x30d9   :  { %2791 = vrot.lane.b32.xlu0 %v4184_v29, %s4255_s30 }
0x30da   :  { %v4186_v31 = vpop.eup %4185  ;;  %v2165_v59 = vpop.permute.xlu0 %2164 }
0x30db   :  { %2793 = vrot.lane.b32.xlu1 %v4186_v31, %s4255_s30  ;;  %v5164_v24 = vmul.f32 %v4166_v32, %v2165_v59 }
0x30dc   :  { %v2167_v12 = vpop.permute.xlu1 %2166 }
0x30dd   :  { %v5166_v26 = vmul.f32 %v4170_v37, %v2167_v12  ;;  %v2323_v37 = vadd.f32 %v5027_v10, %v4936_v52 }
0x30df   :  { %v2172_v17 = vpack.c.bf16 %v5166_v26, %v5164_v24 }
0x30e1   :  { %2174 = vrot.lane.b32.xlu0 %v2172_v17, %s4254_s26 }
0x314b   :  { %v2792_v60 = vpop.permute.xlu0 %2791 }
0x314c   :  { %v2797_v34 = vmul.f32 %v4176_v47, %v2792_v60 }
0x314d   :  { %v2794_v38 = vpop.permute.xlu1 %2793 }
0x314e   :  { %v2798_v36 = vmul.f32 %v4178_v11, %v2794_v38 }
0x3150   :  { %v2799_v3 = vpack.c.bf16 %v2798_v36, %v2797_v34 }
0x3152   :  { %2801 = vrot.lane.b32.xlu1 %v2799_v3, %s4254_s26 }
0x3153   :  { %v2175_v35 = vpop.permute.xlu0 %2174 }
0x3154   :  { %2177 = vst.msk [vmem:[#allocation3 + $0x38] sm:$0xff] %vm55_vm2, %v2175_v35 }
0x315b   :  { %v2205_v53 = vld [vmem:[#allocation3 + $0x38] sm:$0xff] }
0x315c   :  { %3760 = vmatmul.mubr.msk.bf16.gmra.mrb[60].mxu0 %vm55_vm2, %v2205_v53 }
0x315d   :  { %3799 = vmatprep.mubr.msk.bf16.mxu0 %vm4253_vm0, %v4252_v1 }
0x31c4   :  { %v2802_v54 = vpop.permute.xlu1 %2801 }
0x31c5   :  { %2804 = vst.msk [vmem:[#allocation3 + $0x18] sm:$0xff] %vm55_vm2, %v2802_v54  ;;  %3800 = vmatmul.mubr.msk.bf16.vlgmr.msra.gmra.mrb[64].mxu0 %vm55_vm2, %v2802_v54 }
0x31c6   :  { %3812 = vmatpush3.bf16.msra.mxu0 %v4967_v18  ;;  %3815 = vmatprep.mubr.msk.bf16.mxu0 %vm4253_vm0, %v4252_v1 }
0x31c7   :  { %3813 = vmatprep.subr.bf16.mxu0 %v4252_v1 }
0x31ca   :  { %3814 = vmatpush3.bf16.msra.mxu0 %v4974_v45 }
0x31cc   :  { %v3236_v0 = vld [vmem:[#allocation3 + $0x18] sm:$0xff] }
0x31cd   :  { %v3466_v58 = vcombine.low %v3236_v0, %v3236_v0  ;;  %v3467_v7 = vcombine.high %v3236_v0, %v3236_v0 }
0x31cf   :  { %3304 = vst.msk [vmem:[%s5371_s12 + $0x18] sm:$0xf] %vm3297_vm3, %v3466_v58  ;;  %3305 = vst.msk [vmem:[%s5371_s12 + $0x1c] sm:$0xf] %vm3297_vm3, %v3467_v7 }
0x322f   :  { %v5191_v6 = vpop.f32.mrb[60].mxu0 }
0x3230   :  { %v5193_v42 = vpop.f32.mrb[61].mxu0 }
0x3231   :  { %v5195_v32 = vpop.f32.mrb[62].mxu0 }
0x3232   :  { %v5197_v55 = vpop.f32.mrb[63].mxu0 }
0x3298   :  { %v2844_v56 = vpop.f32.mrb[64].mxu0 }
0x3299   :  { %v2851_v4 = vadd.f32 %v2844_v56, %v2320_v44  ;;  %v3801_v57 = vpop.f32.mrb[65].mxu0 }
0x329a   :  { %v2847_v61 = vpop.f32.mrb[66].mxu0 }
0x329b   :  { %4187 = vtanh.f32 %v2851_v4  ;;  %v2852_v63 = vadd.f32 %v2847_v61, %v2323_v37  ;;  %v3802_v8 = vpop.f32.mrb[67].mxu0  ;;  %v3445_v47 = vmul.f32 -1.442695, %v2851_v4 }
0x329d   :  { %4189 = vtanh.f32 %v2852_v63  ;;  %v3446_v27 = vmul.f32 -1.442695, %v2852_v63 }
0x329e   :  { %4191 = vpow2.f32 %v3445_v47 }
0x329f   :  { %4193 = vpow2.f32 %v3446_v27 }
0x32a5   :  { %v4188_v46 = vpop.eup %4187 }
0x32a6   :  { %2871 = vrot.lane.b32.xlu0 %v4188_v46, %s4255_s30 }
0x32a7   :  { %v4190_v48 = vpop.eup %4189 }
0x32a8   :  { %2873 = vrot.lane.b32.xlu1 %v4190_v48, %s4255_s30  ;;  %v4192_v9 = vpop.eup %4191 }
0x32a9   :  { %v4194_v5 = vpop.eup %4193  ;;  %v2859_v52 = vadd.f32 1.0, %v4192_v9 }
0x32aa   :  { %v2860_v11 = vadd.f32 1.0, %v4194_v5 }
0x32ab   :  { %4195 = vrcp.f32 %v2859_v52 }
0x32ac   :  { %4197 = vrcp.f32 %v2860_v11 }
0x32b5   :  { %v4196_v30 = vpop.eup %4195 }
0x32b6   :  { %v4198_v43 = vpop.eup %4197  ;;  %v2867_v22 = vmul.f32 %v4196_v30, %v5155_v41 }
0x32b7   :  { %v2868_v39 = vmul.f32 %v4198_v43, %v5159_v28 }
0x3318   :  { %v2872_v14 = vpop.permute.xlu0 %2871 }
0x3319   :  { %v2877_v15 = vmul.f32 %v4196_v30, %v2872_v14 }
0x331a   :  { %v2874_v40 = vpop.permute.xlu1 %2873 }
0x331b   :  { %2881 = vrot.lane.b32.xlu0 %v2877_v15, %s4254_s26  ;;  %v2878_v20 = vmul.f32 %v4198_v43, %v2874_v40 }
0x331d   :  { %2883 = vrot.lane.b32.xlu1 %v2878_v20, %s4254_s26 }
0x338d   :  { %v2882_v23 = vpop.permute.xlu0 %2881 }
0x338e   :  { %v2887_v62 = vadd.f32 %v2882_v23, %v2867_v22 }
0x338f   :  { %v2884_v16 = vpop.permute.xlu1 %2883 }
0x3390   :  { %4199 = vtanh.f32 %v2887_v62  ;;  %v2888_v25 = vadd.f32 %v2884_v16, %v2868_v39 }
0x3392   :  { %4201 = vtanh.f32 %v2888_v25 }
0x339a   :  { %v4200_v29 = vpop.eup %4199 }
0x339b   :  { %2893 = vrot.lane.b32.xlu0 %v4200_v29, %s4255_s30 }
0x339c   :  { %v4202_v31 = vpop.eup %4201 }
0x339d   :  { %2895 = vrot.lane.b32.xlu1 %v4202_v31, %s4255_s30  ;;  %v2339_v31 = vadd.f32 %v5027_v10, %v5197_v55 }
0x340d   :  { %v2894_v59 = vpop.permute.xlu0 %2893 }
0x340e   :  { %v2899_v17 = vmul.f32 %v4196_v30, %v2894_v59 }
0x340f   :  { %v2896_v12 = vpop.permute.xlu1 %2895 }
0x3410   :  { %v2900_v60 = vmul.f32 %v4198_v43, %v2896_v12 }
0x3412   :  { %v2901_v38 = vpack.c.bf16 %v2900_v60, %v2899_v17 }
0x3414   :  { %2903 = vrot.lane.b32.xlu0 %v2901_v38, %s4254_s26 }
0x3486   :  { %v2904_v41 = vpop.permute.xlu0 %2903 }
0x3487   :  { %2906 = vst.msk [vmem:[#allocation3 + $0x20] sm:$0xff] %vm55_vm2, %v2904_v41  ;;  %3808 = vmatmul.mubr.msk.bf16.vlgmr.msra.gmra.mrb[64].mxu1 %vm55_vm2, %v2904_v41 }
0x3488   :  { %3820 = vmatpush3.bf16.msra.mxu1 %v4967_v18  ;;  %3823 = vmatprep.mubr.msk.bf16.mxu1 %vm4253_vm0, %v4252_v1  ;;  %v2328_v18 = vadd.f32 %v4930_v2, %v5027_v10 }
0x3489   :  { %3821 = vmatprep.subr.bf16.mxu1 %v4252_v1  ;;  %v2331_v1 = vadd.f32 %v4934_v51, %v5027_v10 }
0x348c   :  { %3822 = vmatpush3.bf16.msra.mxu1 %v4974_v45 }
0x348e   :  { %v3237_v28 = vld [vmem:[#allocation3 + $0x20] sm:$0xff] }
0x348f   :  { %v3468_v34 = vcombine.low %v3237_v28, %v3237_v28  ;;  %v3469_v36 = vcombine.high %v3237_v28, %v3237_v28 }
0x3491   :  { %3306 = vst.msk [vmem:[%s5371_s12 + $0x20] sm:$0xf] %vm3297_vm3, %v3468_v34  ;;  %3307 = vst.msk [vmem:[%s5371_s12 + $0x24] sm:$0xf] %vm3297_vm3, %v3469_v36 }
0x355a   :  { %v2946_v3 = vpop.f32.mrb[64].mxu1 }
0x355b   :  { %v2953_v45 = vadd.f32 %v2946_v3, %v2328_v18  ;;  %v3809_v35 = vpop.f32.mrb[65].mxu1 }
0x355c   :  { %v2949_v53 = vpop.f32.mrb[66].mxu1 }
0x355d   :  { %4203 = vtanh.f32 %v2953_v45  ;;  %v2954_v54 = vadd.f32 %v2949_v53, %v2331_v1  ;;  %v3810_v0 = vpop.f32.mrb[67].mxu1  ;;  %v3448_v44 = vmul.f32 -1.442695, %v2953_v45 }
0x355f   :  { %4205 = vtanh.f32 %v2954_v54  ;;  %v3449_v56 = vmul.f32 -1.442695, %v2954_v54 }
0x3560   :  { %4207 = vpow2.f32 %v3448_v44 }
0x3561   :  { %4209 = vpow2.f32 %v3449_v56 }
0x3567   :  { %v4204_v58 = vpop.eup %4203 }
0x3568   :  { %2973 = vrot.lane.b32.xlu1 %v4204_v58, %s4255_s30 }
0x3569   :  { %v4206_v7 = vpop.eup %4205 }
0x356a   :  { %2975 = vrot.lane.b32.xlu0 %v4206_v7, %s4255_s30  ;;  %v4208_v2 = vpop.eup %4207 }
0x356b   :  { %v4210_v37 = vpop.eup %4209  ;;  %v2961_v51 = vadd.f32 1.0, %v4208_v2 }
0x356c   :  { %v2962_v4 = vadd.f32 1.0, %v4210_v37 }
0x356d   :  { %4211 = vrcp.f32 %v2961_v51 }
0x356e   :  { %4213 = vrcp.f32 %v2962_v4 }
0x3577   :  { %v4212_v57 = vpop.eup %4211 }
0x3578   :  { %v4214_v8 = vpop.eup %4213  ;;  %v2969_v47 = vmul.f32 %v4212_v57, %v2887_v62 }
0x3579   :  { %v2970_v5 = vmul.f32 %v4214_v8, %v2888_v25  ;;  %v2336_v25 = vadd.f32 %v5027_v10, %v5193_v42 }
0x35da   :  { %v2974_v61 = vpop.permute.xlu1 %2973 }
0x35db   :  { %v2979_v63 = vmul.f32 %v4212_v57, %v2974_v61 }
0x35dc   :  { %v2976_v46 = vpop.permute.xlu0 %2975 }
0x35dd   :  { %2983 = vrot.lane.b32.xlu1 %v2979_v63, %s4254_s26  ;;  %v2980_v48 = vmul.f32 %v4214_v8, %v2976_v46 }
0x35df   :  { %2985 = vrot.lane.b32.xlu0 %v2980_v48, %s4254_s26 }
0x364f   :  { %v2984_v27 = vpop.permute.xlu1 %2983 }
0x3650   :  { %v2989_v9 = vadd.f32 %v2984_v27, %v2969_v47 }
0x3651   :  { %v2986_v52 = vpop.permute.xlu0 %2985 }
0x3652   :  { %4215 = vtanh.f32 %v2989_v9  ;;  %v2990_v11 = vadd.f32 %v2986_v52, %v2970_v5  ;;  %v2344_v5 = vadd.f32 %v5191_v6, %v5027_v10 }
0x3654   :  { %4217 = vtanh.f32 %v2990_v11 }
0x365c   :  { %v4216_v30 = vpop.eup %4215 }
0x365d   :  { %2995 = vrot.lane.b32.xlu1 %v4216_v30, %s4255_s30 }
0x365e   :  { %v4218_v14 = vpop.eup %4217 }
0x365f   :  { %2997 = vrot.lane.b32.xlu0 %v4218_v14, %s4255_s30 }
0x36cf   :  { %v2996_v15 = vpop.permute.xlu1 %2995 }
0x36d0   :  { %v3001_v40 = vmul.f32 %v4212_v57, %v2996_v15 }
0x36d1   :  { %v2998_v43 = vpop.permute.xlu0 %2997 }
0x36d2   :  { %v3002_v20 = vmul.f32 %v4214_v8, %v2998_v43 }
0x36d4   :  { %v3003_v22 = vpack.c.bf16 %v3002_v20, %v3001_v40 }
0x36d6   :  { %3005 = vrot.lane.b32.xlu1 %v3003_v22, %s4254_s26 }
0x3748   :  { %v3006_v23 = vpop.permute.xlu1 %3005 }
0x3749   :  { %3008 = vst.msk [vmem:[#allocation3 + $0x28] sm:$0xff] %vm55_vm2, %v3006_v23  ;;  %3816 = vmatmul.mubr.msk.bf16.vlgmr.msra.gmra.mrb[68].mxu0 %vm55_vm2, %v3006_v23 }
0x3750   :  { %v3238_v62 = vld [vmem:[#allocation3 + $0x28] sm:$0xff] }
0x3751   :  { %v3470_v39 = vcombine.low %v3238_v62, %v3238_v62  ;;  %v3471_v16 = vcombine.high %v3238_v62, %v3238_v62 }
0x3753   :  { %3308 = vst.msk [vmem:[%s5371_s12 + $0x28] sm:$0xf] %vm3297_vm3, %v3470_v39  ;;  %3309 = vst.msk [vmem:[%s5371_s12 + $0x2c] sm:$0xf] %vm3297_vm3, %v3471_v16 }
0x381c   :  { %v3048_v29 = vpop.f32.mrb[68].mxu0 }
0x381d   :  { %v3055_v59 = vadd.f32 %v3048_v29, %v2336_v25  ;;  %v3817_v12 = vpop.f32.mrb[69].mxu0 }
0x381e   :  { %v3051_v17 = vpop.f32.mrb[70].mxu0 }
0x381f   :  { %4219 = vtanh.f32 %v3055_v59  ;;  %v3056_v60 = vadd.f32 %v3051_v17, %v2339_v31  ;;  %v3818_v38 = vpop.f32.mrb[71].mxu0  ;;  %v3451_v34 = vmul.f32 -1.442695, %v3055_v59 }
0x3821   :  { %4221 = vtanh.f32 %v3056_v60  ;;  %v3452_v36 = vmul.f32 -1.442695, %v3056_v60 }
0x3822   :  { %4223 = vpow2.f32 %v3451_v34 }
0x3823   :  { %4225 = vpow2.f32 %v3452_v36 }
0x3829   :  { %v4220_v41 = vpop.eup %4219 }
0x382a   :  { %3075 = vrot.lane.b32.xlu0 %v4220_v41, %s4255_s30 }
0x382b   :  { %v4222_v28 = vpop.eup %4221 }
0x382c   :  { %3077 = vrot.lane.b32.xlu1 %v4222_v28, %s4255_s30  ;;  %v4224_v42 = vpop.eup %4223 }
0x382d   :  { %v4226_v18 = vpop.eup %4225  ;;  %v3063_v55 = vadd.f32 1.0, %v4224_v42 }
0x382e   :  { %v3064_v3 = vadd.f32 1.0, %v4226_v18 }
0x382f   :  { %4227 = vrcp.f32 %v3063_v55 }
0x3830   :  { %4229 = vrcp.f32 %v3064_v3 }
0x3839   :  { %v4228_v1 = vpop.eup %4227 }
0x383a   :  { %v4230_v53 = vpop.eup %4229  ;;  %v3071_v58 = vmul.f32 %v4228_v1, %v2989_v9 }
0x383b   :  { %v3072_v56 = vmul.f32 %v4230_v53, %v2990_v11  ;;  %v2347_v11 = vadd.f32 %v5195_v32, %v5027_v10 }
0x389c   :  { %v3076_v45 = vpop.permute.xlu0 %3075 }
0x389d   :  { %v3081_v35 = vmul.f32 %v4228_v1, %v3076_v45 }
0x389e   :  { %v3078_v54 = vpop.permute.xlu1 %3077 }
0x389f   :  { %3085 = vrot.lane.b32.xlu0 %v3081_v35, %s4254_s26  ;;  %v3082_v0 = vmul.f32 %v4230_v53, %v3078_v54 }
0x38a1   :  { %3087 = vrot.lane.b32.xlu1 %v3082_v0, %s4254_s26 }
0x3911   :  { %v3086_v7 = vpop.permute.xlu0 %3085 }
0x3912   :  { %v3091_v44 = vadd.f32 %v3086_v7, %v3071_v58 }
0x3913   :  { %v3088_v2 = vpop.permute.xlu1 %3087 }
0x3914   :  { %4231 = vtanh.f32 %v3091_v44  ;;  %v3092_v37 = vadd.f32 %v3088_v2, %v3072_v56 }
0x3916   :  { %4233 = vtanh.f32 %v3092_v37 }
0x391e   :  { %v4232_v51 = vpop.eup %4231 }
0x391f   :  { %3097 = vrot.lane.b32.xlu0 %v4232_v51, %s4255_s30 }
0x3920   :  { %v4234_v4 = vpop.eup %4233 }
0x3921   :  { %3099 = vrot.lane.b32.xlu1 %v4234_v4, %s4255_s30 }
0x3991   :  { %v3098_v57 = vpop.permute.xlu0 %3097 }
0x3992   :  { %v3103_v63 = vmul.f32 %v4228_v1, %v3098_v57 }
0x3993   :  { %v3100_v61 = vpop.permute.xlu1 %3099 }
0x3994   :  { %v3104_v8 = vmul.f32 %v4230_v53, %v3100_v61 }
0x3996   :  { %v3105_v46 = vpack.c.bf16 %v3104_v8, %v3103_v63 }
0x3998   :  { %3107 = vrot.lane.b32.xlu0 %v3105_v46, %s4254_s26 }
0x3a0a   :  { %v3108_v48 = vpop.permute.xlu0 %3107 }
0x3a0b   :  { %3110 = vst.msk [vmem:[#allocation3 + $0x30] sm:$0xff] %vm55_vm2, %v3108_v48  ;;  %3824 = vmatmul.mubr.msk.bf16.vlgmr.msra.gmra.mrb[68].mxu1 %vm55_vm2, %v3108_v48 }
0x3a12   :  { %v3239_v47 = vld [vmem:[#allocation3 + $0x30] sm:$0xff] }
0x3a13   :  { %v3472_v27 = vcombine.low %v3239_v47, %v3239_v47  ;;  %v3473_v9 = vcombine.high %v3239_v47, %v3239_v47 }
0x3a15   :  { %3310 = vst.msk [vmem:[%s5371_s12 + $0x30] sm:$0xf] %vm3297_vm3, %v3472_v27  ;;  %3311 = vst.msk [vmem:[%s5371_s12 + $0x34] sm:$0xf] %vm3297_vm3, %v3473_v9 }
0x3ade   :  { %v3150_v52 = vpop.f32.mrb[68].mxu1 }
0x3adf   :  { %v3157_v30 = vadd.f32 %v3150_v52, %v2344_v5  ;;  %v3825_v14 = vpop.f32.mrb[69].mxu1 }
0x3ae0   :  { %v3153_v15 = vpop.f32.mrb[70].mxu1 }
0x3ae1   :  { %4235 = vtanh.f32 %v3157_v30  ;;  %v3158_v43 = vadd.f32 %v3153_v15, %v2347_v11  ;;  %v3826_v40 = vpop.f32.mrb[71].mxu1  ;;  %v3454_v23 = vmul.f32 -1.442695, %v3157_v30 }
0x3ae3   :  { %4237 = vtanh.f32 %v3158_v43  ;;  %v3455_v62 = vmul.f32 -1.442695, %v3158_v43 }
0x3ae4   :  { %4239 = vpow2.f32 %v3454_v23 }
0x3ae5   :  { %4241 = vpow2.f32 %v3455_v62 }
0x3aeb   :  { %v4236_v20 = vpop.eup %4235 }
0x3aec   :  { %3177 = vrot.lane.b32.xlu1 %v4236_v20, %s4255_s30 }
0x3aed   :  { %v4238_v22 = vpop.eup %4237 }
0x3aee   :  { %3179 = vrot.lane.b32.xlu0 %v4238_v22, %s4255_s30  ;;  %v4240_v6 = vpop.eup %4239 }
0x3aef   :  { %v4242_v39 = vpop.eup %4241  ;;  %v3165_v10 = vadd.f32 1.0, %v4240_v6 }
0x3af0   :  { %v3166_v32 = vadd.f32 1.0, %v4242_v39 }
0x3af1   :  { %4243 = vrcp.f32 %v3165_v10 }
0x3af2   :  { %4245 = vrcp.f32 %v3166_v32 }
0x3afb   :  { %v4244_v16 = vpop.eup %4243 }
0x3afc   :  { %v4246_v31 = vpop.eup %4245  ;;  %v3173_v17 = vmul.f32 %v4244_v16, %v3091_v44 }
0x3afd   :  { %v3174_v41 = vmul.f32 %v4246_v31, %v3092_v37 }
0x3b5e   :  { %v3178_v25 = vpop.permute.xlu1 %3177 }
0x3b5f   :  { %v3183_v29 = vmul.f32 %v4244_v16, %v3178_v25 }
0x3b60   :  { %v3180_v59 = vpop.permute.xlu0 %3179 }
0x3b61   :  { %3187 = vrot.lane.b32.xlu1 %v3183_v29, %s4254_s26  ;;  %v3184_v12 = vmul.f32 %v4246_v31, %v3180_v59 }
0x3b63   :  { %3189 = vrot.lane.b32.xlu0 %v3184_v12, %s4254_s26 }
0x3bd3   :  { %v3188_v60 = vpop.permute.xlu1 %3187 }
0x3bd4   :  { %v3193_v38 = vadd.f32 %v3188_v60, %v3173_v17 }
0x3bd5   :  { %v3190_v28 = vpop.permute.xlu0 %3189 }
0x3bd6   :  { %4247 = vtanh.f32 %v3193_v38  ;;  %v3194_v34 = vadd.f32 %v3190_v28, %v3174_v41 }
0x3bd8   :  { %4249 = vtanh.f32 %v3194_v34 }
0x3be0   :  { %v4248_v36 = vpop.eup %4247 }
0x3be1   :  { %3199 = vrot.lane.b32.xlu1 %v4248_v36, %s4255_s30 }
0x3be2   :  { %v4250_v42 = vpop.eup %4249 }
0x3be3   :  { %3201 = vrot.lane.b32.xlu0 %v4250_v42, %s4255_s30 }
0x3be5   :  { %1147 = vrot.lane.b32.xlu1 %v4830_v50, %s4254_s26 }
0x3be7   :  { %1145 = vrot.lane.b32.xlu0 %v4828_v49, %s4254_s26 }
0x3be9   :  { %1157 = vrot.lane.b32.xlu1 %v4813_v19, %s4256_s4 }
0x3beb   :  { %1155 = vrot.lane.b32.xlu0 %v4808_v33, %s4256_s4 }
0x3bed   :  { %2182 = vrot.lane.b32.xlu1 %v5166_v26, %s4254_s26 }
0x3bef   :  { %2180 = vrot.lane.b32.xlu0 %v5164_v24, %s4254_s26 }
0x3bf3   :  { %2190 = vrot.lane.b32.xlu0 %v5144_v13, %s4256_s4 }
0x3c53   :  { %v3200_v50 = vpop.permute.xlu1 %3199 }
0x3c54   :  { %v3205_v18 = vmul.f32 %v4244_v16, %v3200_v50 }
0x3c55   :  { %v3202_v55 = vpop.permute.xlu0 %3201 }
0x3c56   :  { %3215 = vrot.lane.b32.xlu0 %v3205_v18, %s4254_s26  ;;  %v3206_v49 = vmul.f32 %v4246_v31, %v3202_v55 }
0x3c57   :  { %v1148_v3 = vpop.permute.xlu1 %1147 }
0x3c58   :  { %1152 = vst.msk [vmem:[%s5362_s13 + $0x8] sm:$0xff] %vm55_vm2, %v1148_v3  ;;  %v3207_v33 = vpack.c.bf16 %v3206_v49, %v3205_v18 }
0x3c59   :  { %v1146_v19 = vpop.permute.xlu0 %1145 }
0x3c5a   :  { %3225 = vrot.lane.b32.xlu0 %v3193_v38, %s4256_s4  ;;  %1151 = vst.msk [vmem:[%s5362_s13] sm:$0xff] %vm55_vm2, %v1146_v19  ;;  %3209 = vrot.lane.b32.xlu1 %v3207_v33, %s4254_s26 }
0x3c5b   :  { %v1158_v13 = vpop.permute.xlu1 %1157 }
0x3c5c   :  { %1162 = vst.msk [vmem:[%s5363_s14 + $0x8] sm:$0xff] %vm55_vm2, %v1158_v13 }
0x3c5d   :  { %v1156_v24 = vpop.permute.xlu0 %1155 }
0x3c5e   :  { %1161 = vst.msk [vmem:[%s5363_s14] sm:$0xff] %vm55_vm2, %v1156_v24  ;;  %2192 = vrot.lane.b32.xlu1 %v5149_v21, %s4256_s4 }
0x3c5f   :  { %v2183_v26 = vpop.permute.xlu1 %2182 }
0x3c60   :  { %3412 = vst.msk [vmem:[%s5362_s13 + $0x18] sm:$0xff] %vm55_vm2, %v2183_v26 }
0x3c61   :  { %v2181_v1 = vpop.permute.xlu0 %2180 }
0x3c62   :  { %3411 = vst.msk [vmem:[%s5362_s13 + $0x10] sm:$0xff] %vm55_vm2, %v2181_v1  ;;  %3217 = vrot.lane.b32.xlu1 %v3206_v49, %s4254_s26 }
0x3c65   :  { %v2191_v45 = vpop.permute.xlu0 %2190 }
0x3c66   :  { %3413 = vst.msk [vmem:[%s5363_s14 + $0x10] sm:$0xff] %vm55_vm2, %v2191_v45  ;;  %3227 = vrot.lane.b32.xlu1 %v3194_v34, %s4256_s4 }
0x3cc8   :  { %v3216_v21 = vpop.permute.xlu0 %3215 }
0x3cc9   :  { %3456 = vst.msk [vmem:[%s5362_s13 + $0x20] sm:$0xff] %vm55_vm2, %v3216_v21 }
0x3ccc   :  { %v3226_v35 = vpop.permute.xlu0 %3225  ;;  %v3210_v53 = vpop.permute.xlu1 %3209 }
0x3ccd   :  { %3458 = vst.msk [vmem:[%s5363_s14 + $0x20] sm:$0xff] %vm55_vm2, %v3226_v35  ;;  %3212 = vst.msk [vmem:[#allocation3 + $0x38] sm:$0xff] %vm55_vm2, %v3210_v53 }
0x3cd0   :  { %v2193_v54 = vpop.permute.xlu1 %2192 }
0x3cd1   :  { %3414 = vst.msk [vmem:[%s5363_s14 + $0x18] sm:$0xff] %vm55_vm2, %v2193_v54 }
0x3cd4   :  { %v3240_v0 = vld [vmem:[#allocation3 + $0x38] sm:$0xff]  ;;  %v3218_v58 = vpop.permute.xlu1 %3217 }
0x3cd5   :  { %v3474_v7 = vcombine.low %v3240_v0, %v3240_v0  ;;  %v3475_v44 = vcombine.high %v3240_v0, %v3240_v0  ;;  %3457 = vst.msk [vmem:[%s5362_s13 + $0x28] sm:$0xff] %vm55_vm2, %v3218_v58 }
0x3cd7   :  { %3312 = vst.msk [vmem:[%s5371_s12 + $0x38] sm:$0xf] %vm3297_vm3, %v3474_v7  ;;  %3313 = vst.msk [vmem:[%s5371_s12 + $0x3c] sm:$0xf] %vm3297_vm3, %v3475_v44 }
0x3cd8   :  { %v3228_v56 = vpop.permute.xlu1 %3227 }
0x3cd9   :  { %3459 = vst.msk [vmem:[%s5363_s14 + $0x28] sm:$0xff] %vm55_vm2, %v3228_v56 }

</bundles_post_ra>
